<compile_context>
chip_gen: v5e
topology: v5e:2x2
jax: 0.10.0
libtpu: 0.0.40
codegen_flags: <defaults>
</compile_context>

<pallas_src>
import math

import jax
import jax.numpy as jnp
from jax import lax
from jax.experimental import pallas as pl
from jax.experimental.pallas import tpu as pltpu


def _round_up(x, m):
    return (x + m - 1) // m * m


# ----------------------------------------------------------------------------
# Pallas kernel: tiled matmul + bias (+ optional ReLU), f32 accumulation.
# Used for the three linear layers (weights pre-transposed / pre-padded).
# ----------------------------------------------------------------------------
def _make_mm_kernel(relu):
    def kernel(a_ref, w_ref, b_ref, o_ref, acc_ref):
        k = pl.program_id(2)

        @pl.when(k == 0)
        def _init():
            acc_ref[...] = jnp.zeros_like(acc_ref)

        acc_ref[...] += jnp.dot(a_ref[...], w_ref[...],
                                preferred_element_type=jnp.float32)

        @pl.when(k == pl.num_programs(2) - 1)
        def _fin():
            out = acc_ref[...] + b_ref[...]
            if relu:
                out = jnp.maximum(out, 0.0)
            o_ref[...] = out.astype(o_ref.dtype)

    return kernel


def matmul_bias(a, w, b, *, relu, tk, tn, tm_target=512):
    """y = a @ w + b (optionally ReLU); w is (K, Np) pre-padded, b is (1, Np)."""
    M, K = a.shape
    Kw, Np = w.shape
    assert K == Kw and K % tk == 0 and Np % tn == 0, (a.shape, w.shape, tk, tn)

    tm = min(tm_target, _round_up(M, 8))
    Mp = _round_up(M, tm)
    a_p = jnp.pad(a, ((0, Mp - M), (0, 0))) if Mp != M else a

    grid = (Mp // tm, Np // tn, K // tk)
    out = pl.pallas_call(
        _make_mm_kernel(relu),
        out_shape=jax.ShapeDtypeStruct((Mp, Np), jnp.float32),
        grid=grid,
        in_specs=[
            pl.BlockSpec((tm, tk), lambda i, j, k: (i, k)),
            pl.BlockSpec((tk, tn), lambda i, j, k: (k, j)),
            pl.BlockSpec((1, tn), lambda i, j, k: (0, j)),
        ],
        out_specs=pl.BlockSpec((tm, tn), lambda i, j, k: (i, j)),
        scratch_shapes=[pltpu.VMEM((tm, tn), jnp.float32)],
        compiler_params=pltpu.CompilerParams(
            dimension_semantics=("parallel", "parallel", "arbitrary"),
            vmem_limit_bytes=48 * 1024 * 1024,
        ),
    )(a_p, w, b)
    return out if Mp == M else out[:M]


# ----------------------------------------------------------------------------
# conv1: 1->32 channels, 3x3, stride 1 + bias + ReLU + 2x2/2 maxpool.
# Direct VPU kernel on parity-split input (no im2col, no K=9 MXU GEMM, no
# pre-pool HBM round trip).  Output is NCHW (N, 32, 47, 47).
# ----------------------------------------------------------------------------
def _conv1_kernel(xee_ref, xeo_ref, xoe_ref, xoo_ref, w_ref, b_ref, o_ref):
    planes = ((xee_ref, xeo_ref), (xoe_ref, xoo_ref))   # planes[h%2][w%2]

    # Hoist the 16 distinct 47x47 shifted windows of the 4 parity planes.
    win = {}
    for p in (0, 1):
        for q in (0, 1):
            xv = planes[p][q][0]                          # (48, 48)
            for dr in (0, 1):
                for dc in (0, 1):
                    win[(p, dr, q, dc)] = xv[dr:dr + 47, dc:dc + 47]

    # For each output parity (a, b): which window each of the 9 taps reads.
    term_lists = []
    for a in (0, 1):
        for b in (0, 1):
            terms = []
            for i in range(3):
                for j in range(3):
                    key = ((a + i) % 2, (a + i) // 2, (b + j) % 2, (b + j) // 2)
                    terms.append((key, i * 3 + j))
            term_lists.append(terms)

    def body(oc, carry):
        pooled = None
        for terms in term_lists:
            acc = None
            for key, t in terms:
                v = win[key] * w_ref[t, oc]               # scalar (SMEM) * (47,47)
                acc = v if acc is None else acc + v
            pooled = acc if pooled is None else jnp.maximum(pooled, acc)
        o_ref[0, oc] = jnp.maximum(pooled + b_ref[oc], 0.0)
        return carry

    lax.fori_loop(0, 32, body, 0)


def conv1_relu_pool(x, w_smem, b_smem):
    """x: (N, 96, 96) f32 -> (N, 32, 47, 47) NCHW."""
    n = x.shape[0]
    parts = [x[:, p::2, q::2] for p in (0, 1) for q in (0, 1)]   # 4x (N, 48, 48)
    return pl.pallas_call(
        _conv1_kernel,
        out_shape=jax.ShapeDtypeStruct((n, 32, 47, 47), jnp.float32),
        grid=(n,),
        in_specs=[pl.BlockSpec((1, 48, 48), lambda i: (i, 0, 0))] * 4
        + [
            pl.BlockSpec(memory_space=pltpu.MemorySpace.SMEM),
            pl.BlockSpec(memory_space=pltpu.MemorySpace.SMEM),
        ],
        out_specs=pl.BlockSpec((1, 32, 47, 47), lambda i: (i, 0, 0, 0)),
        compiler_params=pltpu.CompilerParams(dimension_semantics=("parallel",)),
    )(*parts, w_smem, b_smem)


# ----------------------------------------------------------------------------
# conv2 / conv3: 2x2 conv + bias + ReLU + 2x2/2 maxpool in NHWC; taps folded
# in-kernel (patches built in VMEM, K = 4*IC MXU GEMM), pooling via the four
# output-parity planes (no compaction, no pre-pool HBM round trip).
# ----------------------------------------------------------------------------
def _make_conv2x2_pool_kernel(ph):
    taps = ((0, 0), (0, 1), (1, 0), (1, 1))

    def kernel(x00_ref, x01_ref, x10_ref, x11_ref, w_ref, b_ref, o_ref):
        planes = ((x00_ref, x01_ref), (x10_ref, x11_ref))
        w = w_ref[...]                                    # (4*IC, OC)
        bias = b_ref[...]                                 # (1, OC)

        def body(u, carry):
            pooled = None
            for a in (0, 1):
                for b in (0, 1):
                    parts = []
                    for i, j in taps:
                        p, dr = (a + i) % 2, (a + i) // 2
                        q, dc = (b + j) % 2, (b + j) // 2
                        row = planes[p][q][0, u + dr]      # (ph + 1, IC)
                        parts.append(row[dc:dc + ph, :])   # (ph, IC)
                    patch = jnp.concatenate(parts, axis=1)  # (ph, 4*IC)
                    y = jnp.dot(patch, w, preferred_element_type=jnp.float32)
                    pooled = y if pooled is None else jnp.maximum(pooled, y)
            o_ref[0, u] = jnp.maximum(pooled + bias, 0.0)
            return carry

        lax.fori_loop(0, ph, body, 0)

    return kernel


def conv2x2_relu_pool(x, w2, b2):
    """x: (N, H, H, IC) NHWC (H odd) -> (N, (H-1)//2, (H-1)//2, OC)."""
    n, h, _, ic = x.shape
    oc = w2.shape[1]
    ph = (h - 1) // 2
    g = ph + 1
    xp = jnp.pad(x, ((0, 0), (0, 1), (0, 1), (0, 0)))               # pad never read
    parts = [xp[:, p::2, q::2, :] for p in (0, 1) for q in (0, 1)]  # 4x (N, g, g, IC)
    return pl.pallas_call(
        _make_conv2x2_pool_kernel(ph),
        out_shape=jax.ShapeDtypeStruct((n, ph, ph, oc), jnp.float32),
        grid=(n,),
        in_specs=[pl.BlockSpec((1, g, g, ic), lambda i: (i, 0, 0, 0))] * 4
        + [
            pl.BlockSpec((4 * ic, oc), lambda i: (0, 0)),
            pl.BlockSpec((1, oc), lambda i: (0, 0)),
        ],
        out_specs=pl.BlockSpec((1, ph, ph, oc), lambda i: (i, 0, 0, 0)),
        compiler_params=pltpu.CompilerParams(dimension_semantics=("parallel",)),
    )(*parts, w2, b2)


# ----------------------------------------------------------------------------
# Parameters (PyTorch layouts) and one-time packing into kernel layouts.
# ----------------------------------------------------------------------------
def init_torch_params(key):
    def uni(k, shape, fan_in):
        bound = 1.0 / math.sqrt(fan_in)
        return jax.random.uniform(k, shape, jnp.float32, -bound, bound)

    ks = jax.random.split(key, 12)
    return {
        "conv1_w": uni(ks[0], (32, 1, 3, 3), 9),
        "conv1_b": uni(ks[1], (32,), 9),
        "conv2_w": uni(ks[2], (64, 32, 2, 2), 128),
        "conv2_b": uni(ks[3], (64,), 128),
        "conv3_w": uni(ks[4], (128, 64, 2, 2), 256),
        "conv3_b": uni(ks[5], (128,), 256),
        "lin1_w": uni(ks[6], (500, 15488), 15488),
        "lin1_b": uni(ks[7], (500,), 15488),
        "lin2_w": uni(ks[8], (500, 500), 500),
        "lin2_b": uni(ks[9], (500,), 500),
        "lin3_w": uni(ks[10], (30, 500), 500),
        "lin3_b": uni(ks[11], (30,), 500),
    }


def pack_params(t):
    """One-time repack into the layouts the kernels consume (exact math)."""
    p = {}
    # conv1 -> SMEM (9, 32) [row = i*3 + j, col = oc] and bias (32,).
    p["conv1_w"] = jnp.transpose(t["conv1_w"][:, 0], (1, 2, 0)).reshape(9, 32)
    p["conv1_b"] = t["conv1_b"]
    # conv2 / conv3 -> (kh*kw*IC, OC) with row index (i*kw + j)*IC + c.
    p["conv2_w"] = jnp.transpose(t["conv2_w"], (2, 3, 1, 0)).reshape(128, 64)
    p["conv2_b"] = t["conv2_b"].reshape(1, 64)
    p["conv3_w"] = jnp.transpose(t["conv3_w"], (2, 3, 1, 0)).reshape(256, 128)
    p["conv3_b"] = t["conv3_b"].reshape(1, 128)
    # lin1: rows permuted from PyTorch NCHW flatten order (c*121 + h*11 + w)
    # to the NHWC flatten order the conv3 kernel emits (h*1408 + w*128 + c),
    # then zero-padded to (15488, 512).
    w1 = jnp.transpose(t["lin1_w"].reshape(500, 128, 11, 11), (2, 3, 1, 0))
    w1 = w1.reshape(15488, 500)
    p["lin1_w"] = jnp.zeros((15488, 512), jnp.float32).at[:, :500].set(w1)
    p["lin1_b"] = jnp.zeros((1, 512), jnp.float32).at[0, :500].set(t["lin1_b"])
    p["lin2_w"] = jnp.zeros((512, 512), jnp.float32).at[:500, :500].set(t["lin2_w"].T)
    p["lin2_b"] = jnp.zeros((1, 512), jnp.float32).at[0, :500].set(t["lin2_b"])
    p["lin3_w"] = jnp.zeros((512, 128), jnp.float32).at[:500, :30].set(t["lin3_w"].T)
    p["lin3_b"] = jnp.zeros((1, 128), jnp.float32).at[0, :30].set(t["lin3_b"])
    return p


@jax.jit
def forward(x, params):
    x = x.reshape(-1, 96, 96)                      # (N, 1, 96, 96) with C=1 squeezed
    n = x.shape[0]

    y = conv1_relu_pool(x, params["conv1_w"], params["conv1_b"])     # (N,32,47,47)
    # TODO(synk): fold this small relayout into conv2's parity slicing.
    y = jnp.transpose(y, (0, 2, 3, 1))                               # (N,47,47,32)
    y = conv2x2_relu_pool(y, params["conv2_w"], params["conv2_b"])   # (N,23,23,64)
    y = conv2x2_relu_pool(y, params["conv3_w"], params["conv3_b"])   # (N,11,11,128)

    f = y.reshape(n, 15488)                        # NHWC flatten; lin1_w rows match

    h = matmul_bias(f, params["lin1_w"], params["lin1_b"], relu=True,
                    tk=1408, tn=(512 if n > 512 else 256))
    h = matmul_bias(h, params["lin2_w"], params["lin2_b"], relu=True,
                    tk=512, tn=512)
    h = matmul_bias(h, params["lin3_w"], params["lin3_b"], relu=False,
                    tk=512, tn=128)
    return h[:, :30]                               # drop lin3's zero-padded cols


# ----------------------------------------------------------------------------
# Pure-JAX reference (mirrors the PyTorch module) for a correctness check.
# ----------------------------------------------------------------------------
@jax.jit
def reference_forward(x, t):
    hi = jax.lax.Precision.HIGHEST

    def conv(x, w, b):
        y = jax.lax.conv_general_dilated(
            x, w, (1, 1), "VALID",
            dimension_numbers=("NCHW", "OIHW", "NCHW"), precision=hi)
        return y + b.reshape(1, -1, 1, 1)

    def pool(x):
        return jax.lax.reduce_window(x, -jnp.inf, jax.lax.max,
                                     (1, 1, 2, 2), (1, 1, 2, 2), "VALID")

    x = x.reshape(-1, 1, 96, 96)
    x = pool(jax.nn.relu(conv(x, t["conv1_w"], t["conv1_b"])))
    x = pool(jax.nn.relu(conv(x, t["conv2_w"], t["conv2_b"])))
    x = pool(jax.nn.relu(conv(x, t["conv3_w"], t["conv3_b"])))
    x = x.reshape(x.shape[0], 15488)
    x = jax.nn.relu(jnp.dot(x, t["lin1_w"].T, precision=hi) + t["lin1_b"])
    x = jax.nn.relu(jnp.dot(x, t["lin2_w"].T, precision=hi) + t["lin2_b"])
    return jnp.dot(x, t["lin3_w"].T, precision=hi) + t["lin3_b"]


if __name__ == "__main__":
    key = jax.random.PRNGKey(0)
    pkey, xkey = jax.random.split(key)
    torch_params = init_torch_params(pkey)
    params = pack_params(torch_params)

    batch = 2
    x = jax.random.normal(xkey, (batch, 96 * 96), dtype=jnp.float32)

    out = jax.block_until_ready(forward(x, params))
    assert out.shape == (batch, 30), out.shape
    assert bool(jnp.all(jnp.isfinite(out)))

    ref = jax.block_until_ready(reference_forward(x, torch_params))
    max_err = float(jnp.max(jnp.abs(out - ref)))
    assert max_err < 3e-2, f"mismatch vs pure-JAX reference: {max_err}"

    print("KERNEL_OK")
</pallas_src>

<mosaic_0001>
module attributes {stable_mosaic.version = 11 : i64} {
  func.func @_conv1_kernel(%arg0: i32, %arg1: memref<1x48x48xf32, #tpu.memory_space<vmem>>, %arg2: memref<1x48x48xf32, #tpu.memory_space<vmem>>, %arg3: memref<1x48x48xf32, #tpu.memory_space<vmem>>, %arg4: memref<1x48x48xf32, #tpu.memory_space<vmem>>, %arg5: memref<9x32xf32, #tpu.memory_space<smem>>, %arg6: memref<32xf32, #tpu.memory_space<smem>>, %arg7: memref<1x32x47x47xf32, #tpu.memory_space<vmem>>) attributes {dimension_semantics = [#tpu.dimension_semantics<parallel>], iteration_bounds = array<i64: 2>, scalar_prefetch = 0 : i64, scratch_operands = 0 : i64, tpu.core_type = #tpu.core_type<tc>, window_params = [{transform_indices = @transform_0, window_bounds = array<i64: 1, 48, 48>}, {transform_indices = @transform_1, window_bounds = array<i64: 1, 48, 48>}, {transform_indices = @transform_2, window_bounds = array<i64: 1, 48, 48>}, {transform_indices = @transform_3, window_bounds = array<i64: 1, 48, 48>}, {transform_indices = @transform_4, window_bounds = array<i64: 9, 32>}, {transform_indices = @transform_5, window_bounds = array<i64: 32>}, {transform_indices = @transform_6, window_bounds = array<i64: 1, 32, 47, 47>}]} {
    %c0 = arith.constant 0 : index
    %c0_0 = arith.constant 0 : index
    %c0_1 = arith.constant 0 : index
    %0 = vector.load %arg1[%c0, %c0_0, %c0_1] : memref<1x48x48xf32, #tpu.memory_space<vmem>>, vector<1x48x48xf32>
    %1 = vector.shape_cast %0 : vector<1x48x48xf32> to vector<48x48xf32>
    %2 = vector.extract_strided_slice %1 {offsets = [0, 0], sizes = [47, 47], strides = [1, 1]} : vector<48x48xf32> to vector<47x47xf32>
    %3 = vector.extract_strided_slice %1 {offsets = [0, 1], sizes = [47, 47], strides = [1, 1]} : vector<48x48xf32> to vector<47x47xf32>
    %4 = vector.extract_strided_slice %1 {offsets = [1, 0], sizes = [47, 47], strides = [1, 1]} : vector<48x48xf32> to vector<47x47xf32>
    %5 = vector.extract_strided_slice %1 {offsets = [1, 1], sizes = [47, 47], strides = [1, 1]} : vector<48x48xf32> to vector<47x47xf32>
    %c0_2 = arith.constant 0 : index
    %c0_3 = arith.constant 0 : index
    %c0_4 = arith.constant 0 : index
    %6 = vector.load %arg2[%c0_2, %c0_3, %c0_4] : memref<1x48x48xf32, #tpu.memory_space<vmem>>, vector<1x48x48xf32>
    %7 = vector.shape_cast %6 : vector<1x48x48xf32> to vector<48x48xf32>
    %8 = vector.extract_strided_slice %7 {offsets = [0, 0], sizes = [47, 47], strides = [1, 1]} : vector<48x48xf32> to vector<47x47xf32>
    %9 = vector.extract_strided_slice %7 {offsets = [0, 1], sizes = [47, 47], strides = [1, 1]} : vector<48x48xf32> to vector<47x47xf32>
    %10 = vector.extract_strided_slice %7 {offsets = [1, 0], sizes = [47, 47], strides = [1, 1]} : vector<48x48xf32> to vector<47x47xf32>
    %11 = vector.extract_strided_slice %7 {offsets = [1, 1], sizes = [47, 47], strides = [1, 1]} : vector<48x48xf32> to vector<47x47xf32>
    %c0_5 = arith.constant 0 : index
    %c0_6 = arith.constant 0 : index
    %c0_7 = arith.constant 0 : index
    %12 = vector.load %arg3[%c0_5, %c0_6, %c0_7] : memref<1x48x48xf32, #tpu.memory_space<vmem>>, vector<1x48x48xf32>
    %13 = vector.shape_cast %12 : vector<1x48x48xf32> to vector<48x48xf32>
    %14 = vector.extract_strided_slice %13 {offsets = [0, 0], sizes = [47, 47], strides = [1, 1]} : vector<48x48xf32> to vector<47x47xf32>
    %15 = vector.extract_strided_slice %13 {offsets = [0, 1], sizes = [47, 47], strides = [1, 1]} : vector<48x48xf32> to vector<47x47xf32>
    %16 = vector.extract_strided_slice %13 {offsets = [1, 0], sizes = [47, 47], strides = [1, 1]} : vector<48x48xf32> to vector<47x47xf32>
    %17 = vector.extract_strided_slice %13 {offsets = [1, 1], sizes = [47, 47], strides = [1, 1]} : vector<48x48xf32> to vector<47x47xf32>
    %c0_8 = arith.constant 0 : index
    %c0_9 = arith.constant 0 : index
    %c0_10 = arith.constant 0 : index
    %18 = vector.load %arg4[%c0_8, %c0_9, %c0_10] : memref<1x48x48xf32, #tpu.memory_space<vmem>>, vector<1x48x48xf32>
    %19 = vector.shape_cast %18 : vector<1x48x48xf32> to vector<48x48xf32>
    %20 = vector.extract_strided_slice %19 {offsets = [0, 0], sizes = [47, 47], strides = [1, 1]} : vector<48x48xf32> to vector<47x47xf32>
    %21 = vector.extract_strided_slice %19 {offsets = [0, 1], sizes = [47, 47], strides = [1, 1]} : vector<48x48xf32> to vector<47x47xf32>
    %22 = vector.extract_strided_slice %19 {offsets = [1, 0], sizes = [47, 47], strides = [1, 1]} : vector<48x48xf32> to vector<47x47xf32>
    %23 = vector.extract_strided_slice %19 {offsets = [1, 1], sizes = [47, 47], strides = [1, 1]} : vector<48x48xf32> to vector<47x47xf32>
    %c0_i32 = arith.constant 0 : i32
    %c32_i32 = arith.constant 32 : i32
    %24 = arith.addi %c0_i32, %c32_i32 : i32
    %c1_i32 = arith.constant 1 : i32
    scf.for %arg8 = %c0_i32 to %24 step %c1_i32  : i32 {
      %c0_12 = arith.constant 0 : index
      %25 = arith.index_cast %arg8 : i32 to index
      %26 = memref.load %arg5[%c0_12, %25] : memref<9x32xf32, #tpu.memory_space<smem>>
      %27 = vector.broadcast %26 : f32 to vector<47x47xf32>
      %28 = arith.mulf %2, %27 : vector<47x47xf32>
      %c1 = arith.constant 1 : index
      %29 = arith.index_cast %arg8 : i32 to index
      %30 = memref.load %arg5[%c1, %29] : memref<9x32xf32, #tpu.memory_space<smem>>
      %31 = vector.broadcast %30 : f32 to vector<47x47xf32>
      %32 = arith.mulf %8, %31 : vector<47x47xf32>
      %33 = arith.addf %28, %32 : vector<47x47xf32>
      %c2 = arith.constant 2 : index
      %34 = arith.index_cast %arg8 : i32 to index
      %35 = memref.load %arg5[%c2, %34] : memref<9x32xf32, #tpu.memory_space<smem>>
      %36 = vector.broadcast %35 : f32 to vector<47x47xf32>
      %37 = arith.mulf %3, %36 : vector<47x47xf32>
      %38 = arith.addf %33, %37 : vector<47x47xf32>
      %c3 = arith.constant 3 : index
      %39 = arith.index_cast %arg8 : i32 to index
      %40 = memref.load %arg5[%c3, %39] : memref<9x32xf32, #tpu.memory_space<smem>>
      %41 = vector.broadcast %40 : f32 to vector<47x47xf32>
      %42 = arith.mulf %14, %41 : vector<47x47xf32>
      %43 = arith.addf %38, %42 : vector<47x47xf32>
      %c4 = arith.constant 4 : index
      %44 = arith.index_cast %arg8 : i32 to index
      %45 = memref.load %arg5[%c4, %44] : memref<9x32xf32, #tpu.memory_space<smem>>
      %46 = vector.broadcast %45 : f32 to vector<47x47xf32>
      %47 = arith.mulf %20, %46 : vector<47x47xf32>
      %48 = arith.addf %43, %47 : vector<47x47xf32>
      %c5 = arith.constant 5 : index
      %49 = arith.index_cast %arg8 : i32 to index
      %50 = memref.load %arg5[%c5, %49] : memref<9x32xf32, #tpu.memory_space<smem>>
      %51 = vector.broadcast %50 : f32 to vector<47x47xf32>
      %52 = arith.mulf %15, %51 : vector<47x47xf32>
      %53 = arith.addf %48, %52 : vector<47x47xf32>
      %c6 = arith.constant 6 : index
      %54 = arith.index_cast %arg8 : i32 to index
      %55 = memref.load %arg5[%c6, %54] : memref<9x32xf32, #tpu.memory_space<smem>>
      %56 = vector.broadcast %55 : f32 to vector<47x47xf32>
      %57 = arith.mulf %4, %56 : vector<47x47xf32>
      %58 = arith.addf %53, %57 : vector<47x47xf32>
      %c7 = arith.constant 7 : index
      %59 = arith.index_cast %arg8 : i32 to index
      %60 = memref.load %arg5[%c7, %59] : memref<9x32xf32, #tpu.memory_space<smem>>
      %61 = vector.broadcast %60 : f32 to vector<47x47xf32>
      %62 = arith.mulf %10, %61 : vector<47x47xf32>
      %63 = arith.addf %58, %62 : vector<47x47xf32>
      %c8 = arith.constant 8 : index
      %64 = arith.index_cast %arg8 : i32 to index
      %65 = memref.load %arg5[%c8, %64] : memref<9x32xf32, #tpu.memory_space<smem>>
      %66 = vector.broadcast %65 : f32 to vector<47x47xf32>
      %67 = arith.mulf %5, %66 : vector<47x47xf32>
      %68 = arith.addf %63, %67 : vector<47x47xf32>
      %c0_13 = arith.constant 0 : index
      %69 = arith.index_cast %arg8 : i32 to index
      %70 = memref.load %arg5[%c0_13, %69] : memref<9x32xf32, #tpu.memory_space<smem>>
      %71 = vector.broadcast %70 : f32 to vector<47x47xf32>
      %72 = arith.mulf %8, %71 : vector<47x47xf32>
      %c1_14 = arith.constant 1 : index
      %73 = arith.index_cast %arg8 : i32 to index
      %74 = memref.load %arg5[%c1_14, %73] : memref<9x32xf32, #tpu.memory_space<smem>>
      %75 = vector.broadcast %74 : f32 to vector<47x47xf32>
      %76 = arith.mulf %3, %75 : vector<47x47xf32>
      %77 = arith.addf %72, %76 : vector<47x47xf32>
      %c2_15 = arith.constant 2 : index
      %78 = arith.index_cast %arg8 : i32 to index
      %79 = memref.load %arg5[%c2_15, %78] : memref<9x32xf32, #tpu.memory_space<smem>>
      %80 = vector.broadcast %79 : f32 to vector<47x47xf32>
      %81 = arith.mulf %9, %80 : vector<47x47xf32>
      %82 = arith.addf %77, %81 : vector<47x47xf32>
      %c3_16 = arith.constant 3 : index
      %83 = arith.index_cast %arg8 : i32 to index
      %84 = memref.load %arg5[%c3_16, %83] : memref<9x32xf32, #tpu.memory_space<smem>>
      %85 = vector.broadcast %84 : f32 to vector<47x47xf32>
      %86 = arith.mulf %20, %85 : vector<47x47xf32>
      %87 = arith.addf %82, %86 : vector<47x47xf32>
      %c4_17 = arith.constant 4 : index
      %88 = arith.index_cast %arg8 : i32 to index
      %89 = memref.load %arg5[%c4_17, %88] : memref<9x32xf32, #tpu.memory_space<smem>>
      %90 = vector.broadcast %89 : f32 to vector<47x47xf32>
      %91 = arith.mulf %15, %90 : vector<47x47xf32>
      %92 = arith.addf %87, %91 : vector<47x47xf32>
      %c5_18 = arith.constant 5 : index
      %93 = arith.index_cast %arg8 : i32 to index
      %94 = memref.load %arg5[%c5_18, %93] : memref<9x32xf32, #tpu.memory_space<smem>>
      %95 = vector.broadcast %94 : f32 to vector<47x47xf32>
      %96 = arith.mulf %21, %95 : vector<47x47xf32>
      %97 = arith.addf %92, %96 : vector<47x47xf32>
      %c6_19 = arith.constant 6 : index
      %98 = arith.index_cast %arg8 : i32 to index
      %99 = memref.load %arg5[%c6_19, %98] : memref<9x32xf32, #tpu.memory_space<smem>>
      %100 = vector.broadcast %99 : f32 to vector<47x47xf32>
      %101 = arith.mulf %10, %100 : vector<47x47xf32>
      %102 = arith.addf %97, %101 : vector<47x47xf32>
      %c7_20 = arith.constant 7 : index
      %103 = arith.index_cast %arg8 : i32 to index
      %104 = memref.load %arg5[%c7_20, %103] : memref<9x32xf32, #tpu.memory_space<smem>>
      %105 = vector.broadcast %104 : f32 to vector<47x47xf32>
      %106 = arith.mulf %5, %105 : vector<47x47xf32>
      %107 = arith.addf %102, %106 : vector<47x47xf32>
      %c8_21 = arith.constant 8 : index
      %108 = arith.index_cast %arg8 : i32 to index
      %109 = memref.load %arg5[%c8_21, %108] : memref<9x32xf32, #tpu.memory_space<smem>>
      %110 = vector.broadcast %109 : f32 to vector<47x47xf32>
      %111 = arith.mulf %11, %110 : vector<47x47xf32>
      %112 = arith.addf %107, %111 : vector<47x47xf32>
      %113 = arith.maximumf %68, %112 : vector<47x47xf32>
      %c0_22 = arith.constant 0 : index
      %114 = arith.index_cast %arg8 : i32 to index
      %115 = memref.load %arg5[%c0_22, %114] : memref<9x32xf32, #tpu.memory_space<smem>>
      %116 = vector.broadcast %115 : f32 to vector<47x47xf32>
      %117 = arith.mulf %14, %116 : vector<47x47xf32>
      %c1_23 = arith.constant 1 : index
      %118 = arith.index_cast %arg8 : i32 to index
      %119 = memref.load %arg5[%c1_23, %118] : memref<9x32xf32, #tpu.memory_space<smem>>
      %120 = vector.broadcast %119 : f32 to vector<47x47xf32>
      %121 = arith.mulf %20, %120 : vector<47x47xf32>
      %122 = arith.addf %117, %121 : vector<47x47xf32>
      %c2_24 = arith.constant 2 : index
      %123 = arith.index_cast %arg8 : i32 to index
      %124 = memref.load %arg5[%c2_24, %123] : memref<9x32xf32, #tpu.memory_space<smem>>
      %125 = vector.broadcast %124 : f32 to vector<47x47xf32>
      %126 = arith.mulf %15, %125 : vector<47x47xf32>
      %127 = arith.addf %122, %126 : vector<47x47xf32>
      %c3_25 = arith.constant 3 : index
      %128 = arith.index_cast %arg8 : i32 to index
      %129 = memref.load %arg5[%c3_25, %128] : memref<9x32xf32, #tpu.memory_space<smem>>
      %130 = vector.broadcast %129 : f32 to vector<47x47xf32>
      %131 = arith.mulf %4, %130 : vector<47x47xf32>
      %132 = arith.addf %127, %131 : vector<47x47xf32>
      %c4_26 = arith.constant 4 : index
      %133 = arith.index_cast %arg8 : i32 to index
      %134 = memref.load %arg5[%c4_26, %133] : memref<9x32xf32, #tpu.memory_space<smem>>
      %135 = vector.broadcast %134 : f32 to vector<47x47xf32>
      %136 = arith.mulf %10, %135 : vector<47x47xf32>
      %137 = arith.addf %132, %136 : vector<47x47xf32>
      %c5_27 = arith.constant 5 : index
      %138 = arith.index_cast %arg8 : i32 to index
      %139 = memref.load %arg5[%c5_27, %138] : memref<9x32xf32, #tpu.memory_space<smem>>
      %140 = vector.broadcast %139 : f32 to vector<47x47xf32>
      %141 = arith.mulf %5, %140 : vector<47x47xf32>
      %142 = arith.addf %137, %141 : vector<47x47xf32>
      %c6_28 = arith.constant 6 : index
      %143 = arith.index_cast %arg8 : i32 to index
      %144 = memref.load %arg5[%c6_28, %143] : memref<9x32xf32, #tpu.memory_space<smem>>
      %145 = vector.broadcast %144 : f32 to vector<47x47xf32>
      %146 = arith.mulf %16, %145 : vector<47x47xf32>
      %147 = arith.addf %142, %146 : vector<47x47xf32>
      %c7_29 = arith.constant 7 : index
      %148 = arith.index_cast %arg8 : i32 to index
      %149 = memref.load %arg5[%c7_29, %148] : memref<9x32xf32, #tpu.memory_space<smem>>
      %150 = vector.broadcast %149 : f32 to vector<47x47xf32>
      %151 = arith.mulf %22, %150 : vector<47x47xf32>
      %152 = arith.addf %147, %151 : vector<47x47xf32>
      %c8_30 = arith.constant 8 : index
      %153 = arith.index_cast %arg8 : i32 to index
      %154 = memref.load %arg5[%c8_30, %153] : memref<9x32xf32, #tpu.memory_space<smem>>
      %155 = vector.broadcast %154 : f32 to vector<47x47xf32>
      %156 = arith.mulf %17, %155 : vector<47x47xf32>
      %157 = arith.addf %152, %156 : vector<47x47xf32>
      %158 = arith.maximumf %113, %157 : vector<47x47xf32>
      %c0_31 = arith.constant 0 : index
      %159 = arith.index_cast %arg8 : i32 to index
      %160 = memref.load %arg5[%c0_31, %159] : memref<9x32xf32, #tpu.memory_space<smem>>
      %161 = vector.broadcast %160 : f32 to vector<47x47xf32>
      %162 = arith.mulf %20, %161 : vector<47x47xf32>
      %c1_32 = arith.constant 1 : index
      %163 = arith.index_cast %arg8 : i32 to index
      %164 = memref.load %arg5[%c1_32, %163] : memref<9x32xf32, #tpu.memory_space<smem>>
      %165 = vector.broadcast %164 : f32 to vector<47x47xf32>
      %166 = arith.mulf %15, %165 : vector<47x47xf32>
      %167 = arith.addf %162, %166 : vector<47x47xf32>
      %c2_33 = arith.constant 2 : index
      %168 = arith.index_cast %arg8 : i32 to index
      %169 = memref.load %arg5[%c2_33, %168] : memref<9x32xf32, #tpu.memory_space<smem>>
      %170 = vector.broadcast %169 : f32 to vector<47x47xf32>
      %171 = arith.mulf %21, %170 : vector<47x47xf32>
      %172 = arith.addf %167, %171 : vector<47x47xf32>
      %c3_34 = arith.constant 3 : index
      %173 = arith.index_cast %arg8 : i32 to index
      %174 = memref.load %arg5[%c3_34, %173] : memref<9x32xf32, #tpu.memory_space<smem>>
      %175 = vector.broadcast %174 : f32 to vector<47x47xf32>
      %176 = arith.mulf %10, %175 : vector<47x47xf32>
      %177 = arith.addf %172, %176 : vector<47x47xf32>
      %c4_35 = arith.constant 4 : index
      %178 = arith.index_cast %arg8 : i32 to index
      %179 = memref.load %arg5[%c4_35, %178] : memref<9x32xf32, #tpu.memory_space<smem>>
      %180 = vector.broadcast %179 : f32 to vector<47x47xf32>
      %181 = arith.mulf %5, %180 : vector<47x47xf32>
      %182 = arith.addf %177, %181 : vector<47x47xf32>
      %c5_36 = arith.constant 5 : index
      %183 = arith.index_cast %arg8 : i32 to index
      %184 = memref.load %arg5[%c5_36, %183] : memref<9x32xf32, #tpu.memory_space<smem>>
      %185 = vector.broadcast %184 : f32 to vector<47x47xf32>
      %186 = arith.mulf %11, %185 : vector<47x47xf32>
      %187 = arith.addf %182, %186 : vector<47x47xf32>
      %c6_37 = arith.constant 6 : index
      %188 = arith.index_cast %arg8 : i32 to index
      %189 = memref.load %arg5[%c6_37, %188] : memref<9x32xf32, #tpu.memory_space<smem>>
      %190 = vector.broadcast %189 : f32 to vector<47x47xf32>
      %191 = arith.mulf %22, %190 : vector<47x47xf32>
      %192 = arith.addf %187, %191 : vector<47x47xf32>
      %c7_38 = arith.constant 7 : index
      %193 = arith.index_cast %arg8 : i32 to index
      %194 = memref.load %arg5[%c7_38, %193] : memref<9x32xf32, #tpu.memory_space<smem>>
      %195 = vector.broadcast %194 : f32 to vector<47x47xf32>
      %196 = arith.mulf %17, %195 : vector<47x47xf32>
      %197 = arith.addf %192, %196 : vector<47x47xf32>
      %c8_39 = arith.constant 8 : index
      %198 = arith.index_cast %arg8 : i32 to index
      %199 = memref.load %arg5[%c8_39, %198] : memref<9x32xf32, #tpu.memory_space<smem>>
      %200 = vector.broadcast %199 : f32 to vector<47x47xf32>
      %201 = arith.mulf %23, %200 : vector<47x47xf32>
      %202 = arith.addf %197, %201 : vector<47x47xf32>
      %203 = arith.maximumf %158, %202 : vector<47x47xf32>
      %204 = arith.index_cast %arg8 : i32 to index
      %205 = memref.load %arg6[%204] : memref<32xf32, #tpu.memory_space<smem>>
      %206 = vector.broadcast %205 : f32 to vector<47x47xf32>
      %207 = arith.addf %203, %206 : vector<47x47xf32>
      %cst = arith.constant 0.000000e+00 : f32
      %208 = vector.broadcast %cst : f32 to vector<47x47xf32>
      %209 = arith.maximumf %207, %208 : vector<47x47xf32>
      %c0_40 = arith.constant 0 : index
      %210 = arith.index_cast %arg8 : i32 to index
      %c0_41 = arith.constant 0 : index
      %c0_42 = arith.constant 0 : index
      %211 = vector.load %arg7[%c0_40, %210, %c0_41, %c0_42] : memref<1x32x47x47xf32, #tpu.memory_space<vmem>>, vector<1x1x47x47xf32>
      %212 = vector.shape_cast %211 : vector<1x1x47x47xf32> to vector<47x47xf32>
      %213 = vector.shape_cast %209 : vector<47x47xf32> to vector<1x1x47x47xf32>
      tpu.vector_store %arg7[%c0_40, %210, %c0_41, %c0_42], %213 {strides = array<i32>} : memref<1x32x47x47xf32, #tpu.memory_space<vmem>>, vector<1x1x47x47xf32>,
    }
    %c32_i32_11 = arith.constant 32 : i32
    return
  }
  func.func @transform_0(%arg0: i32) -> (i32, i32, i32) {
    %c0_i32 = arith.constant 0 : i32
    %c0_i32_0 = arith.constant 0 : i32
    %c0_i32_1 = arith.constant 0 : i32
    return %arg0, %c0_i32, %c0_i32_0 : i32, i32, i32
  }
  func.func @transform_1(%arg0: i32) -> (i32, i32, i32) {
    %c0_i32 = arith.constant 0 : i32
    %c0_i32_0 = arith.constant 0 : i32
    %c0_i32_1 = arith.constant 0 : i32
    return %arg0, %c0_i32, %c0_i32_0 : i32, i32, i32
  }
  func.func @transform_2(%arg0: i32) -> (i32, i32, i32) {
    %c0_i32 = arith.constant 0 : i32
    %c0_i32_0 = arith.constant 0 : i32
    %c0_i32_1 = arith.constant 0 : i32
    return %arg0, %c0_i32, %c0_i32_0 : i32, i32, i32
  }
  func.func @transform_3(%arg0: i32) -> (i32, i32, i32) {
    %c0_i32 = arith.constant 0 : i32
    %c0_i32_0 = arith.constant 0 : i32
    %c0_i32_1 = arith.constant 0 : i32
    return %arg0, %c0_i32, %c0_i32_0 : i32, i32, i32
  }
  func.func @transform_4(%arg0: i32) -> (i32, i32) {
    %c0_i32 = arith.constant 0 : i32
    %c0_i32_0 = arith.constant 0 : i32
    %c0_i32_1 = arith.constant 0 : i32
    return %c0_i32, %c0_i32_0 : i32, i32
  }
  func.func @transform_5(%arg0: i32) -> i32 {
    %c0_i32 = arith.constant 0 : i32
    %c0_i32_0 = arith.constant 0 : i32
    return %c0_i32 : i32
  }
  func.func @transform_6(%arg0: i32) -> (i32, i32, i32, i32) {
    %c0_i32 = arith.constant 0 : i32
    %c0_i32_0 = arith.constant 0 : i32
    %c0_i32_1 = arith.constant 0 : i32
    %c0_i32_2 = arith.constant 0 : i32
    return %arg0, %c0_i32, %c0_i32_0, %c0_i32_1 : i32, i32, i32, i32
  }
}

module attributes {stable_mosaic.version = 11 : i64} {
  func.func @kernel(%arg0: i32, %arg1: memref<1x24x24x32xf32, #tpu.memory_space<vmem>>, %arg2: memref<1x24x24x32xf32, #tpu.memory_space<vmem>>, %arg3: memref<1x24x24x32xf32, #tpu.memory_space<vmem>>, %arg4: memref<1x24x24x32xf32, #tpu.memory_space<vmem>>, %arg5: memref<128x64xf32, #tpu.memory_space<vmem>>, %arg6: memref<1x64xf32, #tpu.memory_space<vmem>>, %arg7: memref<1x23x23x64xf32, #tpu.memory_space<vmem>>) attributes {dimension_semantics = [#tpu.dimension_semantics<parallel>], iteration_bounds = array<i64: 2>, scalar_prefetch = 0 : i64, scratch_operands = 0 : i64, tpu.core_type = #tpu.core_type<tc>, window_params = [{transform_indices = @transform_0, window_bounds = array<i64: 1, 24, 24, 32>}, {transform_indices = @transform_1, window_bounds = array<i64: 1, 24, 24, 32>}, {transform_indices = @transform_2, window_bounds = array<i64: 1, 24, 24, 32>}, {transform_indices = @transform_3, window_bounds = array<i64: 1, 24, 24, 32>}, {pipeline_mode = #tpu.pipeline_mode<synchronous>, transform_indices = @transform_4, window_bounds = array<i64: 128, 64>}, {pipeline_mode = #tpu.pipeline_mode<synchronous>, transform_indices = @transform_5, window_bounds = array<i64: 1, 64>}, {transform_indices = @transform_6, window_bounds = array<i64: 1, 23, 23, 64>}]} {
    %c0 = arith.constant 0 : index
    %c0_0 = arith.constant 0 : index
    %0 = vector.load %arg5[%c0, %c0_0] : memref<128x64xf32, #tpu.memory_space<vmem>>, vector<128x64xf32>
    %c0_1 = arith.constant 0 : index
    %c0_2 = arith.constant 0 : index
    %1 = vector.load %arg6[%c0_1, %c0_2] : memref<1x64xf32, #tpu.memory_space<vmem>>, vector<1x64xf32>
    %c0_i32 = arith.constant 0 : i32
    %c23_i32 = arith.constant 23 : i32
    %2 = arith.addi %c0_i32, %c23_i32 : i32
    %c1_i32 = arith.constant 1 : i32
    scf.for %arg8 = %c0_i32 to %2 step %c1_i32  : i32 {
      %c0_i32_4 = arith.constant 0 : i32
      %3 = arith.addi %arg8, %c0_i32_4 : i32
      %c0_5 = arith.constant 0 : index
      %4 = arith.index_cast %3 : i32 to index
      %c0_6 = arith.constant 0 : index
      %c0_7 = arith.constant 0 : index
      %5 = vector.load %arg1[%c0_5, %4, %c0_6, %c0_7] : memref<1x24x24x32xf32, #tpu.memory_space<vmem>>, vector<1x1x24x32xf32>
      %6 = vector.shape_cast %5 : vector<1x1x24x32xf32> to vector<24x32xf32>
      %7 = vector.extract_strided_slice %6 {offsets = [0, 0], sizes = [23, 32], strides = [1, 1]} : vector<24x32xf32> to vector<23x32xf32>
      %c0_i32_8 = arith.constant 0 : i32
      %8 = arith.addi %arg8, %c0_i32_8 : i32
      %c0_9 = arith.constant 0 : index
      %9 = arith.index_cast %8 : i32 to index
      %c0_10 = arith.constant 0 : index
      %c0_11 = arith.constant 0 : index
      %10 = vector.load %arg2[%c0_9, %9, %c0_10, %c0_11] : memref<1x24x24x32xf32, #tpu.memory_space<vmem>>, vector<1x1x24x32xf32>
      %11 = vector.shape_cast %10 : vector<1x1x24x32xf32> to vector<24x32xf32>
      %12 = vector.extract_strided_slice %11 {offsets = [0, 0], sizes = [23, 32], strides = [1, 1]} : vector<24x32xf32> to vector<23x32xf32>
      %c0_i32_12 = arith.constant 0 : i32
      %13 = arith.addi %arg8, %c0_i32_12 : i32
      %c0_13 = arith.constant 0 : index
      %14 = arith.index_cast %13 : i32 to index
      %c0_14 = arith.constant 0 : index
      %c0_15 = arith.constant 0 : index
      %15 = vector.load %arg3[%c0_13, %14, %c0_14, %c0_15] : memref<1x24x24x32xf32, #tpu.memory_space<vmem>>, vector<1x1x24x32xf32>
      %16 = vector.shape_cast %15 : vector<1x1x24x32xf32> to vector<24x32xf32>
      %17 = vector.extract_strided_slice %16 {offsets = [0, 0], sizes = [23, 32], strides = [1, 1]} : vector<24x32xf32> to vector<23x32xf32>
      %c0_i32_16 = arith.constant 0 : i32
      %18 = arith.addi %arg8, %c0_i32_16 : i32
      %c0_17 = arith.constant 0 : index
      %19 = arith.index_cast %18 : i32 to index
      %c0_18 = arith.constant 0 : index
      %c0_19 = arith.constant 0 : index
      %20 = vector.load %arg4[%c0_17, %19, %c0_18, %c0_19] : memref<1x24x24x32xf32, #tpu.memory_space<vmem>>, vector<1x1x24x32xf32>
      %21 = vector.shape_cast %20 : vector<1x1x24x32xf32> to vector<24x32xf32>
      %22 = vector.extract_strided_slice %21 {offsets = [0, 0], sizes = [23, 32], strides = [1, 1]} : vector<24x32xf32> to vector<23x32xf32>
      %23 = tpu.concatenate %7, %12, %17, %22 in 1 : vector<23x32xf32>, vector<23x32xf32>, vector<23x32xf32>, vector<23x32xf32> -> vector<23x128xf32>
      %cst = arith.constant dense<0.000000e+00> : vector<23x64xf32>
      %24 = tpu.matmul %23, %0, %cst {dimension_numbers = #tpu.dot_dimension_numbers<[1], [0], [0], [1], [0, 0, 1, 1], [], []>} : vector<23x128xf32>, vector<128x64xf32>, vector<23x64xf32> -> vector<23x64xf32>
      %c0_i32_20 = arith.constant 0 : i32
      %25 = arith.addi %arg8, %c0_i32_20 : i32
      %c0_21 = arith.constant 0 : index
      %26 = arith.index_cast %25 : i32 to index
      %c0_22 = arith.constant 0 : index
      %c0_23 = arith.constant 0 : index
      %27 = vector.load %arg2[%c0_21, %26, %c0_22, %c0_23] : memref<1x24x24x32xf32, #tpu.memory_space<vmem>>, vector<1x1x24x32xf32>
      %28 = vector.shape_cast %27 : vector<1x1x24x32xf32> to vector<24x32xf32>
      %29 = vector.extract_strided_slice %28 {offsets = [0, 0], sizes = [23, 32], strides = [1, 1]} : vector<24x32xf32> to vector<23x32xf32>
      %c0_i32_24 = arith.constant 0 : i32
      %30 = arith.addi %arg8, %c0_i32_24 : i32
      %c0_25 = arith.constant 0 : index
      %31 = arith.index_cast %30 : i32 to index
      %c0_26 = arith.constant 0 : index
      %c0_27 = arith.constant 0 : index
      %32 = vector.load %arg1[%c0_25, %31, %c0_26, %c0_27] : memref<1x24x24x32xf32, #tpu.memory_space<vmem>>, vector<1x1x24x32xf32>
      %33 = vector.shape_cast %32 : vector<1x1x24x32xf32> to vector<24x32xf32>
      %34 = vector.extract_strided_slice %33 {offsets = [1, 0], sizes = [23, 32], strides = [1, 1]} : vector<24x32xf32> to vector<23x32xf32>
      %c0_i32_28 = arith.constant 0 : i32
      %35 = arith.addi %arg8, %c0_i32_28 : i32
      %c0_29 = arith.constant 0 : index
      %36 = arith.index_cast %35 : i32 to index
      %c0_30 = arith.constant 0 : index
      %c0_31 = arith.constant 0 : index
      %37 = vector.load %arg4[%c0_29, %36, %c0_30, %c0_31] : memref<1x24x24x32xf32, #tpu.memory_space<vmem>>, vector<1x1x24x32xf32>
      %38 = vector.shape_cast %37 : vector<1x1x24x32xf32> to vector<24x32xf32>
      %39 = vector.extract_strided_slice %38 {offsets = [0, 0], sizes = [23, 32], strides = [1, 1]} : vector<24x32xf32> to vector<23x32xf32>
      %c0_i32_32 = arith.constant 0 : i32
      %40 = arith.addi %arg8, %c0_i32_32 : i32
      %c0_33 = arith.constant 0 : index
      %41 = arith.index_cast %40 : i32 to index
      %c0_34 = arith.constant 0 : index
      %c0_35 = arith.constant 0 : index
      %42 = vector.load %arg3[%c0_33, %41, %c0_34, %c0_35] : memref<1x24x24x32xf32, #tpu.memory_space<vmem>>, vector<1x1x24x32xf32>
      %43 = vector.shape_cast %42 : vector<1x1x24x32xf32> to vector<24x32xf32>
      %44 = vector.extract_strided_slice %43 {offsets = [1, 0], sizes = [23, 32], strides = [1, 1]} : vector<24x32xf32> to vector<23x32xf32>
      %45 = tpu.concatenate %29, %34, %39, %44 in 1 : vector<23x32xf32>, vector<23x32xf32>, vector<23x32xf32>, vector<23x32xf32> -> vector<23x128xf32>
      %cst_36 = arith.constant dense<0.000000e+00> : vector<23x64xf32>
      %46 = tpu.matmul %45, %0, %cst_36 {dimension_numbers = #tpu.dot_dimension_numbers<[1], [0], [0], [1], [0, 0, 1, 1], [], []>} : vector<23x128xf32>, vector<128x64xf32>, vector<23x64xf32> -> vector<23x64xf32>
      %47 = arith.maximumf %24, %46 : vector<23x64xf32>
      %c0_i32_37 = arith.constant 0 : i32
      %48 = arith.addi %arg8, %c0_i32_37 : i32
      %c0_38 = arith.constant 0 : index
      %49 = arith.index_cast %48 : i32 to index
      %c0_39 = arith.constant 0 : index
      %c0_40 = arith.constant 0 : index
      %50 = vector.load %arg3[%c0_38, %49, %c0_39, %c0_40] : memref<1x24x24x32xf32, #tpu.memory_space<vmem>>, vector<1x1x24x32xf32>
      %51 = vector.shape_cast %50 : vector<1x1x24x32xf32> to vector<24x32xf32>
      %52 = vector.extract_strided_slice %51 {offsets = [0, 0], sizes = [23, 32], strides = [1, 1]} : vector<24x32xf32> to vector<23x32xf32>
      %c0_i32_41 = arith.constant 0 : i32
      %53 = arith.addi %arg8, %c0_i32_41 : i32
      %c0_42 = arith.constant 0 : index
      %54 = arith.index_cast %53 : i32 to index
      %c0_43 = arith.constant 0 : index
      %c0_44 = arith.constant 0 : index
      %55 = vector.load %arg4[%c0_42, %54, %c0_43, %c0_44] : memref<1x24x24x32xf32, #tpu.memory_space<vmem>>, vector<1x1x24x32xf32>
      %56 = vector.shape_cast %55 : vector<1x1x24x32xf32> to vector<24x32xf32>
      %57 = vector.extract_strided_slice %56 {offsets = [0, 0], sizes = [23, 32], strides = [1, 1]} : vector<24x32xf32> to vector<23x32xf32>
      %c1_i32_45 = arith.constant 1 : i32
      %58 = arith.addi %arg8, %c1_i32_45 : i32
      %c0_46 = arith.constant 0 : index
      %59 = arith.index_cast %58 : i32 to index
      %c0_47 = arith.constant 0 : index
      %c0_48 = arith.constant 0 : index
      %60 = vector.load %arg1[%c0_46, %59, %c0_47, %c0_48] : memref<1x24x24x32xf32, #tpu.memory_space<vmem>>, vector<1x1x24x32xf32>
      %61 = vector.shape_cast %60 : vector<1x1x24x32xf32> to vector<24x32xf32>
      %62 = vector.extract_strided_slice %61 {offsets = [0, 0], sizes = [23, 32], strides = [1, 1]} : vector<24x32xf32> to vector<23x32xf32>
      %c1_i32_49 = arith.constant 1 : i32
      %63 = arith.addi %arg8, %c1_i32_49 : i32
      %c0_50 = arith.constant 0 : index
      %64 = arith.index_cast %63 : i32 to index
      %c0_51 = arith.constant 0 : index
      %c0_52 = arith.constant 0 : index
      %65 = vector.load %arg2[%c0_50, %64, %c0_51, %c0_52] : memref<1x24x24x32xf32, #tpu.memory_space<vmem>>, vector<1x1x24x32xf32>
      %66 = vector.shape_cast %65 : vector<1x1x24x32xf32> to vector<24x32xf32>
      %67 = vector.extract_strided_slice %66 {offsets = [0, 0], sizes = [23, 32], strides = [1, 1]} : vector<24x32xf32> to vector<23x32xf32>
      %68 = tpu.concatenate %52, %57, %62, %67 in 1 : vector<23x32xf32>, vector<23x32xf32>, vector<23x32xf32>, vector<23x32xf32> -> vector<23x128xf32>
      %cst_53 = arith.constant dense<0.000000e+00> : vector<23x64xf32>
      %69 = tpu.matmul %68, %0, %cst_53 {dimension_numbers = #tpu.dot_dimension_numbers<[1], [0], [0], [1], [0, 0, 1, 1], [], []>} : vector<23x128xf32>, vector<128x64xf32>, vector<23x64xf32> -> vector<23x64xf32>
      %70 = arith.maximumf %47, %69 : vector<23x64xf32>
      %c0_i32_54 = arith.constant 0 : i32
      %71 = arith.addi %arg8, %c0_i32_54 : i32
      %c0_55 = arith.constant 0 : index
      %72 = arith.index_cast %71 : i32 to index
      %c0_56 = arith.constant 0 : index
      %c0_57 = arith.constant 0 : index
      %73 = vector.load %arg4[%c0_55, %72, %c0_56, %c0_57] : memref<1x24x24x32xf32, #tpu.memory_space<vmem>>, vector<1x1x24x32xf32>
      %74 = vector.shape_cast %73 : vector<1x1x24x32xf32> to vector<24x32xf32>
      %75 = vector.extract_strided_slice %74 {offsets = [0, 0], sizes = [23, 32], strides = [1, 1]} : vector<24x32xf32> to vector<23x32xf32>
      %c0_i32_58 = arith.constant 0 : i32
      %76 = arith.addi %arg8, %c0_i32_58 : i32
      %c0_59 = arith.constant 0 : index
      %77 = arith.index_cast %76 : i32 to index
      %c0_60 = arith.constant 0 : index
      %c0_61 = arith.constant 0 : index
      %78 = vector.load %arg3[%c0_59, %77, %c0_60, %c0_61] : memref<1x24x24x32xf32, #tpu.memory_space<vmem>>, vector<1x1x24x32xf32>
      %79 = vector.shape_cast %78 : vector<1x1x24x32xf32> to vector<24x32xf32>
      %80 = vector.extract_strided_slice %79 {offsets = [1, 0], sizes = [23, 32], strides = [1, 1]} : vector<24x32xf32> to vector<23x32xf32>
      %c1_i32_62 = arith.constant 1 : i32
      %81 = arith.addi %arg8, %c1_i32_62 : i32
      %c0_63 = arith.constant 0 : index
      %82 = arith.index_cast %81 : i32 to index
      %c0_64 = arith.constant 0 : index
      %c0_65 = arith.constant 0 : index
      %83 = vector.load %arg2[%c0_63, %82, %c0_64, %c0_65] : memref<1x24x24x32xf32, #tpu.memory_space<vmem>>, vector<1x1x24x32xf32>
      %84 = vector.shape_cast %83 : vector<1x1x24x32xf32> to vector<24x32xf32>
      %85 = vector.extract_strided_slice %84 {offsets = [0, 0], sizes = [23, 32], strides = [1, 1]} : vector<24x32xf32> to vector<23x32xf32>
      %c1_i32_66 = arith.constant 1 : i32
      %86 = arith.addi %arg8, %c1_i32_66 : i32
      %c0_67 = arith.constant 0 : index
      %87 = arith.index_cast %86 : i32 to index
      %c0_68 = arith.constant 0 : index
      %c0_69 = arith.constant 0 : index
      %88 = vector.load %arg1[%c0_67, %87, %c0_68, %c0_69] : memref<1x24x24x32xf32, #tpu.memory_space<vmem>>, vector<1x1x24x32xf32>
      %89 = vector.shape_cast %88 : vector<1x1x24x32xf32> to vector<24x32xf32>
      %90 = vector.extract_strided_slice %89 {offsets = [1, 0], sizes = [23, 32], strides = [1, 1]} : vector<24x32xf32> to vector<23x32xf32>
      %91 = tpu.concatenate %75, %80, %85, %90 in 1 : vector<23x32xf32>, vector<23x32xf32>, vector<23x32xf32>, vector<23x32xf32> -> vector<23x128xf32>
      %cst_70 = arith.constant dense<0.000000e+00> : vector<23x64xf32>
      %92 = tpu.matmul %91, %0, %cst_70 {dimension_numbers = #tpu.dot_dimension_numbers<[1], [0], [0], [1], [0, 0, 1, 1], [], []>} : vector<23x128xf32>, vector<128x64xf32>, vector<23x64xf32> -> vector<23x64xf32>
      %93 = arith.maximumf %70, %92 : vector<23x64xf32>
      %94 = vector.broadcast %1 : vector<1x64xf32> to vector<23x64xf32>
      %95 = arith.addf %93, %94 : vector<23x64xf32>
      %cst_71 = arith.constant 0.000000e+00 : f32
      %96 = vector.broadcast %cst_71 : f32 to vector<23x64xf32>
      %97 = arith.maximumf %95, %96 : vector<23x64xf32>
      %c0_72 = arith.constant 0 : index
      %98 = arith.index_cast %arg8 : i32 to index
      %c0_73 = arith.constant 0 : index
      %c0_74 = arith.constant 0 : index
      %99 = vector.load %arg7[%c0_72, %98, %c0_73, %c0_74] : memref<1x23x23x64xf32, #tpu.memory_space<vmem>>, vector<1x1x23x64xf32>
      %100 = vector.shape_cast %99 : vector<1x1x23x64xf32> to vector<23x64xf32>
      %101 = vector.shape_cast %97 : vector<23x64xf32> to vector<1x1x23x64xf32>
      tpu.vector_store %arg7[%c0_72, %98, %c0_73, %c0_74], %101 {strides = array<i32>} : memref<1x23x23x64xf32, #tpu.memory_space<vmem>>, vector<1x1x23x64xf32>,
    }
    %c23_i32_3 = arith.constant 23 : i32
    return
  }
  func.func @transform_0(%arg0: i32) -> (i32, i32, i32, i32) {
    %c0_i32 = arith.constant 0 : i32
    %c0_i32_0 = arith.constant 0 : i32
    %c0_i32_1 = arith.constant 0 : i32
    %c0_i32_2 = arith.constant 0 : i32
    return %arg0, %c0_i32, %c0_i32_0, %c0_i32_1 : i32, i32, i32, i32
  }
  func.func @transform_1(%arg0: i32) -> (i32, i32, i32, i32) {
    %c0_i32 = arith.constant 0 : i32
    %c0_i32_0 = arith.constant 0 : i32
    %c0_i32_1 = arith.constant 0 : i32
    %c0_i32_2 = arith.constant 0 : i32
    return %arg0, %c0_i32, %c0_i32_0, %c0_i32_1 : i32, i32, i32, i32
  }
  func.func @transform_2(%arg0: i32) -> (i32, i32, i32, i32) {
    %c0_i32 = arith.constant 0 : i32
    %c0_i32_0 = arith.constant 0 : i32
    %c0_i32_1 = arith.constant 0 : i32
    %c0_i32_2 = arith.constant 0 : i32
    return %arg0, %c0_i32, %c0_i32_0, %c0_i32_1 : i32, i32, i32, i32
  }
  func.func @transform_3(%arg0: i32) -> (i32, i32, i32, i32) {
    %c0_i32 = arith.constant 0 : i32
    %c0_i32_0 = arith.constant 0 : i32
    %c0_i32_1 = arith.constant 0 : i32
    %c0_i32_2 = arith.constant 0 : i32
    return %arg0, %c0_i32, %c0_i32_0, %c0_i32_1 : i32, i32, i32, i32
  }
  func.func @transform_4(%arg0: i32) -> (i32, i32) {
    %c0_i32 = arith.constant 0 : i32
    %c0_i32_0 = arith.constant 0 : i32
    %c0_i32_1 = arith.constant 0 : i32
    return %c0_i32, %c0_i32_0 : i32, i32
  }
  func.func @transform_5(%arg0: i32) -> (i32, i32) {
    %c0_i32 = arith.constant 0 : i32
    %c0_i32_0 = arith.constant 0 : i32
    %c0_i32_1 = arith.constant 0 : i32
    return %c0_i32, %c0_i32_0 : i32, i32
  }
  func.func @transform_6(%arg0: i32) -> (i32, i32, i32, i32) {
    %c0_i32 = arith.constant 0 : i32
    %c0_i32_0 = arith.constant 0 : i32
    %c0_i32_1 = arith.constant 0 : i32
    %c0_i32_2 = arith.constant 0 : i32
    return %arg0, %c0_i32, %c0_i32_0, %c0_i32_1 : i32, i32, i32, i32
  }
}

module attributes {stable_mosaic.version = 11 : i64} {
  func.func @kernel(%arg0: i32, %arg1: memref<1x12x12x64xf32, #tpu.memory_space<vmem>>, %arg2: memref<1x12x12x64xf32, #tpu.memory_space<vmem>>, %arg3: memref<1x12x12x64xf32, #tpu.memory_space<vmem>>, %arg4: memref<1x12x12x64xf32, #tpu.memory_space<vmem>>, %arg5: memref<256x128xf32, #tpu.memory_space<vmem>>, %arg6: memref<1x128xf32, #tpu.memory_space<vmem>>, %arg7: memref<1x11x11x128xf32, #tpu.memory_space<vmem>>) attributes {dimension_semantics = [#tpu.dimension_semantics<parallel>], iteration_bounds = array<i64: 2>, scalar_prefetch = 0 : i64, scratch_operands = 0 : i64, tpu.core_type = #tpu.core_type<tc>, window_params = [{transform_indices = @transform_0, window_bounds = array<i64: 1, 12, 12, 64>}, {transform_indices = @transform_1, window_bounds = array<i64: 1, 12, 12, 64>}, {transform_indices = @transform_2, window_bounds = array<i64: 1, 12, 12, 64>}, {transform_indices = @transform_3, window_bounds = array<i64: 1, 12, 12, 64>}, {pipeline_mode = #tpu.pipeline_mode<synchronous>, transform_indices = @transform_4, window_bounds = array<i64: 256, 128>}, {pipeline_mode = #tpu.pipeline_mode<synchronous>, transform_indices = @transform_5, window_bounds = array<i64: 1, 128>}, {transform_indices = @transform_6, window_bounds = array<i64: 1, 11, 11, 128>}]} {
    %c0 = arith.constant 0 : index
    %c0_0 = arith.constant 0 : index
    %0 = vector.load %arg5[%c0, %c0_0] : memref<256x128xf32, #tpu.memory_space<vmem>>, vector<256x128xf32>
    %c0_1 = arith.constant 0 : index
    %c0_2 = arith.constant 0 : index
    %1 = vector.load %arg6[%c0_1, %c0_2] : memref<1x128xf32, #tpu.memory_space<vmem>>, vector<1x128xf32>
    %c0_i32 = arith.constant 0 : i32
    %c11_i32 = arith.constant 11 : i32
    %2 = arith.addi %c0_i32, %c11_i32 : i32
    %c1_i32 = arith.constant 1 : i32
    scf.for %arg8 = %c0_i32 to %2 step %c1_i32  : i32 {
      %c0_i32_4 = arith.constant 0 : i32
      %3 = arith.addi %arg8, %c0_i32_4 : i32
      %c0_5 = arith.constant 0 : index
      %4 = arith.index_cast %3 : i32 to index
      %c0_6 = arith.constant 0 : index
      %c0_7 = arith.constant 0 : index
      %5 = vector.load %arg1[%c0_5, %4, %c0_6, %c0_7] : memref<1x12x12x64xf32, #tpu.memory_space<vmem>>, vector<1x1x12x64xf32>
      %6 = vector.shape_cast %5 : vector<1x1x12x64xf32> to vector<12x64xf32>
      %7 = vector.extract_strided_slice %6 {offsets = [0, 0], sizes = [11, 64], strides = [1, 1]} : vector<12x64xf32> to vector<11x64xf32>
      %c0_i32_8 = arith.constant 0 : i32
      %8 = arith.addi %arg8, %c0_i32_8 : i32
      %c0_9 = arith.constant 0 : index
      %9 = arith.index_cast %8 : i32 to index
      %c0_10 = arith.constant 0 : index
      %c0_11 = arith.constant 0 : index
      %10 = vector.load %arg2[%c0_9, %9, %c0_10, %c0_11] : memref<1x12x12x64xf32, #tpu.memory_space<vmem>>, vector<1x1x12x64xf32>
      %11 = vector.shape_cast %10 : vector<1x1x12x64xf32> to vector<12x64xf32>
      %12 = vector.extract_strided_slice %11 {offsets = [0, 0], sizes = [11, 64], strides = [1, 1]} : vector<12x64xf32> to vector<11x64xf32>
      %c0_i32_12 = arith.constant 0 : i32
      %13 = arith.addi %arg8, %c0_i32_12 : i32
      %c0_13 = arith.constant 0 : index
      %14 = arith.index_cast %13 : i32 to index
      %c0_14 = arith.constant 0 : index
      %c0_15 = arith.constant 0 : index
      %15 = vector.load %arg3[%c0_13, %14, %c0_14, %c0_15] : memref<1x12x12x64xf32, #tpu.memory_space<vmem>>, vector<1x1x12x64xf32>
      %16 = vector.shape_cast %15 : vector<1x1x12x64xf32> to vector<12x64xf32>
      %17 = vector.extract_strided_slice %16 {offsets = [0, 0], sizes = [11, 64], strides = [1, 1]} : vector<12x64xf32> to vector<11x64xf32>
      %c0_i32_16 = arith.constant 0 : i32
      %18 = arith.addi %arg8, %c0_i32_16 : i32
      %c0_17 = arith.constant 0 : index
      %19 = arith.index_cast %18 : i32 to index
      %c0_18 = arith.constant 0 : index
      %c0_19 = arith.constant 0 : index
      %20 = vector.load %arg4[%c0_17, %19, %c0_18, %c0_19] : memref<1x12x12x64xf32, #tpu.memory_space<vmem>>, vector<1x1x12x64xf32>
      %21 = vector.shape_cast %20 : vector<1x1x12x64xf32> to vector<12x64xf32>
      %22 = vector.extract_strided_slice %21 {offsets = [0, 0], sizes = [11, 64], strides = [1, 1]} : vector<12x64xf32> to vector<11x64xf32>
      %23 = tpu.concatenate %7, %12, %17, %22 in 1 : vector<11x64xf32>, vector<11x64xf32>, vector<11x64xf32>, vector<11x64xf32> -> vector<11x256xf32>
      %cst = arith.constant dense<0.000000e+00> : vector<11x128xf32>
      %24 = tpu.matmul %23, %0, %cst {dimension_numbers = #tpu.dot_dimension_numbers<[1], [0], [0], [1], [0, 0, 1, 1], [], []>} : vector<11x256xf32>, vector<256x128xf32>, vector<11x128xf32> -> vector<11x128xf32>
      %c0_i32_20 = arith.constant 0 : i32
      %25 = arith.addi %arg8, %c0_i32_20 : i32
      %c0_21 = arith.constant 0 : index
      %26 = arith.index_cast %25 : i32 to index
      %c0_22 = arith.constant 0 : index
      %c0_23 = arith.constant 0 : index
      %27 = vector.load %arg2[%c0_21, %26, %c0_22, %c0_23] : memref<1x12x12x64xf32, #tpu.memory_space<vmem>>, vector<1x1x12x64xf32>
      %28 = vector.shape_cast %27 : vector<1x1x12x64xf32> to vector<12x64xf32>
      %29 = vector.extract_strided_slice %28 {offsets = [0, 0], sizes = [11, 64], strides = [1, 1]} : vector<12x64xf32> to vector<11x64xf32>
      %c0_i32_24 = arith.constant 0 : i32
      %30 = arith.addi %arg8, %c0_i32_24 : i32
      %c0_25 = arith.constant 0 : index
      %31 = arith.index_cast %30 : i32 to index
      %c0_26 = arith.constant 0 : index
      %c0_27 = arith.constant 0 : index
      %32 = vector.load %arg1[%c0_25, %31, %c0_26, %c0_27] : memref<1x12x12x64xf32, #tpu.memory_space<vmem>>, vector<1x1x12x64xf32>
      %33 = vector.shape_cast %32 : vector<1x1x12x64xf32> to vector<12x64xf32>
      %34 = vector.extract_strided_slice %33 {offsets = [1, 0], sizes = [11, 64], strides = [1, 1]} : vector<12x64xf32> to vector<11x64xf32>
      %c0_i32_28 = arith.constant 0 : i32
      %35 = arith.addi %arg8, %c0_i32_28 : i32
      %c0_29 = arith.constant 0 : index
      %36 = arith.index_cast %35 : i32 to index
      %c0_30 = arith.constant 0 : index
      %c0_31 = arith.constant 0 : index
      %37 = vector.load %arg4[%c0_29, %36, %c0_30, %c0_31] : memref<1x12x12x64xf32, #tpu.memory_space<vmem>>, vector<1x1x12x64xf32>
      %38 = vector.shape_cast %37 : vector<1x1x12x64xf32> to vector<12x64xf32>
      %39 = vector.extract_strided_slice %38 {offsets = [0, 0], sizes = [11, 64], strides = [1, 1]} : vector<12x64xf32> to vector<11x64xf32>
      %c0_i32_32 = arith.constant 0 : i32
      %40 = arith.addi %arg8, %c0_i32_32 : i32
      %c0_33 = arith.constant 0 : index
      %41 = arith.index_cast %40 : i32 to index
      %c0_34 = arith.constant 0 : index
      %c0_35 = arith.constant 0 : index
      %42 = vector.load %arg3[%c0_33, %41, %c0_34, %c0_35] : memref<1x12x12x64xf32, #tpu.memory_space<vmem>>, vector<1x1x12x64xf32>
      %43 = vector.shape_cast %42 : vector<1x1x12x64xf32> to vector<12x64xf32>
      %44 = vector.extract_strided_slice %43 {offsets = [1, 0], sizes = [11, 64], strides = [1, 1]} : vector<12x64xf32> to vector<11x64xf32>
      %45 = tpu.concatenate %29, %34, %39, %44 in 1 : vector<11x64xf32>, vector<11x64xf32>, vector<11x64xf32>, vector<11x64xf32> -> vector<11x256xf32>
      %cst_36 = arith.constant dense<0.000000e+00> : vector<11x128xf32>
      %46 = tpu.matmul %45, %0, %cst_36 {dimension_numbers = #tpu.dot_dimension_numbers<[1], [0], [0], [1], [0, 0, 1, 1], [], []>} : vector<11x256xf32>, vector<256x128xf32>, vector<11x128xf32> -> vector<11x128xf32>
      %47 = arith.maximumf %24, %46 : vector<11x128xf32>
      %c0_i32_37 = arith.constant 0 : i32
      %48 = arith.addi %arg8, %c0_i32_37 : i32
      %c0_38 = arith.constant 0 : index
      %49 = arith.index_cast %48 : i32 to index
      %c0_39 = arith.constant 0 : index
      %c0_40 = arith.constant 0 : index
      %50 = vector.load %arg3[%c0_38, %49, %c0_39, %c0_40] : memref<1x12x12x64xf32, #tpu.memory_space<vmem>>, vector<1x1x12x64xf32>
      %51 = vector.shape_cast %50 : vector<1x1x12x64xf32> to vector<12x64xf32>
      %52 = vector.extract_strided_slice %51 {offsets = [0, 0], sizes = [11, 64], strides = [1, 1]} : vector<12x64xf32> to vector<11x64xf32>
      %c0_i32_41 = arith.constant 0 : i32
      %53 = arith.addi %arg8, %c0_i32_41 : i32
      %c0_42 = arith.constant 0 : index
      %54 = arith.index_cast %53 : i32 to index
      %c0_43 = arith.constant 0 : index
      %c0_44 = arith.constant 0 : index
      %55 = vector.load %arg4[%c0_42, %54, %c0_43, %c0_44] : memref<1x12x12x64xf32, #tpu.memory_space<vmem>>, vector<1x1x12x64xf32>
      %56 = vector.shape_cast %55 : vector<1x1x12x64xf32> to vector<12x64xf32>
      %57 = vector.extract_strided_slice %56 {offsets = [0, 0], sizes = [11, 64], strides = [1, 1]} : vector<12x64xf32> to vector<11x64xf32>
      %c1_i32_45 = arith.constant 1 : i32
      %58 = arith.addi %arg8, %c1_i32_45 : i32
      %c0_46 = arith.constant 0 : index
      %59 = arith.index_cast %58 : i32 to index
      %c0_47 = arith.constant 0 : index
      %c0_48 = arith.constant 0 : index
      %60 = vector.load %arg1[%c0_46, %59, %c0_47, %c0_48] : memref<1x12x12x64xf32, #tpu.memory_space<vmem>>, vector<1x1x12x64xf32>
      %61 = vector.shape_cast %60 : vector<1x1x12x64xf32> to vector<12x64xf32>
      %62 = vector.extract_strided_slice %61 {offsets = [0, 0], sizes = [11, 64], strides = [1, 1]} : vector<12x64xf32> to vector<11x64xf32>
      %c1_i32_49 = arith.constant 1 : i32
      %63 = arith.addi %arg8, %c1_i32_49 : i32
      %c0_50 = arith.constant 0 : index
      %64 = arith.index_cast %63 : i32 to index
      %c0_51 = arith.constant 0 : index
      %c0_52 = arith.constant 0 : index
      %65 = vector.load %arg2[%c0_50, %64, %c0_51, %c0_52] : memref<1x12x12x64xf32, #tpu.memory_space<vmem>>, vector<1x1x12x64xf32>
      %66 = vector.shape_cast %65 : vector<1x1x12x64xf32> to vector<12x64xf32>
      %67 = vector.extract_strided_slice %66 {offsets = [0, 0], sizes = [11, 64], strides = [1, 1]} : vector<12x64xf32> to vector<11x64xf32>
      %68 = tpu.concatenate %52, %57, %62, %67 in 1 : vector<11x64xf32>, vector<11x64xf32>, vector<11x64xf32>, vector<11x64xf32> -> vector<11x256xf32>
      %cst_53 = arith.constant dense<0.000000e+00> : vector<11x128xf32>
      %69 = tpu.matmul %68, %0, %cst_53 {dimension_numbers = #tpu.dot_dimension_numbers<[1], [0], [0], [1], [0, 0, 1, 1], [], []>} : vector<11x256xf32>, vector<256x128xf32>, vector<11x128xf32> -> vector<11x128xf32>
      %70 = arith.maximumf %47, %69 : vector<11x128xf32>
      %c0_i32_54 = arith.constant 0 : i32
      %71 = arith.addi %arg8, %c0_i32_54 : i32
      %c0_55 = arith.constant 0 : index
      %72 = arith.index_cast %71 : i32 to index
      %c0_56 = arith.constant 0 : index
      %c0_57 = arith.constant 0 : index
      %73 = vector.load %arg4[%c0_55, %72, %c0_56, %c0_57] : memref<1x12x12x64xf32, #tpu.memory_space<vmem>>, vector<1x1x12x64xf32>
      %74 = vector.shape_cast %73 : vector<1x1x12x64xf32> to vector<12x64xf32>
      %75 = vector.extract_strided_slice %74 {offsets = [0, 0], sizes = [11, 64], strides = [1, 1]} : vector<12x64xf32> to vector<11x64xf32>
      %c0_i32_58 = arith.constant 0 : i32
      %76 = arith.addi %arg8, %c0_i32_58 : i32
      %c0_59 = arith.constant 0 : index
      %77 = arith.index_cast %76 : i32 to index
      %c0_60 = arith.constant 0 : index
      %c0_61 = arith.constant 0 : index
      %78 = vector.load %arg3[%c0_59, %77, %c0_60, %c0_61] : memref<1x12x12x64xf32, #tpu.memory_space<vmem>>, vector<1x1x12x64xf32>
      %79 = vector.shape_cast %78 : vector<1x1x12x64xf32> to vector<12x64xf32>
      %80 = vector.extract_strided_slice %79 {offsets = [1, 0], sizes = [11, 64], strides = [1, 1]} : vector<12x64xf32> to vector<11x64xf32>
      %c1_i32_62 = arith.constant 1 : i32
      %81 = arith.addi %arg8, %c1_i32_62 : i32
      %c0_63 = arith.constant 0 : index
      %82 = arith.index_cast %81 : i32 to index
      %c0_64 = arith.constant 0 : index
      %c0_65 = arith.constant 0 : index
      %83 = vector.load %arg2[%c0_63, %82, %c0_64, %c0_65] : memref<1x12x12x64xf32, #tpu.memory_space<vmem>>, vector<1x1x12x64xf32>
      %84 = vector.shape_cast %83 : vector<1x1x12x64xf32> to vector<12x64xf32>
      %85 = vector.extract_strided_slice %84 {offsets = [0, 0], sizes = [11, 64], strides = [1, 1]} : vector<12x64xf32> to vector<11x64xf32>
      %c1_i32_66 = arith.constant 1 : i32
      %86 = arith.addi %arg8, %c1_i32_66 : i32
      %c0_67 = arith.constant 0 : index
      %87 = arith.index_cast %86 : i32 to index
      %c0_68 = arith.constant 0 : index
      %c0_69 = arith.constant 0 : index
      %88 = vector.load %arg1[%c0_67, %87, %c0_68, %c0_69] : memref<1x12x12x64xf32, #tpu.memory_space<vmem>>, vector<1x1x12x64xf32>
      %89 = vector.shape_cast %88 : vector<1x1x12x64xf32> to vector<12x64xf32>
      %90 = vector.extract_strided_slice %89 {offsets = [1, 0], sizes = [11, 64], strides = [1, 1]} : vector<12x64xf32> to vector<11x64xf32>
      %91 = tpu.concatenate %75, %80, %85, %90 in 1 : vector<11x64xf32>, vector<11x64xf32>, vector<11x64xf32>, vector<11x64xf32> -> vector<11x256xf32>
      %cst_70 = arith.constant dense<0.000000e+00> : vector<11x128xf32>
      %92 = tpu.matmul %91, %0, %cst_70 {dimension_numbers = #tpu.dot_dimension_numbers<[1], [0], [0], [1], [0, 0, 1, 1], [], []>} : vector<11x256xf32>, vector<256x128xf32>, vector<11x128xf32> -> vector<11x128xf32>
      %93 = arith.maximumf %70, %92 : vector<11x128xf32>
      %94 = vector.broadcast %1 : vector<1x128xf32> to vector<11x128xf32>
      %95 = arith.addf %93, %94 : vector<11x128xf32>
      %cst_71 = arith.constant 0.000000e+00 : f32
      %96 = vector.broadcast %cst_71 : f32 to vector<11x128xf32>
      %97 = arith.maximumf %95, %96 : vector<11x128xf32>
      %c0_72 = arith.constant 0 : index
      %98 = arith.index_cast %arg8 : i32 to index
      %c0_73 = arith.constant 0 : index
      %c0_74 = arith.constant 0 : index
      %99 = vector.load %arg7[%c0_72, %98, %c0_73, %c0_74] : memref<1x11x11x128xf32, #tpu.memory_space<vmem>>, vector<1x1x11x128xf32>
      %100 = vector.shape_cast %99 : vector<1x1x11x128xf32> to vector<11x128xf32>
      %101 = vector.shape_cast %97 : vector<11x128xf32> to vector<1x1x11x128xf32>
      tpu.vector_store %arg7[%c0_72, %98, %c0_73, %c0_74], %101 {strides = array<i32>} : memref<1x11x11x128xf32, #tpu.memory_space<vmem>>, vector<1x1x11x128xf32>,
    }
    %c11_i32_3 = arith.constant 11 : i32
    return
  }
  func.func @transform_0(%arg0: i32) -> (i32, i32, i32, i32) {
    %c0_i32 = arith.constant 0 : i32
    %c0_i32_0 = arith.constant 0 : i32
    %c0_i32_1 = arith.constant 0 : i32
    %c0_i32_2 = arith.constant 0 : i32
    return %arg0, %c0_i32, %c0_i32_0, %c0_i32_1 : i32, i32, i32, i32
  }
  func.func @transform_1(%arg0: i32) -> (i32, i32, i32, i32) {
    %c0_i32 = arith.constant 0 : i32
    %c0_i32_0 = arith.constant 0 : i32
    %c0_i32_1 = arith.constant 0 : i32
    %c0_i32_2 = arith.constant 0 : i32
    return %arg0, %c0_i32, %c0_i32_0, %c0_i32_1 : i32, i32, i32, i32
  }
  func.func @transform_2(%arg0: i32) -> (i32, i32, i32, i32) {
    %c0_i32 = arith.constant 0 : i32
    %c0_i32_0 = arith.constant 0 : i32
    %c0_i32_1 = arith.constant 0 : i32
    %c0_i32_2 = arith.constant 0 : i32
    return %arg0, %c0_i32, %c0_i32_0, %c0_i32_1 : i32, i32, i32, i32
  }
  func.func @transform_3(%arg0: i32) -> (i32, i32, i32, i32) {
    %c0_i32 = arith.constant 0 : i32
    %c0_i32_0 = arith.constant 0 : i32
    %c0_i32_1 = arith.constant 0 : i32
    %c0_i32_2 = arith.constant 0 : i32
    return %arg0, %c0_i32, %c0_i32_0, %c0_i32_1 : i32, i32, i32, i32
  }
  func.func @transform_4(%arg0: i32) -> (i32, i32) {
    %c0_i32 = arith.constant 0 : i32
    %c0_i32_0 = arith.constant 0 : i32
    %c0_i32_1 = arith.constant 0 : i32
    return %c0_i32, %c0_i32_0 : i32, i32
  }
  func.func @transform_5(%arg0: i32) -> (i32, i32) {
    %c0_i32 = arith.constant 0 : i32
    %c0_i32_0 = arith.constant 0 : i32
    %c0_i32_1 = arith.constant 0 : i32
    return %c0_i32, %c0_i32_0 : i32, i32
  }
  func.func @transform_6(%arg0: i32) -> (i32, i32, i32, i32) {
    %c0_i32 = arith.constant 0 : i32
    %c0_i32_0 = arith.constant 0 : i32
    %c0_i32_1 = arith.constant 0 : i32
    %c0_i32_2 = arith.constant 0 : i32
    return %arg0, %c0_i32, %c0_i32_0, %c0_i32_1 : i32, i32, i32, i32
  }
}

module attributes {stable_mosaic.version = 11 : i64} {
  func.func @kernel(%arg0: i32, %arg1: i32, %arg2: i32, %arg3: memref<8x1408xf32, #tpu.memory_space<vmem>>, %arg4: memref<1408x256xf32, #tpu.memory_space<vmem>>, %arg5: memref<1x256xf32, #tpu.memory_space<vmem>>, %arg6: memref<8x256xf32, #tpu.memory_space<vmem>>, %arg7: memref<8x256xf32, #tpu.memory_space<vmem>>) attributes {dimension_semantics = [#tpu.dimension_semantics<parallel>, #tpu.dimension_semantics<parallel>, #tpu.dimension_semantics<arbitrary>], iteration_bounds = array<i64: 1, 2, 11>, scalar_prefetch = 0 : i64, scratch_operands = 1 : i64, tpu.core_type = #tpu.core_type<tc>, window_params = [{transform_indices = @transform_0, window_bounds = array<i64: 8, 1408>}, {transform_indices = @transform_1, window_bounds = array<i64: 1408, 256>}, {transform_indices = @transform_2, window_bounds = array<i64: 1, 256>}, {transform_indices = @transform_3, window_bounds = array<i64: 8, 256>}]} {
    %c0_i32 = arith.constant 0 : i32
    %0 = arith.cmpi eq, %arg2, %c0_i32 : i32
    %1 = arith.extui %0 : i1 to i32
    %c0_i32_0 = arith.constant 0 : i32
    %2 = arith.cmpi ne, %1, %c0_i32_0 : i32
    scf.if %2 {
      %cst_9 = arith.constant 0.000000e+00 : f32
      %12 = vector.broadcast %cst_9 : f32 to vector<8x256xf32>
      %c0_10 = arith.constant 0 : index
      %c0_11 = arith.constant 0 : index
      %13 = vector.load %arg7[%c0_10, %c0_11] : memref<8x256xf32, #tpu.memory_space<vmem>>, vector<8x256xf32>
      tpu.vector_store %arg7[%c0_10, %c0_11], %12 {strides = array<i32>} : memref<8x256xf32, #tpu.memory_space<vmem>>, vector<8x256xf32>,
    } else {
    }
    %c0 = arith.constant 0 : index
    %c0_1 = arith.constant 0 : index
    %3 = vector.load %arg7[%c0, %c0_1] : memref<8x256xf32, #tpu.memory_space<vmem>>, vector<8x256xf32>
    %c0_2 = arith.constant 0 : index
    %c0_3 = arith.constant 0 : index
    %4 = vector.load %arg3[%c0_2, %c0_3] : memref<8x1408xf32, #tpu.memory_space<vmem>>, vector<8x1408xf32>
    %c0_4 = arith.constant 0 : index
    %c0_5 = arith.constant 0 : index
    %5 = vector.load %arg4[%c0_4, %c0_5] : memref<1408x256xf32, #tpu.memory_space<vmem>>, vector<1408x256xf32>
    %cst = arith.constant dense<0.000000e+00> : vector<8x256xf32>
    %6 = tpu.matmul %4, %5, %cst {dimension_numbers = #tpu.dot_dimension_numbers<[1], [0], [0], [1], [0, 0, 1, 1], [], []>} : vector<8x1408xf32>, vector<1408x256xf32>, vector<8x256xf32> -> vector<8x256xf32>
    %7 = arith.addf %3, %6 : vector<8x256xf32>
    %c0_6 = arith.constant 0 : index
    %c0_7 = arith.constant 0 : index
    %8 = vector.load %arg7[%c0_6, %c0_7] : memref<8x256xf32, #tpu.memory_space<vmem>>, vector<8x256xf32>
    tpu.vector_store %arg7[%c0_6, %c0_7], %7 {strides = array<i32>} : memref<8x256xf32, #tpu.memory_space<vmem>>, vector<8x256xf32>,
    %c10_i32 = arith.constant 10 : i32
    %9 = arith.cmpi eq, %arg2, %c10_i32 : i32
    %10 = arith.extui %9 : i1 to i32
    %c0_i32_8 = arith.constant 0 : i32
    %11 = arith.cmpi ne, %10, %c0_i32_8 : i32
    scf.if %11 {
      %c0_9 = arith.constant 0 : index
      %c0_10 = arith.constant 0 : index
      %12 = vector.load %arg7[%c0_9, %c0_10] : memref<8x256xf32, #tpu.memory_space<vmem>>, vector<8x256xf32>
      %c0_11 = arith.constant 0 : index
      %c0_12 = arith.constant 0 : index
      %13 = vector.load %arg5[%c0_11, %c0_12] : memref<1x256xf32, #tpu.memory_space<vmem>>, vector<1x256xf32>
      %14 = vector.broadcast %13 : vector<1x256xf32> to vector<8x256xf32>
      %15 = arith.addf %12, %14 : vector<8x256xf32>
      %cst_13 = arith.constant 0.000000e+00 : f32
      %16 = vector.broadcast %cst_13 : f32 to vector<8x256xf32>
      %17 = arith.maximumf %15, %16 : vector<8x256xf32>
      %c0_14 = arith.constant 0 : index
      %c0_15 = arith.constant 0 : index
      %18 = vector.load %arg6[%c0_14, %c0_15] : memref<8x256xf32, #tpu.memory_space<vmem>>, vector<8x256xf32>
      tpu.vector_store %arg6[%c0_14, %c0_15], %17 {strides = array<i32>} : memref<8x256xf32, #tpu.memory_space<vmem>>, vector<8x256xf32>,
    } else {
    }
    return
  }
  func.func @transform_0(%arg0: i32, %arg1: i32, %arg2: i32) -> (i32, i32) {
    %c0_i32 = arith.constant 0 : i32
    return %arg0, %arg2 : i32, i32
  }
  func.func @transform_1(%arg0: i32, %arg1: i32, %arg2: i32) -> (i32, i32) {
    %c0_i32 = arith.constant 0 : i32
    return %arg2, %arg1 : i32, i32
  }
  func.func @transform_2(%arg0: i32, %arg1: i32, %arg2: i32) -> (i32, i32) {
    %c0_i32 = arith.constant 0 : i32
    %c0_i32_0 = arith.constant 0 : i32
    return %c0_i32, %arg1 : i32, i32
  }
  func.func @transform_3(%arg0: i32, %arg1: i32, %arg2: i32) -> (i32, i32) {
    %c0_i32 = arith.constant 0 : i32
    return %arg0, %arg1 : i32, i32
  }
}

module attributes {stable_mosaic.version = 11 : i64} {
  func.func @kernel(%arg0: i32, %arg1: i32, %arg2: i32, %arg3: memref<8x512xf32, #tpu.memory_space<vmem>>, %arg4: memref<512x512xf32, #tpu.memory_space<vmem>>, %arg5: memref<1x512xf32, #tpu.memory_space<vmem>>, %arg6: memref<8x512xf32, #tpu.memory_space<vmem>>, %arg7: memref<8x512xf32, #tpu.memory_space<vmem>>) attributes {dimension_semantics = [#tpu.dimension_semantics<parallel>, #tpu.dimension_semantics<parallel>, #tpu.dimension_semantics<arbitrary>], iteration_bounds = array<i64: 1, 1, 1>, scalar_prefetch = 0 : i64, scratch_operands = 1 : i64, tpu.core_type = #tpu.core_type<tc>, window_params = [{transform_indices = @transform_0, window_bounds = array<i64: 8, 512>}, {transform_indices = @transform_1, window_bounds = array<i64: 512, 512>}, {transform_indices = @transform_2, window_bounds = array<i64: 1, 512>}, {transform_indices = @transform_3, window_bounds = array<i64: 8, 512>}]} {
    %c0_i32 = arith.constant 0 : i32
    %0 = arith.cmpi eq, %arg2, %c0_i32 : i32
    %1 = arith.extui %0 : i1 to i32
    %c0_i32_0 = arith.constant 0 : i32
    %2 = arith.cmpi ne, %1, %c0_i32_0 : i32
    scf.if %2 {
      %cst_10 = arith.constant 0.000000e+00 : f32
      %12 = vector.broadcast %cst_10 : f32 to vector<8x512xf32>
      %c0_11 = arith.constant 0 : index
      %c0_12 = arith.constant 0 : index
      %13 = vector.load %arg7[%c0_11, %c0_12] : memref<8x512xf32, #tpu.memory_space<vmem>>, vector<8x512xf32>
      tpu.vector_store %arg7[%c0_11, %c0_12], %12 {strides = array<i32>} : memref<8x512xf32, #tpu.memory_space<vmem>>, vector<8x512xf32>,
    } else {
    }
    %c0 = arith.constant 0 : index
    %c0_1 = arith.constant 0 : index
    %3 = vector.load %arg7[%c0, %c0_1] : memref<8x512xf32, #tpu.memory_space<vmem>>, vector<8x512xf32>
    %c0_2 = arith.constant 0 : index
    %c0_3 = arith.constant 0 : index
    %4 = vector.load %arg3[%c0_2, %c0_3] : memref<8x512xf32, #tpu.memory_space<vmem>>, vector<8x512xf32>
    %c0_4 = arith.constant 0 : index
    %c0_5 = arith.constant 0 : index
    %5 = vector.load %arg4[%c0_4, %c0_5] : memref<512x512xf32, #tpu.memory_space<vmem>>, vector<512x512xf32>
    %cst = arith.constant dense<0.000000e+00> : vector<8x512xf32>
    %6 = tpu.matmul %4, %5, %cst {dimension_numbers = #tpu.dot_dimension_numbers<[1], [0], [0], [1], [0, 0, 1, 1], [], []>} : vector<8x512xf32>, vector<512x512xf32>, vector<8x512xf32> -> vector<8x512xf32>
    %7 = arith.addf %3, %6 : vector<8x512xf32>
    %c0_6 = arith.constant 0 : index
    %c0_7 = arith.constant 0 : index
    %8 = vector.load %arg7[%c0_6, %c0_7] : memref<8x512xf32, #tpu.memory_space<vmem>>, vector<8x512xf32>
    tpu.vector_store %arg7[%c0_6, %c0_7], %7 {strides = array<i32>} : memref<8x512xf32, #tpu.memory_space<vmem>>, vector<8x512xf32>,
    %c0_i32_8 = arith.constant 0 : i32
    %9 = arith.cmpi eq, %arg2, %c0_i32_8 : i32
    %10 = arith.extui %9 : i1 to i32
    %c0_i32_9 = arith.constant 0 : i32
    %11 = arith.cmpi ne, %10, %c0_i32_9 : i32
    scf.if %11 {
      %c0_10 = arith.constant 0 : index
      %c0_11 = arith.constant 0 : index
      %12 = vector.load %arg7[%c0_10, %c0_11] : memref<8x512xf32, #tpu.memory_space<vmem>>, vector<8x512xf32>
      %c0_12 = arith.constant 0 : index
      %c0_13 = arith.constant 0 : index
      %13 = vector.load %arg5[%c0_12, %c0_13] : memref<1x512xf32, #tpu.memory_space<vmem>>, vector<1x512xf32>
      %14 = vector.broadcast %13 : vector<1x512xf32> to vector<8x512xf32>
      %15 = arith.addf %12, %14 : vector<8x512xf32>
      %cst_14 = arith.constant 0.000000e+00 : f32
      %16 = vector.broadcast %cst_14 : f32 to vector<8x512xf32>
      %17 = arith.maximumf %15, %16 : vector<8x512xf32>
      %c0_15 = arith.constant 0 : index
      %c0_16 = arith.constant 0 : index
      %18 = vector.load %arg6[%c0_15, %c0_16] : memref<8x512xf32, #tpu.memory_space<vmem>>, vector<8x512xf32>
      tpu.vector_store %arg6[%c0_15, %c0_16], %17 {strides = array<i32>} : memref<8x512xf32, #tpu.memory_space<vmem>>, vector<8x512xf32>,
    } else {
    }
    return
  }
  func.func @transform_0(%arg0: i32, %arg1: i32, %arg2: i32) -> (i32, i32) {
    %c0_i32 = arith.constant 0 : i32
    return %arg0, %arg2 : i32, i32
  }
  func.func @transform_1(%arg0: i32, %arg1: i32, %arg2: i32) -> (i32, i32) {
    %c0_i32 = arith.constant 0 : i32
    return %arg2, %arg1 : i32, i32
  }
  func.func @transform_2(%arg0: i32, %arg1: i32, %arg2: i32) -> (i32, i32) {
    %c0_i32 = arith.constant 0 : i32
    %c0_i32_0 = arith.constant 0 : i32
    return %c0_i32, %arg1 : i32, i32
  }
  func.func @transform_3(%arg0: i32, %arg1: i32, %arg2: i32) -> (i32, i32) {
    %c0_i32 = arith.constant 0 : i32
    return %arg0, %arg1 : i32, i32
  }
}

module attributes {stable_mosaic.version = 11 : i64} {
  func.func @kernel(%arg0: i32, %arg1: i32, %arg2: i32, %arg3: memref<8x512xf32, #tpu.memory_space<vmem>>, %arg4: memref<512x128xf32, #tpu.memory_space<vmem>>, %arg5: memref<1x128xf32, #tpu.memory_space<vmem>>, %arg6: memref<8x128xf32, #tpu.memory_space<vmem>>, %arg7: memref<8x128xf32, #tpu.memory_space<vmem>>) attributes {dimension_semantics = [#tpu.dimension_semantics<parallel>, #tpu.dimension_semantics<parallel>, #tpu.dimension_semantics<arbitrary>], iteration_bounds = array<i64: 1, 1, 1>, scalar_prefetch = 0 : i64, scratch_operands = 1 : i64, tpu.core_type = #tpu.core_type<tc>, window_params = [{transform_indices = @transform_0, window_bounds = array<i64: 8, 512>}, {transform_indices = @transform_1, window_bounds = array<i64: 512, 128>}, {transform_indices = @transform_2, window_bounds = array<i64: 1, 128>}, {transform_indices = @transform_3, window_bounds = array<i64: 8, 128>}]} {
    %c0_i32 = arith.constant 0 : i32
    %0 = arith.cmpi eq, %arg2, %c0_i32 : i32
    %1 = arith.extui %0 : i1 to i32
    %c0_i32_0 = arith.constant 0 : i32
    %2 = arith.cmpi ne, %1, %c0_i32_0 : i32
    scf.if %2 {
      %cst_10 = arith.constant 0.000000e+00 : f32
      %12 = vector.broadcast %cst_10 : f32 to vector<8x128xf32>
      %c0_11 = arith.constant 0 : index
      %c0_12 = arith.constant 0 : index
      %13 = vector.load %arg7[%c0_11, %c0_12] : memref<8x128xf32, #tpu.memory_space<vmem>>, vector<8x128xf32>
      tpu.vector_store %arg7[%c0_11, %c0_12], %12 {strides = array<i32>} : memref<8x128xf32, #tpu.memory_space<vmem>>, vector<8x128xf32>,
    } else {
    }
    %c0 = arith.constant 0 : index
    %c0_1 = arith.constant 0 : index
    %3 = vector.load %arg7[%c0, %c0_1] : memref<8x128xf32, #tpu.memory_space<vmem>>, vector<8x128xf32>
    %c0_2 = arith.constant 0 : index
    %c0_3 = arith.constant 0 : index
    %4 = vector.load %arg3[%c0_2, %c0_3] : memref<8x512xf32, #tpu.memory_space<vmem>>, vector<8x512xf32>
    %c0_4 = arith.constant 0 : index
    %c0_5 = arith.constant 0 : index
    %5 = vector.load %arg4[%c0_4, %c0_5] : memref<512x128xf32, #tpu.memory_space<vmem>>, vector<512x128xf32>
    %cst = arith.constant dense<0.000000e+00> : vector<8x128xf32>
    %6 = tpu.matmul %4, %5, %cst {dimension_numbers = #tpu.dot_dimension_numbers<[1], [0], [0], [1], [0, 0, 1, 1], [], []>} : vector<8x512xf32>, vector<512x128xf32>, vector<8x128xf32> -> vector<8x128xf32>
    %7 = arith.addf %3, %6 : vector<8x128xf32>
    %c0_6 = arith.constant 0 : index
    %c0_7 = arith.constant 0 : index
    %8 = vector.load %arg7[%c0_6, %c0_7] : memref<8x128xf32, #tpu.memory_space<vmem>>, vector<8x128xf32>
    tpu.vector_store %arg7[%c0_6, %c0_7], %7 {strides = array<i32>} : memref<8x128xf32, #tpu.memory_space<vmem>>, vector<8x128xf32>,
    %c0_i32_8 = arith.constant 0 : i32
    %9 = arith.cmpi eq, %arg2, %c0_i32_8 : i32
    %10 = arith.extui %9 : i1 to i32
    %c0_i32_9 = arith.constant 0 : i32
    %11 = arith.cmpi ne, %10, %c0_i32_9 : i32
    scf.if %11 {
      %c0_10 = arith.constant 0 : index
      %c0_11 = arith.constant 0 : index
      %12 = vector.load %arg7[%c0_10, %c0_11] : memref<8x128xf32, #tpu.memory_space<vmem>>, vector<8x128xf32>
      %c0_12 = arith.constant 0 : index
      %c0_13 = arith.constant 0 : index
      %13 = vector.load %arg5[%c0_12, %c0_13] : memref<1x128xf32, #tpu.memory_space<vmem>>, vector<1x128xf32>
      %14 = vector.broadcast %13 : vector<1x128xf32> to vector<8x128xf32>
      %15 = arith.addf %12, %14 : vector<8x128xf32>
      %c0_14 = arith.constant 0 : index
      %c0_15 = arith.constant 0 : index
      %16 = vector.load %arg6[%c0_14, %c0_15] : memref<8x128xf32, #tpu.memory_space<vmem>>, vector<8x128xf32>
      tpu.vector_store %arg6[%c0_14, %c0_15], %15 {strides = array<i32>} : memref<8x128xf32, #tpu.memory_space<vmem>>, vector<8x128xf32>,
    } else {
    }
    return
  }
  func.func @transform_0(%arg0: i32, %arg1: i32, %arg2: i32) -> (i32, i32) {
    %c0_i32 = arith.constant 0 : i32
    return %arg0, %arg2 : i32, i32
  }
  func.func @transform_1(%arg0: i32, %arg1: i32, %arg2: i32) -> (i32, i32) {
    %c0_i32 = arith.constant 0 : i32
    return %arg2, %arg1 : i32, i32
  }
  func.func @transform_2(%arg0: i32, %arg1: i32, %arg2: i32) -> (i32, i32) {
    %c0_i32 = arith.constant 0 : i32
    %c0_i32_0 = arith.constant 0 : i32
    return %c0_i32, %arg1 : i32, i32
  }
  func.func @transform_3(%arg0: i32, %arg1: i32, %arg2: i32) -> (i32, i32) {
    %c0_i32 = arith.constant 0 : i32
    return %arg0, %arg1 : i32, i32
  }
}

</mosaic_0001>

<bundles_post_ra>
// kernel: forward.6
= control target key start
LH: loop header
LB: loop body
LE: loop exit
PB: predicated region body
PF: predicated region fallthrough
CT: control target
= control target key end

     0   :  { %11 = vsyncpa [#allocation3], 0  ;;  %s2942_s0 = inlined_call_operand.vmem [shape: f32[2,48,48], index: 0, kind: input, shape index: {}]   ;;  %s2943_s1 = inlined_call_operand.vmem [shape: f32[2,48,48], index: 1, kind: input, shape index: {}]   ;;  %s2944_s2 = inlined_call_operand.vmem [shape: f32[2,48,48], index: 2, kind: input, shape index: {}]   ;;  %s2945_s3 = inlined_call_operand.vmem [shape: f32[2,48,48], index: 3, kind: input, shape index: {}]   ;;  %s2946_s4 = inlined_call_operand.hbm [shape: f32[9,32], index: 4, kind: input, shape index: {}]   ;;  %s2947_s5 = inlined_call_operand.hbm [shape: f32[32], index: 5, kind: input, shape index: {}]   ;;  %s2948_s6 = inlined_call_operand.vmem [shape: f32[2,32,47,47], index: 6, kind: output, shape index: {}]  }
   0x1   :  { %12 = vsyncpa [#allocation5], 0  ;;  %s1902_s21 = smov 0  }
   0x2 LB: > { %s206_s24 = sshll.u32 %s2946_s4, 4  ;;  %s1726_s25 = sadd.s32 4294967295, %s1856_s21   ;;  %s1856_s21 = sphi %s1902_s21, %s18_s21   ;;  %s207_s24 = int_to_ptr.hbm [resolvable:$true] %s206_s24 }
   0x3   : > { %p1728_p0 = scmp.ge.s32.totalorder %s1856_s21, 1  ;;  %p195_p1 = scmp.lt.s32.totalorder %s1856_s21, 3 }
   0x4   : > { %p1783_p3 = scmp.eq.s32.totalorder %s1726_s25, 0  ;;  %s219_s28 = sshll.u32 %s2947_s5, 4  ;;  %s220_s28 = int_to_ptr.hbm [resolvable:$true] %s219_s28 }
   0x5   : > { %p196_p2 = pnand %p1728_p0, %p195_p1  ;;  %s1862_s29 = smov [#allocation2]  }
   0x6   : > { %s1863_s30 = smov 128   ;;  %s1864_s7 = smov 8  }
   0x7   : > { %p1776_p4 = pneg %p196_p2  ;;  %s1865_s8 = smov [#allocation4]  }
   0x8   : > { %264 = sbr.rel (%p196_p2) target bundleno = 458 (0x1ca), region = 44 }
   0x9   : > { %p1777_p5 = pnand %p1783_p3, %p1776_p4 }
   0xb   : > { %1779 = dma.hbm_to_smem (!%p1777_p5), %s207_s24, 256, %s1862_s29, [#allocation3], %s1863_s30, %s1863_s30, %s1864_s7  }
   0xc   : > { %1782 = dma.hbm_to_smem (!%p1777_p5), %s220_s28, 16, %s1865_s8, [#allocation5]  }
   0xd   : > { %1847 = dma.done.wait (%p1783_p3), [#allocation3], 256  }
   0xe   : > { %1849 = vsyncadd (%p1783_p3), [#allocation3], 4294967040 }
   0xf   : > { %1851 = dma.done.wait (%p1783_p3), [#allocation5], 16  }
  0x10   : > { %1853 = vsyncadd (%p1783_p3), [#allocation5], 4294967280 }
  0x11   : > { %276 = sfence }
  0x12   : > { %p316_p6 = scmp.lt.s32.totalorder %s1726_s25, 1  ;;  %s1986_s27 = smov 0  }
  0x14   : > { %s3079_s25 = smov (!%p316_p6, %s1726_s25), 1 }
  0x15   : > { %s1766_s9 = smul.u32 48, %s3079_s25 }
  0x16   : > { %s1767_s10 = smul.u32 1536, %s3079_s25 }
  0x17   : > { %s320_s13 = scalar_lea.vmem %s2942_s0, %s1766_s9  ;;  %s325_s16 = scalar_lea.vmem %s2943_s1, %s1766_s9 }
  0x18   : > { %v1927_v0 = vld [vmem:[%s320_s13] sm:$0xff]  ;;  %v1929_v1 = vld [vmem:[%s320_s13 + $0x8] sm:$0xff]  ;;  %v1931_v2 = vld [vmem:[%s320_s13 + $0x10] sm:$0xff]  ;;  %s330_s19 = scalar_lea.vmem %s2944_s2, %s1766_s9  ;;  %s1939_s23 = scalar_lea.vmem %s2948_s6, %s1767_s10 }
  0x19   : > { %2993 = vst [vmem:[#allocation8_spill] sm:$0xff] %v1927_v0  ;;  %v1941_v3 = vld [vmem:[%s320_s13 + $0x18] sm:$0xff]  ;;  %v1943_v4 = vld [vmem:[%s320_s13 + $0x20] sm:$0xff]  ;;  %v1945_v5 = vld [vmem:[%s320_s13 + $0x28] sm:$0xff]  ;;  %s335_s26 = scalar_lea.vmem %s2945_s3, %s1766_s9 }
  0x1a   : > { %2994 = vst [vmem:[#allocation9_spill] sm:$0xff] %v1929_v1  ;;  %v1947_v6 = vld [vmem:[%s325_s16] sm:$0xff]  ;;  %v1949_v7 = vld [vmem:[%s325_s16 + $0x8] sm:$0xff]  ;;  %v1951_v8 = vld [vmem:[%s325_s16 + $0x10] sm:$0xff] }
  0x1b   : > { %2995 = vst [vmem:[#allocation10_spill] sm:$0xff] %v1931_v2  ;;  %v1956_v9 = vld [vmem:[%s325_s16 + $0x18] sm:$0xff]  ;;  %v1958_v10 = vld [vmem:[%s325_s16 + $0x20] sm:$0xff]  ;;  %v1960_v11 = vld [vmem:[%s325_s16 + $0x28] sm:$0xff] }
  0x1c   : > { %2996 = vst [vmem:[#allocation11_spill] sm:$0xff] %v1941_v3  ;;  %v1962_v12 = vld [vmem:[%s330_s19] sm:$0xff]  ;;  %v1964_v13 = vld [vmem:[%s330_s19 + $0x8] sm:$0xff]  ;;  %v1966_v14 = vld [vmem:[%s330_s19 + $0x10] sm:$0xff] }
  0x1d   : > { %2997 = vst [vmem:[#allocation12_spill] sm:$0xff] %v1943_v4  ;;  %v1968_v15 = vld [vmem:[%s330_s19 + $0x18] sm:$0xff]  ;;  %v1970_v16 = vld [vmem:[%s330_s19 + $0x20] sm:$0xff]  ;;  %v1972_v17 = vld [vmem:[%s330_s19 + $0x28] sm:$0xff] }
  0x1e   : > { %2998 = vst [vmem:[#allocation13_spill] sm:$0xff] %v1945_v5  ;;  %v1974_v18 = vld [vmem:[%s335_s26] sm:$0xff]  ;;  %v1976_v19 = vld [vmem:[%s335_s26 + $0x8] sm:$0xff]  ;;  %v1978_v20 = vld [vmem:[%s335_s26 + $0x10] sm:$0xff] }
  0x1f   : > { %2999 = vst [vmem:[#allocation14_spill] sm:$0xff] %v1949_v7  ;;  %v1980_v21 = vld [vmem:[%s335_s26 + $0x18] sm:$0xff]  ;;  %v1982_v22 = vld [vmem:[%s335_s26 + $0x20] sm:$0xff]  ;;  %v1984_v23 = vld [vmem:[%s335_s26 + $0x28] sm:$0xff] }
  0x20   : > { %3000 = vst [vmem:[#allocation15_spill] sm:$0xff] %v1956_v9 }
  0x21   : > { %3001 = vst [vmem:[#allocation16_spill] sm:$0xff] %v1960_v11 }
  0x22   : > { %3002 = vst [vmem:[#allocation17_spill] sm:$0xff] %v1966_v14 }
  0x23   : > { %3003 = vst [vmem:[#allocation18_spill] sm:$0xff] %v1968_v15 }
  0x24   : > { %3004 = vst [vmem:[#allocation19_spill] sm:$0xff] %v1972_v17 }
  0x25   : > { %3005 = vst [vmem:[#allocation20_spill] sm:$0xff] %v1980_v21 }
  0x26   : > { %3006 = vst [vmem:[#allocation21_spill] sm:$0xff] %v1982_v22 }
  0x27   : > { %3007 = vst [vmem:[#allocation22_spill] sm:$0xff] %v1984_v23 }
  0x28 LB: >> { %v3010_v7 = vld [vmem:[#allocation14_spill] sm:$0xff]  ;;  %v3011_v4 = vld [vmem:[#allocation12_spill] sm:$0xff]  ;;  %v3014_v1 = vld [vmem:[#allocation9_spill] sm:$0xff]  ;;  %s379_s28 = sshra.s32 %s1860_s27, 7  ;;  %s1993_s29 = sand.u32 127, %s1860_s27  ;;  %vm533_vm0 = vcmask 1046528   ;;  %s1860_s27 = sphi %s1986_s27, %s370_s27  }
  0x29   : >> { %v3013_v11 = vld [vmem:[#allocation16_spill] sm:$0xff]  ;;  %v3016_v14 = vld [vmem:[#allocation17_spill] sm:$0xff]  ;;  %v3017_v3 = vld [vmem:[#allocation11_spill] sm:$0xff]  ;;  %s1995_s30 = sshll.u32 %s379_s28, 7  ;;  %s1866_s19 = smov 127   ;;  %vm1598_vm1 = vcmask 384000  }
  0x2a   : >> { %v3009_v15 = vld [vmem:[#allocation18_spill] sm:$0xff]  ;;  %v3015_v0 = vld [vmem:[#allocation8_spill] sm:$0xff]  ;;  %v3020_v5 = vld [vmem:[#allocation13_spill] sm:$0xff]  ;;  %s1753_s7 = sadd.s32 256, %s1995_s30  ;;  %s1757_s10 = sadd.s32 512, %s1995_s30  ;;  %vm1604_vm2 = vcmask 382976  }
  0x2b   : >> { %v3012_v17 = vld [vmem:[#allocation19_spill] sm:$0xff]  ;;  %v3018_v2 = vld [vmem:[#allocation10_spill] sm:$0xff]  ;;  %s402_s8 = sadd.s32 %s1753_s7, %s1993_s29  ;;  %s1759_s11 = sadd.s32 640, %s1995_s30 }
  0x2c   : >> { %v3008_v21 = vld [vmem:[#allocation20_spill] sm:$0xff]  ;;  %v3022_v9 = vld [vmem:[#allocation15_spill] sm:$0xff]  ;;  %s403_s9 = sld [smem:[#allocation2 + %s402_s8]]  ;;  %s2002_s12 = sadd.s32 %s1757_s10, %s1993_s29 }
  0x2d   : >> { %v3019_v22 = vld [vmem:[#allocation21_spill] sm:$0xff]  ;;  %s1755_s13 = sadd.s32 384, %s1995_s30  ;;  %s1763_s15 = sadd.s32 896, %s1995_s30 }
  0x2e   : >> { %v3021_v23 = vld [vmem:[#allocation22_spill] sm:$0xff]  ;;  %s2008_s14 = sadd.s32 %s1755_s13, %s1993_s29  ;;  %s477_s16 = sadd.s32 %s1759_s11, %s1993_s29 }
  0x2f   : >> { %s2019_s17 = sadd.s32 %s1763_s15, %s1993_s29  ;;  %s1761_s18 = sadd.s32 768, %s1995_s30 }
  0x30   : >> { %s2025_s20 = sadd.s32 %s1761_s18, %s1993_s29  ;;  %s478_s22 = sld [smem:[#allocation2 + %s477_s16]] }
  0x31   : >> { %s1765_s24 = sadd.s32 1024, %s1995_s30  ;;  %s1751_s28 = sadd.s32 128, %s1995_s30 }
  0x32   : >> { %v2005_v24 = vstv %s403_s9  ;;  %s599_s25 = sadd.s32 %s1765_s24, %s1993_s29  ;;  %s385_s7 = sadd.s32 %s1751_s28, %s1993_s29 }
  0x33   : >> { %v409_v25 = vmul.f32 %v2005_v24, %v3011_v4  ;;  %v407_v26 = vmul.f32 %v2005_v24, %v3018_v2  ;;  %v405_v27 = vmul.f32 %v2005_v24, %v3015_v0  ;;  %v410_v28 = vmul.f32 %v2005_v24, %v3020_v5  ;;  %s600_s26 = sld [smem:[#allocation2 + %s599_s25]]  ;;  %s1596_s13 = smul.u32 48, %s1860_s27 }
  0x34   : >> { %v408_v29 = vmul.f32 %v2005_v24, %v3017_v3  ;;  %v406_v30 = vmul.f32 %v2005_v24, %v3014_v1  ;;  %s386_s30 = sld [smem:[#allocation2 + %s385_s7]]  ;;  %v693_v63 = vmul.f32 %v2005_v24, %v1951_v8 }
  0x35   : >> { %425 = vrot.lane.b32.xlu2 %v409_v25, %s1866_s19  ;;  %421 = vrot.lane.b32.xlu1 %v407_v26, %s1866_s19  ;;  %v692_v25 = vmul.f32 %v2005_v24, %v3010_v7  ;;  %v691_v26 = vmul.f32 %v2005_v24, %v1947_v6  ;;  %s461_s29 = sld [smem:[#allocation2 + %s2002_s12]] }
  0x36   : >> { %417 = vrot.lane.b32.xlu0 %v405_v27, %s1866_s19  ;;  %v2039_v31 = vstv %s478_s22  ;;  %v696_v27 = vmul.f32 %v2005_v24, %v3013_v11  ;;  %s371_s8 = sld [smem:[#allocation2 + %s1860_s27]] }
  0x37   : >> { %v482_v32 = vmul.f32 %v2039_v31, %v3016_v14  ;;  %v481_v33 = vmul.f32 %v2039_v31, %v1964_v13  ;;  %v480_v34 = vmul.f32 %v2039_v31, %v1962_v12  ;;  %v485_v36 = vmul.f32 %v2039_v31, %v3012_v17  ;;  %s444_s9 = sld [smem:[#allocation2 + %s2008_s14]]  ;;  %s2918_s14 = scalar_lea.vmem %s1939_s23, %s1596_s13 }
  0x38   : >> { %v484_v37 = vmul.f32 %v2039_v31, %v1970_v16  ;;  %v483_v38 = vmul.f32 %v2039_v31, %v3009_v15  ;;  %s560_s10 = sld [smem:[#allocation2 + %s2019_s17]] }
  0x39   : >> { %v2050_v35 = vstv %s600_s26  ;;  %s519_s11 = sld [smem:[#allocation2 + %s2025_s20]] }
  0x3a   : >> { %3023 = vst [vmem:[#allocation23_spill] sm:$0xff] %v2050_v35  ;;  %v604_v39 = vmul.f32 %v2050_v35, %v3018_v2  ;;  %v605_v40 = vmul.f32 %v2050_v35, %v3017_v3  ;;  %v603_v41 = vmul.f32 %v2050_v35, %v3014_v1  ;;  %v602_v42 = vmul.f32 %v2050_v35, %v3015_v0  ;;  %s1582_s12 = sld [smem:[#allocation4 + %s1860_s27]]  ;;  %s370_s27 = sadd.s32 1, %s1860_s27  }
  0x3b   : >> { %v607_v49 = vmul.f32 %v2050_v35, %v3020_v5  ;;  %v606_v50 = vmul.f32 %v2050_v35, %v3011_v4  ;;  %v2086_v56 = vstv %s386_s30  ;;  %p367_p7 = scmp.ge.s32.totalorder %s370_s27, 32  }
  0x3c   : >> { %v617_v43 = vrot.slane %v604_v39, 1  ;;  %v619_v44 = vrot.slane %v605_v40, 1  ;;  %v615_v45 = vrot.slane %v603_v41, 1  ;;  %v614_v46 = vrot.slane %v602_v42, 1  ;;  %3024 = vst [vmem:[#allocation24_spill] sm:$0xff] %v2086_v56 }
  0x3d   : >> { %427 = vrot.lane.b32.xlu2 %v410_v28, %s1866_s19  ;;  %423 = vrot.lane.b32.xlu1 %v408_v29, %s1866_s19  ;;  %v623_v52 = vrot.slane %v607_v49, 1  ;;  %v621_v53 = vrot.slane %v606_v50, 1  ;;  %v657_v57 = vmul.f32 %v2086_v56, %v3018_v2  ;;  %v656_v58 = vmul.f32 %v2086_v56, %v3014_v1 }
  0x3e   : >> { %419 = vrot.lane.b32.xlu0 %v406_v30, %s1866_s19  ;;  %v620_v47 = vsel %vm533_vm0, %v617_v43, %v619_v44  ;;  %v618_v48 = vsel %vm533_vm0, %v615_v45, %v617_v43  ;;  %v616_v51 = vsel %vm533_vm0, %v614_v46, %v615_v45  ;;  %v655_v59 = vmul.f32 %v2086_v56, %v3015_v0 }
  0x3f   : >> { %v624_v54 = vsel %vm533_vm0, %v621_v53, %v623_v52  ;;  %v622_v55 = vsel %vm533_vm0, %v619_v44, %v621_v53  ;;  %v660_v60 = vmul.f32 %v2086_v56, %v3020_v5  ;;  %v659_v61 = vmul.f32 %v2086_v56, %v3011_v4 }
  0x40   : >> { %v658_v62 = vmul.f32 %v2086_v56, %v3017_v3  ;;  %v695_v28 = vmul.f32 %v2005_v24, %v1958_v10  ;;  %v694_v29 = vmul.f32 %v2005_v24, %v3022_v9  ;;  %v2126_v30 = vstv %s461_s29 }
  0x41   : >> { %v744_v39 = vmul.f32 %v2126_v30, %v3012_v17  ;;  %v743_v40 = vmul.f32 %v2126_v30, %v1970_v16  ;;  %v742_v41 = vmul.f32 %v2126_v30, %v3009_v15  ;;  %v2150_v42 = vstv %s444_s9 }
  0x42   : >> { %v450_v44 = vmul.f32 %v2150_v42, %v1970_v16  ;;  %v777_v49 = vmul.f32 %v2039_v31, %v1978_v20  ;;  %v776_v50 = vmul.f32 %v2039_v31, %v1976_v19 }
  0x45   : >> { %496 = vrot.lane.b32.xlu2 %v482_v32, %s1866_s19  ;;  %494 = vrot.lane.b32.xlu1 %v481_v33, %s1866_s19  ;;  %v741_v32 = vmul.f32 %v2126_v30, %v3016_v14  ;;  %v740_v33 = vmul.f32 %v2126_v30, %v1964_v13 }
  0x46   : >> { %492 = vrot.lane.b32.xlu0 %v480_v34, %s1866_s19  ;;  %v739_v34 = vmul.f32 %v2126_v30, %v1962_v12 }
  0x4d   : >> { %502 = vrot.lane.b32.xlu2 %v485_v36, %s1866_s19  ;;  %500 = vrot.lane.b32.xlu1 %v484_v37, %s1866_s19  ;;  %v2137_v36 = vstv %s371_s8 }
  0x4e   : >> { %498 = vrot.lane.b32.xlu0 %v483_v38, %s1866_s19  ;;  %v377_v37 = vmul.f32 %v2137_v36, %v3011_v4  ;;  %v392_v38 = vmul.f32 %v2086_v56, %v1958_v10 }
  0x50   : >> { %v398_v43 = vadd.f32 %v392_v38, %v377_v37  ;;  %v468_v37 = vmul.f32 %v2126_v30, %v3021_v23  ;;  %v2199_v38 = vstv %s519_s11 }
  0x55   : >> { %629 = vrot.lane.b32.xlu2 %v620_v47, %s1866_s19  ;;  %627 = vrot.lane.b32.xlu1 %v618_v48, %s1866_s19  ;;  %v378_v47 = vmul.f32 %v2137_v36, %v3020_v5  ;;  %v393_v48 = vmul.f32 %v2086_v56, %v3013_v11 }
  0x56   : >> { %625 = vrot.lane.b32.xlu0 %v616_v51, %s1866_s19 }
  0x57   : >> { %v399_v53 = vadd.f32 %v393_v48, %v378_v47 }
  0x5d   : >> { %635 = vrot.lane.b32.xlu2 %v623_v52, %s1866_s19  ;;  %633 = vrot.lane.b32.xlu1 %v624_v54, %s1866_s19  ;;  %v775_v52 = vmul.f32 %v2039_v31, %v1974_v18  ;;  %v451_v54 = vmul.f32 %v2150_v42, %v3012_v17 }
  0x5e   : >> { %631 = vrot.lane.b32.xlu0 %v622_v55, %s1866_s19 }
  0x65   : >> { %671 = vrot.lane.b32.xlu2 %v657_v57, %s1866_s19  ;;  %669 = vrot.lane.b32.xlu1 %v656_v58, %s1866_s19  ;;  %v2175_v57 = vstv %s560_s10 }
  0x66   : >> { %667 = vrot.lane.b32.xlu0 %v655_v59, %s1866_s19  ;;  %v780_v59 = vmul.f32 %v2039_v31, %v3021_v23  ;;  %v851_v47 = vmul.f32 %v2175_v57, %v3020_v5  ;;  %v850_v48 = vmul.f32 %v2175_v57, %v3011_v4 }
  0x6d   : >> { %677 = vrot.lane.b32.xlu2 %v660_v60, %s1866_s19  ;;  %675 = vrot.lane.b32.xlu1 %v659_v61, %s1866_s19  ;;  %v779_v60 = vmul.f32 %v2039_v31, %v3019_v22  ;;  %v778_v61 = vmul.f32 %v2039_v31, %v3008_v21 }
  0x6e   : >> { %673 = vrot.lane.b32.xlu0 %v658_v62, %s1866_s19 }
  0x75   : >> { %707 = vrot.lane.b32.xlu2 %v693_v63, %s1866_s19  ;;  %705 = vrot.lane.b32.xlu1 %v692_v25, %s1866_s19  ;;  %v848_v63 = vmul.f32 %v2175_v57, %v3018_v2  ;;  %v849_v25 = vmul.f32 %v2175_v57, %v3017_v3 }
  0x76   : >> { %703 = vrot.lane.b32.xlu0 %v691_v26, %s1866_s19  ;;  %v847_v26 = vmul.f32 %v2175_v57, %v3014_v1 }
  0x7d   : >> { %713 = vrot.lane.b32.xlu2 %v696_v27, %s1866_s19  ;;  %711 = vrot.lane.b32.xlu1 %v695_v28, %s1866_s19  ;;  %v846_v27 = vmul.f32 %v2175_v57, %v3015_v0  ;;  %v861_v28 = vrot.slane %v848_v63, 1  ;;  %v865_v63 = vrot.slane %v850_v48, 1  ;;  %v895_v48 = vmul.f32 %v2050_v35, %v1951_v8 }
  0x7e   : >> { %709 = vrot.lane.b32.xlu0 %v694_v29, %s1866_s19  ;;  %v863_v29 = vrot.slane %v849_v25, 1  ;;  %v376_v25 = vmul.f32 %v2137_v36, %v3017_v3 }
  0x85   : >> { %755 = vrot.lane.b32.xlu2 %v741_v32, %s1866_s19  ;;  %753 = vrot.lane.b32.xlu1 %v740_v33, %s1866_s19  ;;  %v859_v32 = vrot.slane %v847_v26, 1  ;;  %v391_v26 = vmul.f32 %v2086_v56, %v3022_v9 }
  0x86   : >> { %751 = vrot.lane.b32.xlu0 %v739_v34, %s1866_s19  ;;  %v858_v34 = vrot.slane %v846_v27, 1 }
  0x8d   : >> { %761 = vrot.lane.b32.xlu2 %v744_v39, %s1866_s19  ;;  %759 = vrot.lane.b32.xlu1 %v743_v40, %s1866_s19  ;;  %v375_v39 = vmul.f32 %v2137_v36, %v3018_v2  ;;  %v390_v40 = vmul.f32 %v2086_v56, %v1951_v8 }
  0x8e   : >> { %757 = vrot.lane.b32.xlu0 %v742_v41, %s1866_s19  ;;  %v2207_v41 = vmul.f32 %v2199_v38, %v3020_v5 }
  0x8f   : >> { %v426_v45 = vpop.permute.xlu2 %425 }
  0x90   : >> { %v439_v46 = vadd.f32 %v426_v45, %v398_v43  ;;  %v373_v43 = vmul.f32 %v2137_v36, %v3015_v0  ;;  %v864_v45 = vsel %vm533_vm0, %v861_v28, %v863_v29 }
  0x92   : >> { %v2166_v51 = vadd.f32 %v450_v44, %v439_v46  ;;  %v388_v44 = vmul.f32 %v2086_v56, %v1947_v6  ;;  %v862_v46 = vsel %vm533_vm0, %v859_v32, %v861_v28 }
  0x95   : >> { %791 = vrot.lane.b32.xlu2 %v777_v49, %s1866_s19  ;;  %789 = vrot.lane.b32.xlu1 %v776_v50, %s1866_s19  ;;  %v860_v49 = vsel %vm533_vm0, %v858_v34, %v859_v32  ;;  %v2222_v50 = vmul.f32 %v2199_v38, %v3018_v2  ;;  %v2245_v34 = vmul.f32 %v2175_v57, %v1951_v8 }
  0x96   : >> { %787 = vrot.lane.b32.xlu0 %v775_v52, %s1866_s19  ;;  %v894_v32 = vmul.f32 %v2050_v35, %v3010_v7 }
  0x97   : >> { %v428_v55 = vpop.permute.xlu2 %427  ;;  %v3026_v5 = vrot.slane %v2222_v50, 1 }
  0x98   : >> { %v440_v58 = vadd.f32 %v428_v55, %v399_v53  ;;  %v448_v53 = vmul.f32 %v2150_v42, %v3016_v14  ;;  %v2228_v55 = vmul.f32 %v2199_v38, %v3017_v3 }
  0x9a   : >> { %v457_v62 = vadd.f32 %v451_v54, %v440_v58  ;;  %v396_v54 = vadd.f32 %v390_v40, %v375_v39  ;;  %v2959_v58 = vrot.slane %v2207_v41, 1  ;;  %v374_v39 = vmul.f32 %v2137_v36, %v3014_v1 }
  0x9b   : >> { %v3025_v23 = vrot.slane %v2228_v55, 1 }
  0x9c   : >> { %v474_v52 = vadd.f32 %v468_v37, %v457_v62  ;;  %v867_v62 = vrot.slane %v851_v47, 1  ;;  %v2249_v37 = vmul.f32 %v2175_v57, %v3022_v9 }
  0x9d   : >> { %797 = vrot.lane.b32.xlu2 %v780_v59, %s1866_s19  ;;  %795 = vrot.lane.b32.xlu1 %v779_v60, %s1866_s19  ;;  %v465_v59 = vmul.f32 %v2126_v30, %v1978_v20  ;;  %v446_v60 = vmul.f32 %v2150_v42, %v1962_v12 }
  0x9e   : >> { %793 = vrot.lane.b32.xlu0 %v778_v61, %s1866_s19  ;;  %v394_v61 = vadd.f32 %v388_v44, %v373_v43 }
  0x9f   : >> { %v2195_v33 = vpop.permute.xlu2 %496 }
  0xa5   : >> { %873 = vrot.lane.b32.xlu2 %v864_v45, %s1866_s19  ;;  %871 = vrot.lane.b32.xlu1 %v862_v46, %s1866_s19  ;;  %v389_v46 = vmul.f32 %v2086_v56, %v3010_v7  ;;  %v893_v56 = vmul.f32 %v2050_v35, %v1947_v6 }
  0xa6   : >> { %869 = vrot.lane.b32.xlu0 %v860_v49, %s1866_s19  ;;  %v2260_v49 = vmul.f32 %v2050_v35, %v3022_v9 }
  0xa7   : >> { %v503_v27 = vpop.permute.xlu2 %502  ;;  %v422_v28 = vpop.permute.xlu1 %421 }
  0xa8   : >> { %v515_v40 = vadd.f32 %v503_v27, %v474_v52  ;;  %v437_v43 = vadd.f32 %v422_v28, %v396_v54  ;;  %v418_v44 = vpop.permute.xlu0 %417  ;;  %v868_v27 = vsel %vm533_vm0, %v865_v63, %v867_v62  ;;  %v866_v28 = vsel %vm533_vm0, %v863_v29, %v865_v63 }
  0xa9   : >> { %v435_v47 = vadd.f32 %v418_v44, %v394_v61  ;;  %v2958_v61 = vrot.slane %v2245_v34, 1  ;;  %v2957_v44 = vrot.slane %v2249_v37, 1  ;;  %v395_v29 = vadd.f32 %v389_v46, %v374_v39 }
  0xaa   : >> { %v556_v52 = vadd.f32 %v2959_v58, %v515_v40  ;;  %v454_v54 = vadd.f32 %v448_v53, %v437_v43  ;;  %v540_v40 = vsel %vm533_vm0, %v3026_v5, %v3025_v23  ;;  %v397_v53 = vadd.f32 %v391_v26, %v376_v25 }
  0xab   : >> { %v452_v45 = vadd.f32 %v446_v60, %v435_v47  ;;  %v2279_v43 = vmul.f32 %v2175_v57, %v3013_v11  ;;  %v908_v60 = vrot.slane %v895_v48, 1  ;;  %v910_v63 = vrot.slane %v2260_v49, 1 }
  0xac   : >> { %v471_v9 = vadd.f32 %v465_v59, %v454_v54  ;;  %v906_v59 = vrot.slane %v894_v32, 1  ;;  %v449_v5 = vmul.f32 %v2150_v42, %v3009_v15  ;;  %v580_v23 = vsel %vm533_vm0, %v2958_v61, %v2957_v44 }
  0xad   : >> { %879 = vrot.lane.b32.xlu2 %v867_v62, %s1866_s19  ;;  %877 = vrot.lane.b32.xlu1 %v868_v27, %s1866_s19  ;;  %v447_v26 = vmul.f32 %v2150_v42, %v1964_v13  ;;  %v905_v39 = vrot.slane %v893_v56, 1  ;;  %v522_v32 = vmul.f32 %v2199_v38, %v3014_v1  ;;  %v583_v48 = vrot.slane %v2279_v43, 1 }
  0xae   : >> { %875 = vrot.lane.b32.xlu0 %v866_v28, %s1866_s19  ;;  %v512_v47 = vadd.f32 %v2195_v33, %v471_v9  ;;  %v521_v49 = vmul.f32 %v2199_v38, %v3015_v0  ;;  %v911_v27 = vsel %vm533_vm0, %v908_v60, %v910_v63  ;;  %v909_v28 = vsel %vm533_vm0, %v906_v59, %v908_v60 }
  0xaf   : >> { %v630_v62 = vpop.permute.xlu2 %629  ;;  %v424_v25 = vpop.permute.xlu1 %423  ;;  %v464_v44 = vmul.f32 %v2126_v30, %v1976_v19  ;;  %v535_v58 = vrot.slane %v522_v32, 1  ;;  %v596_v60 = vadd.f32 %v583_v48, %v556_v52  ;;  %v525_v52 = vmul.f32 %v2199_v38, %v3011_v4 }
  0xb0   : >> { %v553_v46 = vadd.f32 %v540_v40, %v512_v47  ;;  %v438_v9 = vadd.f32 %v424_v25, %v397_v53  ;;  %v420_v33 = vpop.permute.xlu0 %419  ;;  %v898_v40 = vmul.f32 %v2050_v35, %v3013_v11  ;;  %v897_v53 = vmul.f32 %v2050_v35, %v1958_v10 }
  0xb1   : >> { %v436_v54 = vadd.f32 %v420_v33, %v395_v29  ;;  %v907_v25 = vsel %vm533_vm0, %v905_v39, %v906_v59  ;;  %v463_v29 = vmul.f32 %v2126_v30, %v1974_v18  ;;  %v3027_v39 = vrot.slane %v2222_v50, 1 }
  0xb2   : >> { %v593_v56 = vadd.f32 %v580_v23, %v553_v46  ;;  %v455_v61 = vadd.f32 %v449_v5, %v438_v9  ;;  %v534_v23 = vrot.slane %v521_v49, 1  ;;  %v912_v46 = vrot.slane %v897_v53, 1 }
  0xb3   : >> { %v453_v47 = vadd.f32 %v447_v26, %v436_v54  ;;  %v914_v26 = vrot.slane %v898_v40, 1  ;;  %v538_v32 = vsel %vm533_vm0, %v535_v58, %v3027_v39  ;;  %v469_v9 = vadd.f32 %v463_v29, %v452_v45 }
  0xb4   : >> { %v2311_v33 = vadd.f32 %v630_v62, %v593_v56  ;;  %v467_v50 = vmul.f32 %v2126_v30, %v3019_v22  ;;  %v466_v53 = vmul.f32 %v2126_v30, %v3008_v21  ;;  %v563_v29 = vmul.f32 %v2175_v57, %v3010_v7 }
  0xb5   : >> { %920 = vrot.lane.b32.xlu2 %v911_v27, %s1866_s19  ;;  %918 = vrot.lane.b32.xlu1 %v909_v28, %s1866_s19  ;;  %v470_v5 = vadd.f32 %v464_v44, %v453_v47  ;;  %v536_v27 = vsel %vm533_vm0, %v534_v23, %v535_v58  ;;  %v915_v40 = vsel %vm533_vm0, %v912_v46, %v914_v26  ;;  %v3028_v23 = vrot.slane %v2207_v41, 1 }
  0xb6   : >> { %916 = vrot.lane.b32.xlu0 %v907_v25, %s1866_s19  ;;  %v913_v47 = vsel %vm533_vm0, %v910_v63, %v912_v46  ;;  %v541_v25 = vrot.slane %v525_v52, 1  ;;  %v562_v58 = vmul.f32 %v2175_v57, %v1947_v6  ;;  %v472_v46 = vadd.f32 %v466_v53, %v455_v61 }
  0xb7   : >> { %v636_v59 = vpop.permute.xlu2 %635  ;;  %v495_v62 = vpop.permute.xlu1 %494  ;;  %v575_v39 = vrot.slane %v563_v29, 1  ;;  %v964_v61 = vmul.f32 %v2005_v24, %v1962_v12 }
  0xb8   : >> { %v2323_v49 = vadd.f32 %v636_v59, %v596_v60  ;;  %v511_v54 = vadd.f32 %v495_v62, %v470_v5  ;;  %v493_v28 = vpop.permute.xlu0 %492  ;;  %v473_v60 = vadd.f32 %v467_v50, %v2166_v51  ;;  %v544_v5 = vsel %vm533_vm0, %v541_v25, %v3028_v23 }
  0xb9   : >> { %v510_v56 = vadd.f32 %v493_v28, %v469_v9  ;;  %v3029_v62 = vrot.slane %v2228_v55, 1  ;;  %v574_v52 = vrot.slane %v562_v58, 1  ;;  %v965_v51 = vmul.f32 %v2005_v24, %v1964_v13 }
  0xba   : >> { %v552_v44 = vadd.f32 %v538_v32, %v511_v54 }
  0xbb   : >> { %v551_v45 = vadd.f32 %v536_v27, %v510_v56  ;;  %v542_v9 = vsel %vm533_vm0, %v3029_v62, %v541_v25  ;;  %v966_v27 = vmul.f32 %v2005_v24, %v3016_v14  ;;  %v3030_v56 = vrot.slane %v2245_v34, 1 }
  0xbc   : >> { %v576_v50 = vsel %vm533_vm0, %v574_v52, %v575_v39  ;;  %v651_v34 = vmul.f32 %v2137_v36, %v1951_v8  ;;  %v3033_v52 = vrot.slane %v2249_v37, 1  ;;  %v654_v37 = vmul.f32 %v2137_v36, %v3013_v11 }
  0xbd   : >> { %926 = vrot.lane.b32.xlu2 %v914_v26, %s1866_s19  ;;  %924 = vrot.lane.b32.xlu1 %v915_v40, %s1866_s19  ;;  %v578_v55 = vsel %vm533_vm0, %v575_v39, %v3030_v56  ;;  %v566_v40 = vmul.f32 %v2175_v57, %v1958_v10  ;;  %v591_v25 = vadd.f32 %v576_v50, %v551_v45 }
  0xbe   : >> { %922 = vrot.lane.b32.xlu0 %v913_v47, %s1866_s19  ;;  %v592_v53 = vadd.f32 %v578_v55, %v552_v44  ;;  %v1072_v44 = vmul.f32 %v2039_v31, %v3018_v2  ;;  %v967_v45 = vmul.f32 %v2005_v24, %v3009_v15  ;;  %v1073_v39 = vmul.f32 %v2039_v31, %v3017_v3 }
  0xbf   : >> { %v501_v63 = vpop.permute.xlu1 %500  ;;  %v672_v59 = vpop.permute.xlu2 %671  ;;  %v581_v58 = vrot.slane %v566_v40, 1 }
  0xc0   : >> { %v514_v32 = vadd.f32 %v501_v63, %v473_v60  ;;  %v499_v26 = vpop.permute.xlu0 %498  ;;  %v969_v63 = vmul.f32 %v2005_v24, %v3012_v17 }
  0xc1   : >> { %v513_v54 = vadd.f32 %v499_v26, %v472_v46  ;;  %v968_v46 = vmul.f32 %v2005_v24, %v1970_v16  ;;  %v584_v62 = vsel %vm533_vm0, %v581_v58, %v583_v48  ;;  %v687_v26 = vadd.f32 %v672_v59, %v651_v34 }
  0xc2   : >> { %v555_v41 = vadd.f32 %v544_v5, %v514_v32  ;;  %v1071_v32 = vmul.f32 %v2039_v31, %v3014_v1  ;;  %v729_v48 = vmul.f32 %v2150_v42, %v1978_v20  ;;  %v1074_v34 = vmul.f32 %v2039_v31, %v3011_v4 }
  0xc3   : >> { %v554_v28 = vadd.f32 %v542_v9, %v513_v54  ;;  %v1070_v9 = vmul.f32 %v2039_v31, %v3015_v0  ;;  %v582_v54 = vsel %vm533_vm0, %v3033_v52, %v581_v58  ;;  %v3035_v58 = vld [vmem:[#allocation13_spill] sm:$0xff] }
  0xc4   : >> { %v1083_v43 = vrot.slane %v1071_v32, 1  ;;  %v3036_v32 = vld [vmem:[#allocation22_spill] sm:$0xff] }
  0xc5   : >> { %980 = vrot.lane.b32.xlu2 %v966_v27, %s1866_s19  ;;  %978 = vrot.lane.b32.xlu1 %v965_v51, %s1866_s19  ;;  %v1085_v27 = vrot.slane %v1072_v44, 1  ;;  %v595_v51 = vadd.f32 %v584_v62, %v555_v41  ;;  %v594_v55 = vadd.f32 %v582_v54, %v554_v28  ;;  %v1082_v40 = vrot.slane %v1070_v9, 1 }
  0xc6   : >> { %976 = vrot.lane.b32.xlu0 %v964_v61, %s1866_s19  ;;  %v1087_v61 = vrot.slane %v1073_v39, 1  ;;  %v1075_v41 = vmul.f32 %v2039_v31, %v3035_v58  ;;  %v1089_v39 = vrot.slane %v1074_v34, 1  ;;  %v732_v62 = vmul.f32 %v2150_v42, %v3036_v32 }
  0xc7   : >> { %v628_v47 = vpop.permute.xlu1 %627  ;;  %v678_v29 = vpop.permute.xlu2 %677  ;;  %v1086_v28 = vsel %vm533_vm0, %v1083_v43, %v1085_v27 }
  0xc8   : >> { %v2363_v60 = vadd.f32 %v628_v47, %v592_v53  ;;  %v626_v23 = vpop.permute.xlu0 %625  ;;  %v690_v44 = vadd.f32 %v678_v29, %v654_v37  ;;  %v1189_v29 = vmul.f32 %v2050_v35, %v3016_v14 }
  0xc9   : >> { %v2365_v5 = vadd.f32 %v626_v23, %v591_v25  ;;  %v1088_v23 = vsel %vm533_vm0, %v1085_v27, %v1087_v61 }
  0xca   : >> { %3031 = vst [vmem:[#allocation25_spill] sm:$0xff] %v2363_v60 }
  0xcb   : >> { %3032 = vst [vmem:[#allocation26_spill] sm:$0xff] %v2365_v5  ;;  %v1486_v5 = vmul.f32 %v2175_v57, %v1970_v16 }
  0xcd   : >> { %986 = vrot.lane.b32.xlu2 %v969_v63, %s1866_s19  ;;  %984 = vrot.lane.b32.xlu1 %v968_v46, %s1866_s19  ;;  %v1084_v46 = vsel %vm533_vm0, %v1082_v40, %v1083_v43  ;;  %v1188_v43 = vmul.f32 %v2050_v35, %v1964_v13 }
  0xce   : >> { %982 = vrot.lane.b32.xlu0 %v967_v45, %s1866_s19  ;;  %v1091_v45 = vrot.slane %v1075_v41, 1 }
  0xcf   : >> { %v634_v56 = vpop.permute.xlu1 %633  ;;  %v708_v59 = vpop.permute.xlu2 %707  ;;  %v1200_v37 = vrot.slane %v1188_v43, 1 }
  0xd0   : >> { %v2394_v50 = vadd.f32 %v634_v56, %v595_v51  ;;  %v632_v53 = vpop.permute.xlu0 %631  ;;  %v723_v47 = vadd.f32 %v708_v59, %v687_v26  ;;  %v1092_v27 = vsel %vm533_vm0, %v1089_v39, %v1091_v45  ;;  %v1190_v51 = vmul.f32 %v2050_v35, %v3009_v15 }
  0xd1   : >> { %v2396_v25 = vadd.f32 %v632_v53, %v594_v55  ;;  %v1090_v56 = vsel %vm533_vm0, %v1087_v61, %v1089_v39  ;;  %v1187_v55 = vmul.f32 %v2050_v35, %v1962_v12  ;;  %v1202_v59 = vrot.slane %v1189_v29, 1 }
  0xd2   : >> { %v735_v63 = vadd.f32 %v729_v48, %v723_v47  ;;  %v1204_v40 = vrot.slane %v1190_v51, 1  ;;  %v650_v61 = vmul.f32 %v2137_v36, %v3010_v7  ;;  %v649_v39 = vmul.f32 %v2137_v36, %v1947_v6 }
  0xd3   : >> { %3034 = vst [vmem:[#allocation27_spill] sm:$0xff] %v2396_v25  ;;  %v1199_v41 = vrot.slane %v1187_v55, 1  ;;  %v2443_v55 = vmul.f32 %v2199_v38, %v1951_v8 }
  0xd5   : >> { %1097 = vrot.lane.b32.xlu2 %v1088_v23, %s1866_s19  ;;  %1095 = vrot.lane.b32.xlu1 %v1086_v28, %s1866_s19  ;;  %v1205_v28 = vsel %vm533_vm0, %v1202_v59, %v1204_v40 }
  0xd6   : >> { %1093 = vrot.lane.b32.xlu0 %v1084_v46, %s1866_s19  ;;  %v1203_v46 = vsel %vm533_vm0, %v1200_v37, %v1202_v59  ;;  %v3037_v59 = vld [vmem:[#allocation15_spill] sm:$0xff] }
  0xd7   : >> { %v714_v9 = vpop.permute.xlu2 %713  ;;  %v670_v26 = vpop.permute.xlu1 %669 }
  0xd8   : >> { %v726_v52 = vadd.f32 %v714_v9, %v690_v44  ;;  %v668_v54 = vpop.permute.xlu0 %667  ;;  %v1192_v44 = vmul.f32 %v2050_v35, %v3012_v17 }
  0xd9   : >> { %v685_v29 = vadd.f32 %v668_v54, %v649_v39  ;;  %v653_v54 = vmul.f32 %v2137_v36, %v1958_v10 }
  0xda   : >> { %v738_v48 = vadd.f32 %v732_v62, %v726_v52  ;;  %v1201_v62 = vsel %vm533_vm0, %v1199_v41, %v1200_v37  ;;  %v1208_v9 = vrot.slane %v1192_v44, 1 }
  0xdd   : >> { %1103 = vrot.lane.b32.xlu2 %v1091_v45, %s1866_s19  ;;  %1101 = vrot.lane.b32.xlu1 %v1092_v27, %s1866_s19  ;;  %v1191_v45 = vmul.f32 %v2050_v35, %v1970_v16  ;;  %v728_v27 = vmul.f32 %v2150_v42, %v1976_v19 }
  0xde   : >> { %1099 = vrot.lane.b32.xlu0 %v1090_v56, %s1866_s19  ;;  %v727_v56 = vmul.f32 %v2150_v42, %v1974_v18 }
  0xdf   : >> { %v756_v53 = vpop.permute.xlu2 %755  ;;  %v676_v47 = vpop.permute.xlu1 %675  ;;  %v1206_v52 = vrot.slane %v1191_v45, 1 }
  0xe0   : >> { %v771_v34 = vadd.f32 %v756_v53, %v735_v63  ;;  %v674_v23 = vpop.permute.xlu0 %673  ;;  %v686_v63 = vadd.f32 %v670_v26, %v650_v61  ;;  %v2447_v26 = vmul.f32 %v2199_v38, %v3037_v59 }
  0xe1   : >> { %v1207_v45 = vsel %vm533_vm0, %v1204_v40, %v1206_v52 }
  0xe2   : >> { %v2962_v35 = vrot.slane %v2447_v26, 1 }
  0xe5   : >> { %1214 = vrot.lane.b32.xlu2 %v1205_v28, %s1866_s19  ;;  %1212 = vrot.lane.b32.xlu1 %v1203_v46, %s1866_s19  ;;  %v652_v28 = vmul.f32 %v2137_v36, %v3037_v59  ;;  %v1209_v46 = vsel %vm533_vm0, %v1206_v52, %v1208_v9  ;;  %v730_v52 = vmul.f32 %v2150_v42, %v3008_v21 }
  0xe6   : >> { %1210 = vrot.lane.b32.xlu0 %v1201_v62, %s1866_s19  ;;  %v826_v62 = vrot.slane %v2443_v55, 1 }
  0xe7   : >> { %v762_v51 = vpop.permute.xlu2 %761  ;;  %v706_v43 = vpop.permute.xlu1 %705 }
  0xe8   : >> { %v774_v37 = vadd.f32 %v762_v51, %v738_v48  ;;  %v722_v53 = vadd.f32 %v706_v43, %v686_v63  ;;  %v704_v41 = vpop.permute.xlu0 %703  ;;  %v689_v48 = vadd.f32 %v676_v47, %v653_v54  ;;  %v731_v63 = vmul.f32 %v2150_v42, %v3019_v22  ;;  %v3038_v47 = vld [vmem:[#allocation24_spill] sm:$0xff] }
  0xe9   : >> { %v721_v61 = vadd.f32 %v704_v41, %v685_v29  ;;  %v688_v29 = vadd.f32 %v674_v23, %v652_v28  ;;  %v829_v40 = vsel %vm533_vm0, %v826_v62, %v2962_v35  ;;  %v1247_v41 = vmul.f32 %v3038_v47, %v1964_v13 }
  0xea   : >> { %v734_v44 = vadd.f32 %v728_v27, %v722_v53  ;;  %v1248_v53 = vmul.f32 %v3038_v47, %v3016_v14  ;;  %v1246_v23 = vmul.f32 %v3038_v47, %v1962_v12  ;;  %v2475_v28 = vmul.f32 %v2199_v38, %v3013_v11 }
  0xeb   : >> { %v733_v39 = vadd.f32 %v727_v56, %v721_v61 }
  0xed   : >> { %1220 = vrot.lane.b32.xlu2 %v1208_v9, %s1866_s19  ;;  %1218 = vrot.lane.b32.xlu1 %v1209_v46, %s1866_s19 }
  0xee   : >> { %1216 = vrot.lane.b32.xlu0 %v1207_v45, %s1866_s19 }
  0xef   : >> { %v792_v51 = vpop.permute.xlu2 %791  ;;  %v712_v27 = vpop.permute.xlu1 %711 }
  0xf0   : >> { %v807_v43 = vadd.f32 %v792_v51, %v771_v34  ;;  %v725_v9 = vadd.f32 %v712_v27, %v689_v48  ;;  %v710_v56 = vpop.permute.xlu0 %709  ;;  %v832_v34 = vrot.slane %v2475_v28, 1  ;;  %v1284_v28 = vmul.f32 %v2005_v24, %v1978_v20 }
  0xf1   : >> { %v724_v55 = vadd.f32 %v710_v56, %v688_v29 }
  0xf2   : >> { %v842_v61 = vadd.f32 %v829_v40, %v807_v43  ;;  %v737_v54 = vadd.f32 %v731_v63, %v725_v9  ;;  %v1251_v63 = vmul.f32 %v3038_v47, %v3012_v17  ;;  %v1249_v43 = vmul.f32 %v3038_v47, %v3009_v15 }
  0xf3   : >> { %v736_v46 = vadd.f32 %v730_v52, %v724_v55  ;;  %v1250_v52 = vmul.f32 %v3038_v47, %v1970_v16 }
  0xf5   : >> { %1262 = vrot.lane.b32.xlu2 %v1248_v53, %s1866_s19  ;;  %1260 = vrot.lane.b32.xlu1 %v1247_v41, %s1866_s19  ;;  %v811_v41 = vmul.f32 %v2199_v38, %v1947_v6 }
  0xf6   : >> { %1258 = vrot.lane.b32.xlu0 %v1246_v23, %s1866_s19 }
  0xf7   : >> { %v798_v45 = vpop.permute.xlu2 %797  ;;  %v754_v48 = vpop.permute.xlu1 %753 }
  0xf8   : >> { %v810_v29 = vadd.f32 %v798_v45, %v774_v37  ;;  %v770_v51 = vadd.f32 %v754_v48, %v734_v44  ;;  %v752_v27 = vpop.permute.xlu0 %751  ;;  %v1283_v45 = vmul.f32 %v2005_v24, %v1976_v19  ;;  %v1282_v48 = vmul.f32 %v2005_v24, %v1974_v18 }
  0xf9   : >> { %v769_v40 = vadd.f32 %v752_v27, %v733_v39  ;;  %v812_v39 = vmul.f32 %v2199_v38, %v3010_v7  ;;  %v823_v27 = vrot.slane %v811_v41, 1  ;;  %v1286_v41 = vmul.f32 %v2005_v24, %v3019_v22 }
  0xfa   : >> { %v845_v9 = vadd.f32 %v832_v34, %v810_v29 }
  0xfb   : >> { %v824_v29 = vrot.slane %v812_v39, 1 }
  0xfd   : >> { %1268 = vrot.lane.b32.xlu2 %v1251_v63, %s1866_s19  ;;  %1266 = vrot.lane.b32.xlu1 %v1250_v52, %s1866_s19  ;;  %v815_v63 = vmul.f32 %v2199_v38, %v1958_v10 }
  0xfe   : >> { %1264 = vrot.lane.b32.xlu0 %v1249_v43, %s1866_s19 }
  0xff   : >> { %v874_v37 = vpop.permute.xlu2 %873  ;;  %v760_v44 = vpop.permute.xlu1 %759 }
 0x100   : >> { %v889_v56 = vadd.f32 %v874_v37, %v842_v61  ;;  %v773_v55 = vadd.f32 %v760_v44, %v737_v54  ;;  %v758_v53 = vpop.permute.xlu0 %757  ;;  %v825_v44 = vsel %vm533_vm0, %v823_v27, %v824_v29 }
 0x101   : >> { %v772_v23 = vadd.f32 %v758_v53, %v736_v46  ;;  %v827_v46 = vsel %vm533_vm0, %v824_v29, %v826_v62  ;;  %v1287_v53 = vmul.f32 %v2005_v24, %v3036_v32  ;;  %v1355_v62 = vmul.f32 %v2126_v30, %v3018_v2 }
 0x102   : >> { %v830_v29 = vrot.slane %v815_v63, 1  ;;  %v3039_v63 = vrot.slane %v2447_v26, 1 }
 0x104   : >> { %v833_v22 = vsel %vm533_vm0, %v830_v29, %v832_v34 }
 0x105   : >> { %1298 = vrot.lane.b32.xlu2 %v1284_v28, %s1866_s19  ;;  %1296 = vrot.lane.b32.xlu1 %v1283_v45, %s1866_s19  ;;  %v1285_v28 = vmul.f32 %v2005_v24, %v3008_v21  ;;  %v1368_v24 = vrot.slane %v1355_v62, 1 }
 0x106   : >> { %1294 = vrot.lane.b32.xlu0 %v1282_v48, %s1866_s19 }
 0x107   : >> { %v880_v61 = vpop.permute.xlu2 %879  ;;  %v790_v54 = vpop.permute.xlu1 %789 }
 0x108   : >> { %v892_v52 = vadd.f32 %v880_v61, %v845_v9  ;;  %v806_v43 = vadd.f32 %v790_v54, %v770_v51  ;;  %v788_v37 = vpop.permute.xlu0 %787  ;;  %v1356_v9 = vmul.f32 %v2126_v30, %v3017_v3  ;;  %v1354_v51 = vmul.f32 %v2126_v30, %v3014_v1 }
 0x109   : >> { %v805_v39 = vadd.f32 %v788_v37, %v769_v40  ;;  %v1353_v40 = vmul.f32 %v2126_v30, %v3015_v0 }
 0x10a   : >> { %v841_v45 = vadd.f32 %v827_v46, %v806_v43  ;;  %v1370_v27 = vrot.slane %v1356_v9, 1  ;;  %v1366_v61 = vrot.slane %v1354_v51, 1 }
 0x10b   : >> { %v840_v48 = vadd.f32 %v825_v44, %v805_v39  ;;  %v1365_v35 = vrot.slane %v1353_v40, 1  ;;  %v831_v44 = vsel %vm533_vm0, %v3039_v63, %v830_v29  ;;  %v2544_v40 = vmul.f32 %v2150_v42, %v3018_v2 }
 0x10c   : >> { %v1371_v34 = vsel %vm533_vm0, %v1368_v24, %v1370_v27  ;;  %v2596_v63 = vmul.f32 %v2126_v30, %v3037_v59 }
 0x10d   : >> { %1304 = vrot.lane.b32.xlu2 %v1287_v53, %s1866_s19  ;;  %1302 = vrot.lane.b32.xlu1 %v1286_v41, %s1866_s19  ;;  %v1358_v53 = vmul.f32 %v2126_v30, %v3035_v58  ;;  %v1357_v41 = vmul.f32 %v2126_v30, %v3011_v4  ;;  %v1367_v62 = vsel %vm533_vm0, %v1365_v35, %v1366_v61 }
 0x10e   : >> { %1300 = vrot.lane.b32.xlu0 %v1285_v28, %s1866_s19 }
 0x10f   : >> { %v921_v54 = vpop.permute.xlu2 %920  ;;  %v796_v37 = vpop.permute.xlu1 %795 }
 0x110   : >> { %v2525_v46 = vadd.f32 %v921_v54, %v889_v56  ;;  %v809_v43 = vadd.f32 %v796_v37, %v773_v55  ;;  %v794_v25 = vpop.permute.xlu0 %793  ;;  %v1369_v56 = vsel %vm533_vm0, %v1366_v61, %v1368_v24  ;;  %v954_v61 = vmul.f32 %v3038_v47, %v1978_v20 }
 0x111   : >> { %v808_v39 = vadd.f32 %v794_v25, %v772_v23  ;;  %v1374_v25 = vrot.slane %v1358_v53, 1  ;;  %v1372_v23 = vrot.slane %v1357_v41, 1  ;;  %v948_v54 = vmul.f32 %v2137_v36, %v3016_v14 }
 0x112   : >> { %v844_v55 = vadd.f32 %v833_v22, %v809_v43  ;;  %v2548_v22 = vmul.f32 %v2150_v42, %v3017_v3  ;;  %v2967_v53 = vrot.slane %v2544_v40, 1  ;;  %v1400_v41 = vmul.f32 %v2039_v31, %v1947_v6 }
 0x113   : >> { %v843_v26 = vadd.f32 %v831_v44, %v808_v39  ;;  %v1375_v43 = vsel %vm533_vm0, %v1372_v23, %v1374_v25  ;;  %v1402_v44 = vmul.f32 %v2039_v31, %v1951_v8  ;;  %v1373_v39 = vsel %vm533_vm0, %v1370_v27, %v1372_v23 }
 0x115   : >> { %1380 = vrot.lane.b32.xlu2 %v1371_v34, %s1866_s19  ;;  %1378 = vrot.lane.b32.xlu1 %v1369_v56, %s1866_s19  ;;  %v960_v34 = vadd.f32 %v954_v61, %v948_v54  ;;  %v1415_v56 = vrot.slane %v1402_v44, 1  ;;  %v957_v61 = vmul.f32 %v3038_v47, %v3036_v32 }
 0x116   : >> { %1376 = vrot.lane.b32.xlu0 %v1367_v62, %s1866_s19 }
 0x117   : >> { %v927_v9 = vpop.permute.xlu2 %926  ;;  %v872_v51 = vpop.permute.xlu1 %871 }
 0x118   : >> { %v2550_v35 = vadd.f32 %v927_v9, %v892_v52  ;;  %v888_v29 = vadd.f32 %v872_v51, %v841_v45  ;;  %v870_v24 = vpop.permute.xlu0 %869  ;;  %v1403_v52 = vmul.f32 %v2039_v31, %v3037_v59  ;;  %v1401_v45 = vmul.f32 %v2039_v31, %v3010_v7 }
 0x119   : >> { %v887_v37 = vadd.f32 %v870_v24, %v840_v48  ;;  %v2966_v48 = vrot.slane %v2548_v22, 1  ;;  %v1412_v24 = vrot.slane %v1400_v41, 1  ;;  %v2592_v41 = vmul.f32 %v2126_v30, %v1951_v8 }
 0x11a   : >> { %v1417_v62 = vrot.slane %v1403_v52, 1  ;;  %v1413_v9 = vrot.slane %v1401_v45, 1  ;;  %v1405_v52 = vmul.f32 %v2039_v31, %v3013_v11  ;;  %v1404_v45 = vmul.f32 %v2039_v31, %v1958_v10 }
 0x11b   : >> { %v1018_v27 = vsel %vm533_vm0, %v2967_v53, %v2966_v48  ;;  %v2972_v48 = vrot.slane %v2592_v41, 1 }
 0x11c   : >> { %v1414_v31 = vsel %vm533_vm0, %v1412_v24, %v1413_v9  ;;  %v1419_v28 = vrot.slane %v1404_v45, 1  ;;  %v1484_v24 = vmul.f32 %v2175_v57, %v3016_v14 }
 0x11d   : >> { %1386 = vrot.lane.b32.xlu2 %v1374_v25, %s1866_s19  ;;  %1384 = vrot.lane.b32.xlu1 %v1375_v43, %s1866_s19  ;;  %v951_v25 = vmul.f32 %v2137_v36, %v3012_v17 }
 0x11e   : >> { %1382 = vrot.lane.b32.xlu0 %v1373_v39, %s1866_s19  ;;  %v1420_v53 = vsel %vm533_vm0, %v1417_v62, %v1419_v28 }
 0x11f   : >> { %v981_v23 = vpop.permute.xlu2 %980  ;;  %v878_v51 = vpop.permute.xlu1 %877 }
 0x120   : >> { %v996_v54 = vadd.f32 %v981_v23, %v960_v34  ;;  %v2582_v43 = vadd.f32 %v878_v51, %v844_v55  ;;  %v876_v44 = vpop.permute.xlu0 %875  ;;  %v1418_v55 = vsel %vm533_vm0, %v1415_v56, %v1417_v62  ;;  %v1416_v23 = vsel %vm533_vm0, %v1413_v9, %v1415_v56 }
 0x121   : >> { %v2588_v39 = vadd.f32 %v876_v44, %v843_v26  ;;  %v2602_v51 = vmul.f32 %v2150_v42, %v3035_v58  ;;  %v963_v26 = vadd.f32 %v957_v61, %v951_v25  ;;  %v1421_v44 = vrot.slane %v1405_v52, 1 }
 0x122   : >> { %v1031_v34 = vadd.f32 %v1018_v27, %v996_v54  ;;  %v2971_v27 = vrot.slane %v2596_v63, 1  ;;  %v2611_v56 = vmul.f32 %v2199_v38, %v3016_v14  ;;  %v2615_v58 = vmul.f32 %v2199_v38, %v3009_v15 }
 0x123   : >> { %v2623_v61 = vmul.f32 %v2175_v57, %v3009_v15  ;;  %v1483_v52 = vmul.f32 %v2175_v57, %v1964_v13 }
 0x124   : >> { %v1053_v2 = vsel %vm533_vm0, %v2972_v48, %v2971_v27  ;;  %v2974_v3 = vrot.slane %v2611_v56, 1  ;;  %v2973_v14 = vrot.slane %v2615_v58, 1  ;;  %v2651_v27 = vmul.f32 %v2126_v30, %v3013_v11 }
 0x125   : >> { %1427 = vrot.lane.b32.xlu2 %v1418_v55, %s1866_s19  ;;  %1425 = vrot.lane.b32.xlu1 %v1416_v23, %s1866_s19  ;;  %v1495_v62 = vrot.slane %v1483_v52, 1  ;;  %v1066_v48 = vadd.f32 %v1053_v2, %v1031_v34  ;;  %v1001_v52 = vmul.f32 %v2150_v42, %v3014_v1  ;;  %v953_v34 = vmul.f32 %v3038_v47, %v1976_v19 }
 0x126   : >> { %1423 = vrot.lane.b32.xlu0 %v1414_v31, %s1866_s19  ;;  %v1422_v31 = vsel %vm533_vm0, %v1419_v28, %v1421_v44  ;;  %v2975_v28 = vrot.slane %v2623_v61, 1  ;;  %v2685_v11 = vmul.f32 %v2175_v57, %v1978_v20 }
 0x127   : >> { %v987_v25 = vpop.permute.xlu2 %986  ;;  %v919_v54 = vpop.permute.xlu1 %918 }
 0x128   : >> { %v999_v45 = vadd.f32 %v987_v25, %v963_v26  ;;  %v2627_v55 = vadd.f32 %v919_v54, %v888_v29  ;;  %v917_v23 = vpop.permute.xlu0 %916  ;;  %v3042_v29 = vrot.slane %v2602_v51, 1  ;;  %v1497_v54 = vrot.slane %v1484_v24, 1 }
 0x129   : >> { %v2631_v9 = vadd.f32 %v917_v23, %v887_v37  ;;  %v1482_v23 = vmul.f32 %v2175_v57, %v1962_v12  ;;  %v1135_v24 = vsel %vm533_vm0, %v2974_v3, %v2973_v14  ;;  %v2678_v3 = vmul.f32 %v2199_v38, %v3012_v17 }
 0x12a   : >> { %3040 = vst [vmem:[#allocation24_spill] sm:$0xff] %v2627_v55  ;;  %v1034_v26 = vadd.f32 %v3042_v29, %v999_v45  ;;  %v1000_v45 = vmul.f32 %v2150_v42, %v3015_v0  ;;  %v1500_v2 = vsel %vm533_vm0, %v1497_v54, %v2975_v28  ;;  %v1498_v25 = vsel %vm533_vm0, %v1495_v62, %v1497_v54 }
 0x12b   : >> { %3041 = vst [vmem:[#allocation28_spill] sm:$0xff] %v2631_v9  ;;  %v1494_v14 = vrot.slane %v1482_v23, 1  ;;  %v2689_v9 = vmul.f32 %v2175_v57, %v3008_v21  ;;  %v1013_v23 = vrot.slane %v1001_v52, 1 }
 0x12d   : >> { %1433 = vrot.lane.b32.xlu2 %v1421_v44, %s1866_s19  ;;  %1431 = vrot.lane.b32.xlu1 %v1422_v31, %s1866_s19  ;;  %v947_v44 = vmul.f32 %v2137_v36, %v1964_v13  ;;  %v952_v31 = vmul.f32 %v3038_v47, %v1974_v18 }
 0x12e   : >> { %1429 = vrot.lane.b32.xlu0 %v1420_v53, %s1866_s19  ;;  %v1012_v53 = vrot.slane %v1000_v45, 1 }
 0x12f   : >> { %v1098_v29 = vpop.permute.xlu2 %1097  ;;  %v925_v37 = vpop.permute.xlu1 %924  ;;  %v959_v45 = vadd.f32 %v953_v34, %v947_v44  ;;  %v1004_v34 = vmul.f32 %v2150_v42, %v3011_v4 }
 0x130   : >> { %v1113_v28 = vadd.f32 %v1098_v29, %v1066_v48  ;;  %v2681_v0 = vadd.f32 %v925_v37, %v2582_v43  ;;  %v923_v1 = vpop.permute.xlu0 %922  ;;  %v946_v48 = vmul.f32 %v2137_v36, %v1962_v12  ;;  %v1487_v37 = vmul.f32 %v2175_v57, %v3012_v17  ;;  %v3049_v43 = vld [vmem:[#allocation23_spill] sm:$0xff] }
 0x131   : >> { %v2692_v54 = vadd.f32 %v923_v1, %v2588_v39  ;;  %v1496_v1 = vsel %vm533_vm0, %v1494_v14, %v1495_v62  ;;  %v3046_v39 = vrot.slane %v2651_v27, 1  ;;  %v3047_v17 = vrot.slane %v2544_v40, 1 }
 0x132   : >> { %3043 = vst [vmem:[#allocation29_spill] sm:$0xff] %v2681_v0  ;;  %v1148_v29 = vadd.f32 %v1135_v24, %v1113_v28  ;;  %v2987_v28 = vrot.slane %v2685_v11, 1  ;;  %v2986_v24 = vrot.slane %v2689_v9, 1  ;;  %v1014_v14 = vsel %vm533_vm0, %v1012_v53, %v1013_v23 }
 0x133   : >> { %3044 = vst [vmem:[#allocation30_spill] sm:$0xff] %v2692_v54  ;;  %v1069_v52 = vadd.f32 %v3046_v39, %v1034_v26  ;;  %v1016_v60 = vsel %vm533_vm0, %v1013_v23, %v3047_v17  ;;  %v958_v54 = vadd.f32 %v952_v31, %v946_v48  ;;  %v1503_v26 = vrot.slane %v1487_v37, 1  ;;  %v3048_v39 = vld [vmem:[#allocation21_spill] sm:$0xff] }
 0x134   : >> { %v1501_v62 = vrot.slane %v1486_v5, 1  ;;  %v950_v40 = vmul.f32 %v2137_v36, %v1970_v16  ;;  %v955_v17 = vmul.f32 %v3038_v47, %v3008_v21  ;;  %v1036_v31 = vmul.f32 %v2126_v30, %v3010_v7 }
 0x135   : >> { %1509 = vrot.lane.b32.xlu2 %v1500_v2, %s1866_s19  ;;  %1507 = vrot.lane.b32.xlu1 %v1498_v25, %s1866_s19  ;;  %v956_v25 = vmul.f32 %v3038_v47, %v3048_v39  ;;  %v1170_v48 = vsel %vm533_vm0, %v2987_v28, %v2986_v24  ;;  %v949_v37 = vmul.f32 %v2137_v36, %v3009_v15  ;;  %v1019_v28 = vrot.slane %v1004_v34, 1 }
 0x136   : >> { %1505 = vrot.lane.b32.xlu0 %v1496_v1, %s1866_s19  ;;  %v1531_v4 = vmul.f32 %v3049_v43, %v1978_v20  ;;  %v2738_v47 = vmul.f32 %v3049_v43, %v3008_v21  ;;  %v1504_v24 = vsel %vm533_vm0, %v1501_v62, %v1503_v26  ;;  %v1529_v15 = vmul.f32 %v3049_v43, %v1974_v18 }
 0x137   : >> { %v1104_v44 = vpop.permute.xlu2 %1103  ;;  %v979_v2 = vpop.permute.xlu1 %978  ;;  %v1035_v21 = vmul.f32 %v2126_v30, %v1947_v6  ;;  %v1183_v55 = vadd.f32 %v1170_v48, %v1148_v29  ;;  %v962_v0 = vadd.f32 %v956_v25, %v950_v40  ;;  %v3052_v34 = vrot.slane %v2602_v51, 1 }
 0x138   : >> { %v1116_v53 = vadd.f32 %v1104_v44, %v1069_v52  ;;  %v995_v23 = vadd.f32 %v979_v2, %v959_v45  ;;  %v977_v5 = vpop.permute.xlu0 %976  ;;  %v1530_v52 = vmul.f32 %v3049_v43, %v1976_v19  ;;  %v3050_v45 = vrot.slane %v2678_v3, 1 }
 0x139   : >> { %v994_v1 = vadd.f32 %v977_v5, %v958_v54  ;;  %v3051_v54 = vrot.slane %v2623_v61, 1  ;;  %v1544_v61 = vrot.slane %v1531_v4, 1  ;;  %v1022_v29 = vsel %vm533_vm0, %v1019_v28, %v3052_v34 }
 0x13a   : >> { %v1151_v44 = vadd.f32 %v3050_v45, %v1116_v53  ;;  %v1030_v2 = vadd.f32 %v1016_v60, %v995_v23  ;;  %v2754_v53 = vmul.f32 %v2175_v57, %v3036_v32  ;;  %v961_v60 = vadd.f32 %v955_v17, %v949_v37 }
 0x13b   : >> { %v1029_v7 = vadd.f32 %v1014_v14, %v994_v1  ;;  %v1502_v5 = vsel %vm533_vm0, %v3051_v54, %v1501_v62  ;;  %v1546_v14 = vrot.slane %v2738_v47, 1  ;;  %v1542_v62 = vrot.slane %v1530_v52, 1 }
 0x13c   : >> { %v1048_v25 = vrot.slane %v1036_v31, 1  ;;  %v3053_v48 = vrot.slane %v2548_v22, 1  ;;  %v1541_v1 = vrot.slane %v1529_v15, 1  ;;  %v1118_v4 = vmul.f32 %v2199_v38, %v1964_v13 }
 0x13d   : >> { %1515 = vrot.lane.b32.xlu2 %v1503_v26, %s1866_s19  ;;  %1513 = vrot.lane.b32.xlu1 %v1504_v24, %s1866_s19  ;;  %v1047_v24 = vrot.slane %v1035_v21, 1  ;;  %v1173_v52 = vrot.slane %v2754_v53, 1  ;;  %v1117_v51 = vmul.f32 %v2199_v38, %v1962_v12  ;;  %v1547_v45 = vsel %vm533_vm0, %v1544_v61, %v1546_v14 }
 0x13e   : >> { %1511 = vrot.lane.b32.xlu0 %v1502_v5, %s1866_s19  ;;  %v1020_v26 = vsel %vm533_vm0, %v3053_v48, %v1019_v28  ;;  %v1545_v22 = vsel %vm533_vm0, %v1542_v62, %v1544_v61  ;;  %v1039_v15 = vmul.f32 %v2126_v30, %v1958_v10  ;;  %v3054_v28 = vmax.f32 %v2311_v33, %v2525_v46 }
 0x13f   : >> { %v1215_v40 = vpop.permute.xlu2 %1214  ;;  %v985_v23 = vpop.permute.xlu1 %984  ;;  %v1533_v54 = vmul.f32 %v3049_v43, %v3048_v39  ;;  %v3055_v61 = vrot.slane %v2592_v41, 1  ;;  %v1130_v30 = vrot.slane %v1118_v4, 1  ;;  %v1186_v33 = vadd.f32 %v1173_v52, %v1151_v44 }
 0x140   : >> { %v1230_v17 = vadd.f32 %v1215_v40, %v1183_v55  ;;  %v998_v37 = vadd.f32 %v985_v23, %v962_v0  ;;  %v983_v47 = vpop.permute.xlu0 %982  ;;  %v1534_v55 = vmul.f32 %v3049_v43, %v3036_v32  ;;  %v1049_v46 = vsel %vm533_vm0, %v1047_v24, %v1048_v25 }
 0x141   : >> { %v997_v31 = vadd.f32 %v983_v47, %v961_v60  ;;  %v1543_v60 = vsel %vm533_vm0, %v1541_v1, %v1542_v62  ;;  %v1051_v34 = vsel %vm533_vm0, %v1048_v25, %v3055_v61  ;;  %v1548_v62 = vrot.slane %v1533_v54, 1 }
 0x142   : >> { %v2778_v21 = vmax.f32 %v3054_v28, %v1230_v17  ;;  %v1033_v0 = vadd.f32 %v1022_v29, %v998_v37  ;;  %v1129_v29 = vrot.slane %v1117_v51, 1  ;;  %v1065_v43 = vadd.f32 %v1051_v34, %v1030_v2 }
 0x143   : >> { %v1032_v5 = vadd.f32 %v1020_v26, %v997_v31  ;;  %v1550_v40 = vrot.slane %v1534_v55, 1  ;;  %v1054_v23 = vrot.slane %v1039_v15, 1  ;;  %v3056_v48 = vrot.slane %v2611_v56, 1 }
 0x144   : >> { %v1064_v44 = vadd.f32 %v1049_v46, %v1029_v7  ;;  %v1121_v25 = vmul.f32 %v2199_v38, %v1970_v16  ;;  %v1131_v17 = vsel %vm533_vm0, %v1129_v29, %v1130_v30  ;;  %v3057_v2 = vmax.f32 %v2323_v49, %v2550_v35 }
 0x145   : >> { %1556 = vrot.lane.b32.xlu2 %v1547_v45, %s1866_s19  ;;  %1554 = vrot.lane.b32.xlu1 %v1545_v22, %s1866_s19  ;;  %v1133_v26 = vsel %vm533_vm0, %v1130_v30, %v3056_v48  ;;  %v1551_v56 = vsel %vm533_vm0, %v1548_v62, %v1550_v40  ;;  %v3058_v45 = vrot.slane %v2651_v27, 1  ;;  %v1549_v15 = vsel %vm533_vm0, %v1546_v14, %v1548_v62 }
 0x146   : >> { %1552 = vrot.lane.b32.xlu0 %v1543_v60, %s1866_s19  ;;  %v1136_v28 = vrot.slane %v1121_v25, 1  ;;  %v1153_v55 = vmul.f32 %v2175_v57, %v1976_v19  ;;  %v3059_v54 = vrot.slane %v2596_v63, 1  ;;  %v1152_v35 = vmul.f32 %v2175_v57, %v1974_v18 }
 0x147   : >> { %v1221_v41 = vpop.permute.xlu2 %1220  ;;  %v1096_v1 = vpop.permute.xlu1 %1095  ;;  %v1057_v7 = vsel %vm533_vm0, %v1054_v23, %v3058_v45  ;;  %v3060_v14 = vrot.slane %v2678_v3, 1  ;;  %v3061_v46 = vrot.slane %v2615_v58, 1  ;;  %v1156_v3 = vmul.f32 %v2175_v57, %v3048_v39  ;;  %v3066_v45 = vld [vmem:[#allocation26_spill] sm:$0xff] }
 0x148   : >> { %v1233_v4 = vadd.f32 %v1221_v41, %v1186_v33  ;;  %v1112_v24 = vadd.f32 %v1096_v1, %v1065_v43  ;;  %v1094_v37 = vpop.permute.xlu0 %1093  ;;  %v1055_v49 = vsel %vm533_vm0, %v3059_v54, %v1054_v23  ;;  %v1068_v27 = vadd.f32 %v1057_v7, %v1033_v0  ;;  %v3067_v7 = vld [vmem:[#allocation28_spill] sm:$0xff] }
 0x149   : >> { %v1111_v47 = vadd.f32 %v1094_v37, %v1064_v44  ;;  %v1139_v61 = vsel %vm533_vm0, %v1136_v28, %v3060_v14  ;;  %v1067_v30 = vadd.f32 %v1055_v49, %v1032_v5  ;;  %v1165_v63 = vrot.slane %v1153_v55, 1 }
 0x14a   : >> { %v2803_v51 = vmax.f32 %v3057_v2, %v1233_v4  ;;  %v1147_v31 = vadd.f32 %v1133_v26, %v1112_v24  ;;  %v1137_v29 = vsel %vm533_vm0, %v3061_v46, %v1136_v28  ;;  %v3062_v0 = vrot.slane %v2685_v11, 1  ;;  %v3064_v2 = vld [vmem:[#allocation24_spill] sm:$0xff] }
 0x14b   : >> { %v1146_v22 = vadd.f32 %v1131_v17, %v1111_v47  ;;  %v1171_v25 = vrot.slane %v1156_v3, 1  ;;  %v1320_v4 = vmul.f32 %v2150_v42, %v1951_v8  ;;  %v2836_v24 = vmul.f32 %v2150_v42, %v3037_v59  ;;  %v3063_v47 = vld [vmem:[#allocation25_spill] sm:$0xff] }
 0x14c   : >> { %v1168_v48 = vsel %vm533_vm0, %v1165_v63, %v3062_v0  ;;  %v1242_v11 = vmul.f32 %v2137_v36, %v1978_v20  ;;  %v3069_v49 = vrot.slane %v2689_v9, 1  ;;  %v1245_v53 = vmul.f32 %v2137_v36, %v3036_v32 }
 0x14d   : >> { %1562 = vrot.lane.b32.xlu2 %v1550_v40, %s1866_s19  ;;  %1560 = vrot.lane.b32.xlu1 %v1551_v56, %s1866_s19  ;;  %v1164_v40 = vrot.slane %v1152_v35, 1  ;;  %v1182_v26 = vadd.f32 %v1168_v48, %v1147_v31  ;;  %v3065_v31 = vmax.f32 %v3063_v47, %v3064_v2  ;;  %v1174_v59 = vsel %vm533_vm0, %v1171_v25, %v1173_v52 }
 0x14e   : >> { %1558 = vrot.lane.b32.xlu0 %v1549_v15, %s1866_s19  ;;  %v1333_v28 = vrot.slane %v1320_v4, 1  ;;  %v1335_v55 = vrot.slane %v2836_v24, 1  ;;  %v1172_v35 = vsel %vm533_vm0, %v3069_v49, %v1171_v25  ;;  %v1318_v47 = vmul.f32 %v2150_v42, %v1947_v6 }
 0x14f   : >> { %v1263_v60 = vpop.permute.xlu2 %1262  ;;  %v1102_v34 = vpop.permute.xlu1 %1101  ;;  %v1166_v5 = vsel %vm533_vm0, %v1164_v40, %v1165_v63  ;;  %v3072_v40 = vld [vmem:[#allocation16_spill] sm:$0xff]  ;;  %v1241_v2 = vmul.f32 %v2137_v36, %v1976_v19  ;;  %v1448_v24 = vmul.f32 %v2199_v38, %v1976_v19 }
 0x150   : >> { %v1115_v33 = vadd.f32 %v1102_v34, %v1068_v27  ;;  %v1100_v43 = vpop.permute.xlu0 %1099  ;;  %v1181_v58 = vadd.f32 %v1166_v5, %v1146_v22  ;;  %v3068_v22 = vmax.f32 %v3066_v45, %v3067_v7  ;;  %v1278_v54 = vadd.f32 %v1263_v60, %v1242_v11  ;;  %v3070_v60 = vld [vmem:[#allocation29_spill] sm:$0xff]  ;;  %v3076_v11 = vld [vmem:[#allocation14_spill] sm:$0xff] }
 0x151   : >> { %v1114_v62 = vadd.f32 %v1100_v43, %v1067_v30  ;;  %v1336_v30 = vsel %vm533_vm0, %v1333_v28, %v1335_v55  ;;  %v3071_v9 = vmax.f32 %v2394_v50, %v3070_v60  ;;  %v1319_v50 = vmul.f32 %v2150_v42, %v3076_v11 }
 0x152   : >> { %v1150_v23 = vadd.f32 %v1139_v61, %v1115_v33  ;;  %v1330_v45 = vrot.slane %v1318_v47, 1 }
 0x153   : >> { %v1149_v41 = vadd.f32 %v1137_v29, %v1114_v62  ;;  %v1323_v62 = vmul.f32 %v2150_v42, %v3072_v40 }
 0x154   : >> { %v1185_v27 = vadd.f32 %v1174_v59, %v1150_v23  ;;  %v3073_v23 = vld [vmem:[#allocation27_spill] sm:$0xff] }
 0x155   : >> { %v1184_v34 = vadd.f32 %v1172_v35, %v1149_v41  ;;  %v3074_v41 = vld [vmem:[#allocation30_spill] sm:$0xff]  ;;  %v1339_v5 = vrot.slane %v1323_v62, 1  ;;  %v1449_v35 = vmul.f32 %v2199_v38, %v1978_v20 }
 0x156   : >> { %v3075_v0 = vmax.f32 %v3073_v23, %v3074_v41 }
 0x157   : >> { %v1269_v1 = vpop.permute.xlu2 %1268  ;;  %v1213_v44 = vpop.permute.xlu1 %1212  ;;  %v1462_v60 = vrot.slane %v1449_v35, 1 }
 0x158   : >> { %v1229_v17 = vadd.f32 %v1213_v44, %v1182_v26  ;;  %v1211_v37 = vpop.permute.xlu0 %1210  ;;  %v1281_v3 = vadd.f32 %v1269_v1, %v1245_v53  ;;  %v1240_v1 = vmul.f32 %v2137_v36, %v1974_v18 }
 0x159   : >> { %v1228_v57 = vadd.f32 %v1211_v37, %v1181_v58 }
 0x15a   : >> { %v2843_v56 = vmax.f32 %v3065_v31, %v1229_v17  ;;  %v1331_v31 = vrot.slane %v1319_v50, 1 }
 0x15b   : >> { %v2848_v15 = vmax.f32 %v3068_v22, %v1228_v57 }
 0x15c   : >> { %v1334_v22 = vsel %vm533_vm0, %v1331_v31, %v1333_v28  ;;  %v1332_v53 = vsel %vm533_vm0, %v1330_v45, %v1331_v31  ;;  %v1244_v28 = vmul.f32 %v2137_v36, %v3048_v39 }
 0x15f   : >> { %v1299_v14 = vpop.permute.xlu2 %1298  ;;  %v1219_v61 = vpop.permute.xlu1 %1218 }
 0x160   : >> { %v1314_v52 = vadd.f32 %v1299_v14, %v1278_v54  ;;  %v1232_v63 = vadd.f32 %v1219_v61, %v1185_v27  ;;  %v1217_v33 = vpop.permute.xlu0 %1216  ;;  %v3077_v27 = vld [vmem:[#allocation20_spill] sm:$0xff]  ;;  %v1322_v61 = vmul.f32 %v2150_v42, %v1958_v10 }
 0x161   : >> { %v1231_v46 = vadd.f32 %v1217_v33, %v1184_v34  ;;  %v2887_v14 = vmul.f32 %v2199_v38, %v3077_v27 }
 0x162   : >> { %v2865_v29 = vmax.f32 %v3071_v9, %v1232_v63  ;;  %v1349_v43 = vadd.f32 %v1336_v30, %v1314_v52  ;;  %v1243_v63 = vmul.f32 %v2137_v36, %v3077_v27  ;;  %v1337_v40 = vrot.slane %v1322_v61, 1 }
 0x163   : >> { %v2872_v48 = vmax.f32 %v3075_v0, %v1231_v46  ;;  %v1464_v9 = vrot.slane %v2887_v14, 1  ;;  %v1451_v61 = vmul.f32 %v2199_v38, %v3048_v39 }
 0x164   : >> { %v1338_v36 = vsel %vm533_vm0, %v1335_v55, %v1337_v40 }
 0x167   : >> { %v1305_v26 = vpop.permute.xlu2 %1304  ;;  %v1261_v44 = vpop.permute.xlu1 %1260 }
 0x168   : >> { %v1317_v58 = vadd.f32 %v1305_v26, %v1281_v3  ;;  %v1259_v25 = vpop.permute.xlu0 %1258  ;;  %v1277_v7 = vadd.f32 %v1261_v44, %v1241_v2  ;;  %v1465_v3 = vsel %vm533_vm0, %v1462_v60, %v1464_v9  ;;  %v1340_v26 = vsel %vm533_vm0, %v1337_v40, %v1339_v5 }
 0x169   : >> { %v1276_v59 = vadd.f32 %v1259_v25, %v1240_v1  ;;  %v1466_v40 = vrot.slane %v1451_v61, 1 }
 0x16a   : >> { %v1352_v4 = vadd.f32 %v1339_v5, %v1317_v58 }
 0x16f   : >> { %v1381_v17 = vpop.permute.xlu2 %1380  ;;  %v1267_v37 = vpop.permute.xlu1 %1266 }
 0x170   : >> { %v1265_v57 = vpop.permute.xlu0 %1264  ;;  %v1396_v62 = vadd.f32 %v1381_v17, %v1349_v43  ;;  %v1280_v23 = vadd.f32 %v1267_v37, %v1244_v28  ;;  %v1452_v43 = vmul.f32 %v2199_v38, %v3036_v32 }
 0x171   : >> { %v1279_v42 = vadd.f32 %v1265_v57, %v1243_v63 }
 0x172   : >> { %v1468_v57 = vrot.slane %v1452_v43, 1 }
 0x177   : >> { %v1387_v54 = vpop.permute.xlu2 %1386  ;;  %v1297_v49 = vpop.permute.xlu1 %1296 }
 0x178   : >> { %v1313_v34 = vadd.f32 %v1297_v49, %v1277_v7  ;;  %v1295_v30 = vpop.permute.xlu0 %1294  ;;  %v1399_v37 = vadd.f32 %v1387_v54, %v1352_v4  ;;  %v1460_v49 = vrot.slane %v1448_v24, 1 }
 0x179   : >> { %v1312_v52 = vadd.f32 %v1295_v30, %v1276_v59  ;;  %v1447_v59 = vmul.f32 %v2199_v38, %v1974_v18 }
 0x17a   : >> { %v1348_v33 = vadd.f32 %v1334_v22, %v1313_v34  ;;  %v1463_v14 = vsel %vm533_vm0, %v1460_v49, %v1462_v60  ;;  %v1469_v60 = vsel %vm533_vm0, %v1466_v40, %v1468_v57 }
 0x17b   : >> { %v1347_v46 = vadd.f32 %v1332_v53, %v1312_v52  ;;  %v1459_v32 = vrot.slane %v1447_v59, 1 }
 0x17d   : >> { %v1461_v53 = vsel %vm533_vm0, %v1459_v32, %v1460_v49 }
 0x17f   : >> { %v1428_v41 = vpop.permute.xlu2 %1427  ;;  %v1303_v0 = vpop.permute.xlu1 %1302 }
 0x180   : >> { %v1443_v44 = vadd.f32 %v1428_v41, %v1396_v62  ;;  %v1316_v58 = vadd.f32 %v1303_v0, %v1280_v23  ;;  %v1301_v25 = vpop.permute.xlu0 %1300  ;;  %v1467_v0 = vsel %vm533_vm0, %v1464_v9, %v1466_v40 }
 0x181   : >> { %v1315_v11 = vadd.f32 %v1301_v25, %v1279_v42 }
 0x182   : >> { %v1478_v50 = vadd.f32 %v1465_v3, %v1443_v44  ;;  %v1351_v47 = vadd.f32 %v1340_v26, %v1316_v58  ;;  %v1583_v3 = vstv %s1582_s12 }
 0x183   : >> { %v1350_v17 = vadd.f32 %v1338_v36, %v1315_v11 }
 0x187   : >> { %v1434_v2 = vpop.permute.xlu2 %1433  ;;  %v1379_v31 = vpop.permute.xlu1 %1378 }
 0x188   : >> { %v1446_v1 = vadd.f32 %v1434_v2, %v1399_v37  ;;  %v1377_v5 = vpop.permute.xlu0 %1376  ;;  %v1395_v35 = vadd.f32 %v1379_v31, %v1348_v33 }
 0x189   : >> { %v1394_v4 = vadd.f32 %v1377_v5, %v1347_v46 }
 0x18a   : >> { %v1481_v45 = vadd.f32 %v1468_v57, %v1446_v1 }
 0x18f   : >> { %v1510_v7 = vpop.permute.xlu2 %1509  ;;  %v1385_v22 = vpop.permute.xlu1 %1384 }
 0x190   : >> { %v1383_v55 = vpop.permute.xlu0 %1382  ;;  %v1525_v62 = vadd.f32 %v1510_v7, %v1478_v50  ;;  %v1398_v33 = vadd.f32 %v1385_v22, %v1351_v47 }
 0x191   : >> { %v1397_v46 = vadd.f32 %v1383_v55, %v1350_v17 }
 0x197   : >> { %v1516_v54 = vpop.permute.xlu2 %1515  ;;  %v1426_v27 = vpop.permute.xlu1 %1425 }
 0x198   : >> { %v1442_v34 = vadd.f32 %v1426_v27, %v1395_v35  ;;  %v1424_v30 = vpop.permute.xlu0 %1423  ;;  %v1528_v11 = vadd.f32 %v1516_v54, %v1481_v45 }
 0x199   : >> { %v1441_v52 = vadd.f32 %v1424_v30, %v1394_v4 }
 0x19a   : >> { %v1477_v28 = vadd.f32 %v1463_v14, %v1442_v34 }
 0x19b   : >> { %v1476_v63 = vadd.f32 %v1461_v53, %v1441_v52 }
 0x19f   : >> { %v1557_v23 = vpop.permute.xlu2 %1556  ;;  %v1432_v42 = vpop.permute.xlu1 %1431 }
 0x1a0   : >> { %v1572_v41 = vadd.f32 %v1557_v23, %v1525_v62  ;;  %v1445_v38 = vadd.f32 %v1432_v42, %v1398_v33  ;;  %v1430_v39 = vpop.permute.xlu0 %1429 }
 0x1a1   : >> { %v1444_v26 = vadd.f32 %v1430_v39, %v1397_v46 }
 0x1a2   : >> { %v1578_v44 = vmax.f32 %v2778_v21, %v1572_v41  ;;  %v1480_v58 = vadd.f32 %v1469_v60, %v1445_v38 }
 0x1a3   : >> { %v1479_v25 = vadd.f32 %v1467_v0, %v1444_v26 }
 0x1a4   : >> { %v1586_v36 = vadd.f32 %v1583_v3, %v1578_v44 }
 0x1a6   : >> { %v1592_v50 = vmax.f32 %v1586_v36, 0.0 }
 0x1a7   : >> { %v1563_v47 = vpop.permute.xlu2 %1562  ;;  %v1508_v43 = vpop.permute.xlu1 %1507 }
 0x1a8   : >> { %1601 = vst.msk [vmem:[%s2918_s14 + $0x10] sm:$0xff] %vm1598_vm1, %v1592_v50  ;;  %v1575_v9 = vadd.f32 %v1563_v47, %v1528_v11  ;;  %v1506_v17 = vpop.permute.xlu0 %1505  ;;  %v1524_v1 = vadd.f32 %v1508_v43, %v1477_v28 }
 0x1a9   : >> { %v1523_v5 = vadd.f32 %v1506_v17, %v1476_v63 }
 0x1aa   : >> { %v1581_v37 = vmax.f32 %v2803_v51, %v1575_v9 }
 0x1ac   : >> { %v1589_v57 = vadd.f32 %v1583_v3, %v1581_v37 }
 0x1ae   : >> { %v1595_v21 = vmax.f32 %v1589_v57, 0.0 }
 0x1af   : >> { %v1514_v2 = vpop.permute.xlu1 %1513 }
 0x1b0   : >> { %1605 = vst.msk [vmem:[%s2918_s14 + $0x28] sm:$0x7f] %vm1604_vm2, %v1595_v21  ;;  %v1512_v31 = vpop.permute.xlu0 %1511  ;;  %v1527_v32 = vadd.f32 %v1514_v2, %v1480_v58 }
 0x1b1   : >> { %v1526_v4 = vadd.f32 %v1512_v31, %v1479_v25 }
 0x1b7   : >> { %v1555_v7 = vpop.permute.xlu1 %1554 }
 0x1b8   : >> { %v1571_v45 = vadd.f32 %v1555_v7, %v1524_v1  ;;  %v1553_v22 = vpop.permute.xlu0 %1552 }
 0x1b9   : >> { %v1570_v24 = vadd.f32 %v1553_v22, %v1523_v5 }
 0x1ba   : >> { %v1577_v55 = vmax.f32 %v2843_v56, %v1571_v45 }
 0x1bb   : >> { %v1576_v59 = vmax.f32 %v2848_v15, %v1570_v24 }
 0x1bc   : >> { %v1585_v49 = vadd.f32 %v1583_v3, %v1577_v55 }
 0x1bd   : >> { %v1584_v51 = vadd.f32 %v1583_v3, %v1576_v59 }
 0x1be   : >> { %v1591_v35 = vmax.f32 %v1585_v49, 0.0 }
 0x1bf   : >> { %v1590_v54 = vmax.f32 %v1584_v51, 0.0  ;;  %v1561_v27 = vpop.permute.xlu1 %1560 }
 0x1c0   : >> { %1600 = vst.msk [vmem:[%s2918_s14 + $0x8] sm:$0xff] %vm1598_vm1, %v1591_v35  ;;  %v1574_v14 = vadd.f32 %v1561_v27, %v1527_v32  ;;  %v1559_v61 = vpop.permute.xlu0 %1558 }
 0x1c1   : >> { %1599 = vst.msk [vmem:[%s2918_s14] sm:$0xff] %vm1598_vm1, %v1590_v54  ;;  %v1573_v34 = vadd.f32 %v1559_v61, %v1526_v4 }
 0x1c2   : >> { %v1580_v56 = vmax.f32 %v2865_v29, %v1574_v14 }
 0x1c3   : >> { %v1579_v15 = vmax.f32 %v2872_v48, %v1573_v34 }
 0x1c4   : >> { %v1588_v30 = vadd.f32 %v1583_v3, %v1580_v56 }
 0x1c5   : >> { %v1587_v53 = vadd.f32 %v1583_v3, %v1579_v15  ;;  %369 = sbr.rel (!%p367_p7) target bundleno = 40 (0x28), region = 100 }
 0x1c6   : >> { %v1594_v52 = vmax.f32 %v1588_v30, 0.0 }
 0x1c7   : >> { %v1593_v28 = vmax.f32 %v1587_v53, 0.0 }
 0x1c8   : >> { %1603 = vst.msk [vmem:[%s2918_s14 + $0x20] sm:$0xff] %vm1598_vm1, %v1594_v52 }
 0x1c9   : >> { %1602 = vst.msk [vmem:[%s2918_s14 + $0x18] sm:$0xff] %vm1598_vm1, %v1593_v28 }
 0x1ca PF: > { %s18_s21 = sadd.s32 1, %s1856_s21  }
 0x1cb   : > { %p15_p8 = scmp.ge.s32.totalorder %s18_s21, 4  }
 0x1cd   :  { %17 = sbr.rel (!%p15_p8) target bundleno = 2 (0x2), region = 111 }
 0x1d2   :  { %1627 = vsyncpa [#allocation3], 1 }
 0x1d3   :  { %1629 = vsyncpa [#allocation3 + $0x1], 1 }
 0x1d4   :  { %1630 = vsyncpa [#allocation5], 1 }

// kernel: forward.7
= control target key start
LH: loop header
LB: loop body
LE: loop exit
PB: predicated region body
PF: predicated region fallthrough
CT: control target
= control target key end

     0   :  { %s965_s21 = smov 0   ;;  %s1339_s0 = inlined_call_operand.vmem [shape: f32[2,24,24,32], index: 0, kind: input, shape index: {}]   ;;  %s1340_s1 = inlined_call_operand.vmem [shape: f32[2,24,24,32], index: 1, kind: input, shape index: {}]   ;;  %s1341_s2 = inlined_call_operand.vmem [shape: f32[2,24,24,32], index: 2, kind: input, shape index: {}]   ;;  %s1342_s3 = inlined_call_operand.vmem [shape: f32[2,24,24,32], index: 3, kind: input, shape index: {}]   ;;  %s1343_s4 = inlined_call_operand.vmem [shape: f32[128,64], index: 4, kind: input, shape index: {}]   ;;  %s1344_s5 = inlined_call_operand.vmem [shape: f32[1,64], index: 5, kind: input, shape index: {}]   ;;  %s1345_s6 = inlined_call_operand.vmem [shape: f32[2,23,23,64], index: 6, kind: output, shape index: {}]  }
   0x1 LB: > { %s782_s22 = sadd.s32 4294967295, %s921_s21   ;;  %p786_p0 = scmp.ge.s32.totalorder %s921_s21, 1  ;;  %s921_s21 = sphi %s965_s21, %s16_s21  }
   0x2   : > { %p242_p1 = scmp.lt.s32.totalorder %s921_s21, 3 }
   0x4   : > { %p243_p2 = pnand %p786_p0, %p242_p1 }
   0x5   : > { %p287_p3 = scmp.lt.s32.totalorder (!%p243_p2), %s782_s22, 1  ;;  %s1081_s30 = smov (!%p243_p2), 0  }
   0x6   : > { %246 = sbr.rel (%p243_p2) target bundleno = 324 (0x144), region = 44 }
   0xb   : > { %v976_v0 = vld [vmem:[%s1343_s4] sm:$0xff]  ;;  %v981_v1 = vld [vmem:[%s1343_s4 + $0x8] sm:$0xff]  ;;  %v986_v2 = vld [vmem:[%s1343_s4 + $0x10] sm:$0xff]  ;;  %s1347_s22 = smov (!%p287_p3, %s782_s22), 1 }
   0xc   : > { %v991_v3 = vld [vmem:[%s1343_s4 + $0x18] sm:$0xff]  ;;  %v996_v4 = vld [vmem:[%s1343_s4 + $0x20] sm:$0xff]  ;;  %v1001_v5 = vld [vmem:[%s1343_s4 + $0x28] sm:$0xff]  ;;  %s1033_s25 = smul.u32 576, %s1347_s22 }
   0xd   : > { %v1006_v6 = vld [vmem:[%s1343_s4 + $0x30] sm:$0xff]  ;;  %v1011_v7 = vld [vmem:[%s1343_s4 + $0x38] sm:$0xff]  ;;  %v1016_v8 = vld [vmem:[%s1343_s4 + $0x40] sm:$0xff]  ;;  %s801_s8 = smul.u32 552, %s1347_s22 }
   0xe   : > { %v1021_v9 = vld [vmem:[%s1343_s4 + $0x48] sm:$0xff]  ;;  %v1026_v10 = vld [vmem:[%s1343_s4 + $0x50] sm:$0xff]  ;;  %v1031_v11 = vld [vmem:[%s1343_s4 + $0x58] sm:$0xff]  ;;  %s291_s15 = scalar_lea.vmem %s1339_s0, %s1033_s25  ;;  %s296_s18 = scalar_lea.vmem %s1340_s1, %s1033_s25 }
   0xf   : > { %v1038_v12 = vld [vmem:[%s1343_s4 + $0x60] sm:$0xff]  ;;  %v1043_v13 = vld [vmem:[%s1343_s4 + $0x68] sm:$0xff]  ;;  %v1048_v14 = vld [vmem:[%s1343_s4 + $0x70] sm:$0xff]  ;;  %s301_s20 = scalar_lea.vmem %s1341_s2, %s1033_s25  ;;  %s306_s26 = scalar_lea.vmem %s1342_s3, %s1033_s25 }
  0x10   : > { %v1053_v15 = vld [vmem:[%s1343_s4 + $0x78] sm:$0xff]  ;;  %v1058_v16 = vld [vmem:[%s1344_s5] sm:$0x1]  ;;  %s1079_s29 = scalar_lea.vmem %s1345_s6, %s801_s8 }
  0x11 LB: >> { %557 = vmatpush.msra.mxu2 %v1053_v15  ;;  %627 = vmatpush.msra.mxu3 %v1053_v15  ;;  %s1091_s7 = smul.u32 24, %s925_s30  ;;  %vm429_vm0 = vcmask 1046528   ;;  %s927_s24 = smov 64   ;;  %vm388_vm1 = vcmask 261120   ;;  %vm392_vm2 = vcmask 523264   ;;  %vm396_vm3 = vcmask 785408   ;;  %s925_s30 = sphi %s1081_s30, %s334_s30  }
  0x12   : >> { %400 = vmatpush.msra.mxu0 %v1053_v15  ;;  %476 = vmatpush.msra.mxu1 %v1053_v15  ;;  %s928_s27 = smov 96   ;;  %s929_s28 = smov 32   ;;  %vm668_vm4 = vcmask 522240  }
  0x13   : >> { %558 = vmatpush.msra.mxu2 %v1048_v14  ;;  %628 = vmatpush.msra.mxu3 %v1048_v14  ;;  %s1103_s10 = scalar_lea.vmem %s291_s15, %s1091_s7  ;;  %s1111_s13 = scalar_lea.vmem %s296_s18, %s1091_s7 }
  0x14   : >> { %401 = vmatpush.msra.mxu0 %v1048_v14  ;;  %477 = vmatpush.msra.mxu1 %v1048_v14  ;;  %v792_v17 = vld [vmem:[%s1103_s10 + $0x18] sm:$0xff]  ;;  %v1118_v19 = vld [vmem:[%s1103_s10 + $0x20] sm:$0xff]  ;;  %s344_s17 = scalar_lea.vmem %s301_s20, %s1091_s7  ;;  %s1132_s23 = scalar_lea.vmem %s306_s26, %s1091_s7  ;;  %v1152_v29 = vld [vmem:[%s1103_s10 + $0x8] sm:$0xff] }
  0x15   : >> { %559 = vmatpush.msra.mxu2 %v1043_v13  ;;  %629 = vmatpush.msra.mxu3 %v1043_v13  ;;  %v795_v18 = vld [vmem:[%s1111_s13 + $0x18] sm:$0xff]  ;;  %v604_v21 = vrot.slane %v792_v17, 1  ;;  %v605_v22 = vrot.slane %v1118_v19, 1  ;;  %v1137_v23 = vld [vmem:[%s344_s17] sm:$0xff]  ;;  %v1139_v24 = vld [vmem:[%s344_s17 + $0x8] sm:$0xff]  ;;  %v431_v33 = vrot.slane %v1152_v29, 1  ;;  %s665_s8 = scalar_lea.vmem %s1079_s29, %s1091_s7 }
  0x16   : >> { %402 = vmatpush.msra.mxu0 %v1043_v13  ;;  %478 = vmatpush.msra.mxu1 %v1043_v13  ;;  %v821_v20 = vpack.i.bf16 %v795_v18, %v792_v17  ;;  %v1142_v25 = vld [vmem:[%s1132_s23] sm:$0xff]  ;;  %v453_v26 = vrot.slane %v1137_v23, 1  ;;  %v454_v27 = vrot.slane %v1139_v24, 1  ;;  %v1166_v36 = vld [vmem:[%s344_s17 + $0x10] sm:$0xff]  ;;  %v1180_v41 = vld [vmem:[%s1103_s10 + $0x28] sm:$0xff]  ;;  %s334_s30 = sadd.s32 1, %s925_s30  }
  0x17   : >> { %560 = vmatpush.msra.mxu2 %v1038_v12  ;;  %630 = vmatpush.msra.mxu3 %v1038_v12  ;;  %v1149_v28 = vld [vmem:[%s1103_s10] sm:$0xff]  ;;  %v826_v30 = vpack.i.bf16 %v1142_v25, %v1137_v23  ;;  %v606_v31 = vsel %vm429_vm0, %v604_v21, %v605_v22  ;;  %v456_v40 = vrot.slane %v1166_v36, 1  ;;  %v607_v42 = vrot.slane %v1180_v41, 1  ;;  %v1193_v44 = vld [vmem:[%s1132_s23 + $0x8] sm:$0xff]  ;;  %v1201_v46 = vld [vmem:[%s1103_s10 + $0x10] sm:$0xff]  ;;  %p331_p4 = scmp.ge.s32.totalorder %s334_s30, 23  }
  0x18   : >> { %403 = vmatpush.msra.mxu0 %v1038_v12  ;;  %479 = vmatpush.msra.mxu1 %v1038_v12  ;;  %v430_v32 = vrot.slane %v1149_v28, 1  ;;  %v836_v34 = vpack.i.bf16 %v606_v31, %v795_v18  ;;  %v455_v35 = vsel %vm429_vm0, %v453_v26, %v454_v27  ;;  %v1173_v38 = vld [vmem:[%s1111_s13] sm:$0xff]  ;;  %v433_v50 = vrot.slane %v1201_v46, 1  ;;  %v1225_v53 = vld [vmem:[%s1111_s13 + $0x8] sm:$0xff]  ;;  %v1248_v57 = vld [vmem:[%s1132_s23 + $0x10] sm:$0xff] }
  0x19   : >> { %822 = vrot.lane.b32.xlu0 %v821_v20, %s927_s24  ;;  %561 = vmatpush.msra.mxu2 %v1031_v11  ;;  %v831_v37 = vpack.i.bf16 %v455_v35, %v1142_v25  ;;  %v457_v45 = vsel %vm429_vm0, %v454_v27, %v456_v40  ;;  %v608_v47 = vsel %vm429_vm0, %v605_v22, %v607_v42  ;;  %v796_v49 = vld [vmem:[%s1111_s13 + $0x20] sm:$0xff]  ;;  %v797_v59 = vld [vmem:[%s1111_s13 + $0x28] sm:$0xff]  ;;  %v1270_v62 = vld [vmem:[%s1111_s13 + $0x10] sm:$0xff] }
  0x1a   : >> { %827 = vrot.lane.b32.xlu2 %v826_v30, %s927_s24  ;;  %631 = vmatpush.msra.mxu3 %v1031_v11  ;;  %v432_v39 = vsel %vm429_vm0, %v430_v32, %v431_v33  ;;  %v851_v48 = vpack.i.bf16 %v457_v45, %v1193_v44  ;;  %v861_v51 = vpack.i.bf16 %v608_v47, %v796_v49 }
  0x1b   : >> { %562 = vmatpush.msra.mxu2 %v1026_v10  ;;  %404 = vmatpush.msra.mxu0 %v1031_v11  ;;  %v841_v43 = vpack.i.bf16 %v432_v39, %v1173_v38  ;;  %v856_v52 = vpack.i.bf16 %v796_v49, %v1118_v19  ;;  %v434_v54 = vsel %vm429_vm0, %v431_v33, %v433_v50 }
  0x1c   : >> { %837 = vrot.lane.b32.xlu1 %v836_v34, %s928_s27  ;;  %632 = vmatpush.msra.mxu3 %v1026_v10  ;;  %v866_v55 = vpack.i.bf16 %v434_v54, %v1225_v53  ;;  %v871_v56 = vpack.i.bf16 %v1193_v44, %v1139_v24  ;;  %v881_v58 = vpack.i.bf16 %v456_v40, %v1248_v57 }
  0x1d   : >> { %480 = vmatpush.msra.mxu1 %v1031_v11  ;;  %563 = vmatpush.msra.mxu2 %v1021_v9  ;;  %v891_v60 = vpack.i.bf16 %v607_v42, %v797_v59  ;;  %v886_v61 = vpack.i.bf16 %v797_v59, %v1180_v41  ;;  %v896_v63 = vpack.i.bf16 %v433_v50, %v1270_v62 }
  0x1e   : >> { %405 = vmatpush.msra.mxu0 %v1026_v10  ;;  %633 = vmatpush.msra.mxu3 %v1021_v9  ;;  %v901_v17 = vpack.i.bf16 %v1248_v57, %v1166_v36 }
  0x1f   : >> { %481 = vmatpush.msra.mxu1 %v1026_v10  ;;  %564 = vmatpush.msra.mxu2 %v1016_v8 }
  0x20   : >> { %406 = vmatpush.msra.mxu0 %v1021_v9  ;;  %634 = vmatpush.msra.mxu3 %v1016_v8 }
  0x21   : >> { %832 = vrot.lane.b32.xlu0 %v831_v37, %s929_s28  ;;  %482 = vmatpush.msra.mxu1 %v1021_v9 }
  0x22   : >> { %847 = vrot.lane.b32.xlu2 %v831_v37, %s928_s27  ;;  %565 = vmatpush.msra.mxu2 %v1011_v7 }
  0x23   : >> { %635 = vmatpush.msra.mxu3 %v1011_v7  ;;  %407 = vmatpush.msra.mxu0 %v1016_v8 }
  0x24   : >> { %842 = vrot.lane.b32.xlu1 %v841_v43, %s929_s28  ;;  %483 = vmatpush.msra.mxu1 %v1016_v8 }
  0x25   : >> { %566 = vmatpush.msra.mxu2 %v1006_v6  ;;  %636 = vmatpush.msra.mxu3 %v1006_v6 }
  0x26   : >> { %408 = vmatpush.msra.mxu0 %v1011_v7  ;;  %484 = vmatpush.msra.mxu1 %v1011_v7 }
  0x27   : >> { %567 = vmatpush.msra.mxu2 %v1001_v5  ;;  %637 = vmatpush.msra.mxu3 %v1001_v5 }
  0x28   : >> { %409 = vmatpush.msra.mxu0 %v1006_v6  ;;  %485 = vmatpush.msra.mxu1 %v1006_v6 }
  0x29   : >> { %852 = vrot.lane.b32.xlu0 %v851_v48, %s929_s28  ;;  %568 = vmatpush.msra.mxu2 %v996_v4 }
  0x2a   : >> { %862 = vrot.lane.b32.xlu2 %v861_v51, %s928_s27  ;;  %638 = vmatpush.msra.mxu3 %v996_v4 }
  0x2b   : >> { %410 = vmatpush.msra.mxu0 %v1001_v5  ;;  %486 = vmatpush.msra.mxu1 %v1001_v5 }
  0x2c   : >> { %857 = vrot.lane.b32.xlu1 %v856_v52, %s927_s24  ;;  %569 = vmatpush.msra.mxu2 %v991_v3 }
  0x2d   : >> { %639 = vmatpush.msra.mxu3 %v991_v3  ;;  %411 = vmatpush.msra.mxu0 %v996_v4 }
  0x2e   : >> { %487 = vmatpush.msra.mxu1 %v996_v4  ;;  %570 = vmatpush.msra.mxu2 %v986_v2 }
  0x2f   : >> { %640 = vmatpush.msra.mxu3 %v986_v2  ;;  %412 = vmatpush.msra.mxu0 %v991_v3 }
  0x30   : >> { %488 = vmatpush.msra.mxu1 %v991_v3  ;;  %571 = vmatpush.msra.mxu2 %v981_v1 }
  0x31   : >> { %867 = vrot.lane.b32.xlu0 %v866_v55, %s929_s28  ;;  %641 = vmatpush.msra.mxu3 %v981_v1 }
  0x32   : >> { %877 = vrot.lane.b32.xlu2 %v851_v48, %s928_s27  ;;  %413 = vmatpush.msra.mxu0 %v986_v2 }
  0x33   : >> { %489 = vmatpush.msra.mxu1 %v986_v2  ;;  %572 = vmatpush.msra.mxu2 %v976_v0 }
  0x34   : >> { %872 = vrot.lane.b32.xlu1 %v871_v56, %s927_s24  ;;  %642 = vmatpush.msra.mxu3 %v976_v0 }
  0x35   : >> { %414 = vmatpush.msra.mxu0 %v981_v1  ;;  %490 = vmatpush.msra.mxu1 %v981_v1 }
  0x37   : >> { %415 = vmatpush.msra.mxu0 %v976_v0  ;;  %491 = vmatpush.msra.mxu1 %v976_v0 }
  0x39   : >> { %882 = vrot.lane.b32.xlu0 %v881_v58, %s929_s28 }
  0x3a   : >> { %892 = vrot.lane.b32.xlu2 %v891_v60, %s928_s27 }
  0x3c   : >> { %887 = vrot.lane.b32.xlu1 %v886_v61, %s927_s24 }
  0x41   : >> { %897 = vrot.lane.b32.xlu0 %v896_v63, %s929_s28 }
  0x42   : >> { %907 = vrot.lane.b32.xlu2 %v881_v58, %s928_s27 }
  0x44   : >> { %902 = vrot.lane.b32.xlu1 %v901_v17, %s927_s24 }
  0x74   : >> { %v828_v18 = vpop.permute.xlu2 %827 }
  0x75   : >> { %v830_v48 = vunpack.i.h.bf16 %v828_v18  ;;  %v829_v49 = vunpack.i.l.bf16 %v828_v18 }
  0x7c   : >> { %v848_v20 = vpop.permute.xlu2 %847 }
  0x7d   : >> { %v850_v32 = vunpack.i.h.bf16 %v848_v20  ;;  %v849_v33 = vunpack.i.l.bf16 %v848_v20 }
  0x84   : >> { %v863_v34 = vpop.permute.xlu2 %862 }
  0x85   : >> { %v865_v63 = vunpack.i.h.bf16 %v863_v34  ;;  %v864_v17 = vunpack.i.l.bf16 %v863_v34 }
  0x8b   : >> { %v823_v19 = vpop.permute.xlu0 %822 }
  0x8c   : >> { %v825_v30 = vunpack.i.h.bf16 %v823_v19  ;;  %v824_v31 = vunpack.i.l.bf16 %v823_v19  ;;  %v878_v20 = vpop.permute.xlu2 %877 }
  0x8d   : >> { %v879_v34 = vunpack.i.l.bf16 %v878_v20 }
  0x8e   : >> { %v838_v21 = vpop.permute.xlu1 %837 }
  0x8f   : >> { %v840_v35 = vunpack.i.h.bf16 %v838_v21  ;;  %v839_v37 = vunpack.i.l.bf16 %v838_v21 }
  0x93   : >> { %v833_v22 = vpop.permute.xlu0 %832 }
  0x94   : >> { %v835_v26 = vunpack.i.h.bf16 %v833_v22  ;;  %v834_v27 = vunpack.i.l.bf16 %v833_v22 }
  0x96   : >> { %v843_v39 = vpop.permute.xlu1 %842  ;;  %v548_v40 = vsel %vm388_vm1, %v1137_v23, %v834_v27  ;;  %v618_v41 = vsel %vm388_vm1, %v1142_v25, %v835_v26 }
  0x97   : >> { %v845_v42 = vunpack.i.h.bf16 %v843_v39  ;;  %v844_v43 = vunpack.i.l.bf16 %v843_v39  ;;  %v551_v45 = vsel %vm392_vm2, %v548_v40, %v824_v31  ;;  %v621_v47 = vsel %vm392_vm2, %v618_v41, %v825_v30 }
  0x98   : >> { %v554_v50 = vsel %vm396_vm3, %v551_v45, %v839_v37  ;;  %v624_v51 = vsel %vm396_vm3, %v621_v47, %v840_v35 }
  0x99   : >> { %573 = vmatmul.f32.vlgmr.msra.gmra.mxu2 %v554_v50  ;;  %643 = vmatmul.f32.vlgmr.msra.gmra.mxu3 %v624_v51  ;;  %v389_v23 = vsel %vm388_vm1, %v1149_v28, %v844_v43  ;;  %v467_v25 = vsel %vm388_vm1, %v1173_v38, %v845_v42  ;;  %v893_v42 = vpop.permute.xlu2 %892 }
  0x9a   : >> { %v393_v52 = vsel %vm392_vm2, %v389_v23, %v829_v49  ;;  %v470_v54 = vsel %vm392_vm2, %v467_v25, %v830_v48  ;;  %v895_v50 = vunpack.i.h.bf16 %v893_v42  ;;  %v894_v51 = vunpack.i.l.bf16 %v893_v42 }
  0x9b   : >> { %v397_v55 = vsel %vm396_vm3, %v393_v52, %v849_v33  ;;  %v473_v56 = vsel %vm396_vm3, %v470_v54, %v850_v32  ;;  %v853_v58 = vpop.permute.xlu0 %852  ;;  %v880_v33 = vunpack.i.h.bf16 %v878_v20 }
  0x9c   : >> { %416 = vmatmul.f32.vlgmr.msra.gmra.mxu0 %v397_v55  ;;  %492 = vmatmul.f32.vlgmr.msra.gmra.mxu1 %v473_v56  ;;  %v855_v59 = vunpack.i.h.bf16 %v853_v58  ;;  %v854_v60 = vunpack.i.l.bf16 %v853_v58 }
  0x9e   : >> { %v858_v61 = vpop.permute.xlu1 %857  ;;  %v549_v28 = vsel %vm388_vm1, %v1139_v24, %v854_v60  ;;  %v619_v38 = vsel %vm388_vm1, %v1193_v44, %v855_v59 }
  0x9f   : >> { %v860_v18 = vunpack.i.h.bf16 %v858_v61  ;;  %v859_v19 = vunpack.i.l.bf16 %v858_v61 }
  0xa1   : >> { %v552_v21 = vsel %vm392_vm2, %v549_v28, %v859_v19  ;;  %v622_v22 = vsel %vm392_vm2, %v619_v38, %v860_v18  ;;  %v908_v60 = vpop.permute.xlu2 %907 }
  0xa2   : >> { %v555_v26 = vsel %vm396_vm3, %v552_v21, %v864_v17  ;;  %v625_v27 = vsel %vm396_vm3, %v622_v22, %v865_v63  ;;  %v910_v17 = vunpack.i.h.bf16 %v908_v60  ;;  %v909_v28 = vunpack.i.l.bf16 %v908_v60 }
  0xa3   : >> { %576 = vmatmul.f32.gmra.mxu2 %v555_v26  ;;  %646 = vmatmul.f32.gmra.mxu3 %v625_v27  ;;  %v868_v30 = vpop.permute.xlu0 %867 }
  0xa4   : >> { %v870_v31 = vunpack.i.h.bf16 %v868_v30  ;;  %v869_v32 = vunpack.i.l.bf16 %v868_v30 }
  0xa6   : >> { %v873_v24 = vpop.permute.xlu1 %872  ;;  %v390_v44 = vsel %vm388_vm1, %v1152_v29, %v869_v32  ;;  %v468_v35 = vsel %vm388_vm1, %v1225_v53, %v870_v31 }
  0xa7   : >> { %v875_v37 = vunpack.i.h.bf16 %v873_v24  ;;  %v874_v39 = vunpack.i.l.bf16 %v873_v24 }
  0xa9   : >> { %v394_v40 = vsel %vm392_vm2, %v390_v44, %v874_v39  ;;  %v471_v41 = vsel %vm392_vm2, %v468_v35, %v875_v37 }
  0xaa   : >> { %v398_v43 = vsel %vm396_vm3, %v394_v40, %v879_v34  ;;  %v474_v45 = vsel %vm396_vm3, %v471_v41, %v880_v33 }
  0xab   : >> { %419 = vmatmul.f32.gmra.mxu0 %v398_v43  ;;  %495 = vmatmul.f32.gmra.mxu1 %v474_v45  ;;  %v883_v47 = vpop.permute.xlu0 %882 }
  0xac   : >> { %v885_v48 = vunpack.i.h.bf16 %v883_v47  ;;  %v884_v49 = vunpack.i.l.bf16 %v883_v47 }
  0xae   : >> { %v888_v29 = vpop.permute.xlu1 %887  ;;  %v550_v53 = vsel %vm388_vm1, %v1166_v36, %v884_v49  ;;  %v620_v23 = vsel %vm388_vm1, %v1248_v57, %v885_v48 }
  0xaf   : >> { %v890_v25 = vunpack.i.h.bf16 %v888_v29  ;;  %v889_v52 = vunpack.i.l.bf16 %v888_v29 }
  0xb1   : >> { %v553_v54 = vsel %vm392_vm2, %v550_v53, %v889_v52  ;;  %v623_v55 = vsel %vm392_vm2, %v620_v23, %v890_v25 }
  0xb2   : >> { %v556_v56 = vsel %vm396_vm3, %v553_v54, %v894_v51  ;;  %v626_v58 = vsel %vm396_vm3, %v623_v55, %v895_v50 }
  0xb3   : >> { %579 = vmatmul.f32.gmra.mxu2 %v556_v56  ;;  %649 = vmatmul.f32.gmra.mxu3 %v626_v58  ;;  %v898_v59 = vpop.permute.xlu0 %897 }
  0xb4   : >> { %v900_v61 = vunpack.i.h.bf16 %v898_v59  ;;  %v899_v63 = vunpack.i.l.bf16 %v898_v59 }
  0xb6   : >> { %v903_v36 = vpop.permute.xlu1 %902  ;;  %v391_v57 = vsel %vm388_vm1, %v1201_v46, %v899_v63  ;;  %v469_v38 = vsel %vm388_vm1, %v1270_v62, %v900_v61  ;;  %v657_v62 = vperm.slane %v1058_v16, 0 }
  0xb7   : >> { %v905_v18 = vunpack.i.h.bf16 %v903_v36  ;;  %v904_v19 = vunpack.i.l.bf16 %v903_v36 }
  0xb9   : >> { %v395_v20 = vsel %vm392_vm2, %v391_v57, %v904_v19  ;;  %v472_v21 = vsel %vm392_vm2, %v469_v38, %v905_v18 }
  0xba   : >> { %v399_v22 = vsel %vm396_vm3, %v395_v20, %v909_v28  ;;  %v475_v26 = vsel %vm396_vm3, %v472_v21, %v910_v17 }
  0xbb   : >> { %422 = vmatmul.f32.gmra.mxu0 %v399_v22  ;;  %498 = vmatmul.f32.gmra.mxu1 %v475_v26 }
 0x119   : >> { %v417_v27 = vpop.f32.mrf.mxu0  ;;  %v493_v30 = vpop.f32.mrf.mxu1 }
 0x11a   : >> { %v502_v46 = vmax.f32 %v417_v27, %v493_v30 }
 0x11c   : >> { %v574_v31 = vpop.f32.mrf.mxu2  ;;  %v644_v24 = vpop.f32.mrf.mxu3 }
 0x11d   : >> { %v583_v32 = vmax.f32 %v502_v46, %v574_v31 }
 0x11f   : >> { %v653_v33 = vmax.f32 %v583_v32, %v644_v24 }
 0x121   : >> { %v659_v34 = vadd.f32 %v657_v62, %v653_v33 }
 0x123   : >> { %v662_v44 = vmax.f32 %v659_v34, 0.0 }
 0x125   : >> { %666 = vst.msk [vmem:[%s665_s8] sm:$0xff] %vm392_vm2, %v662_v44 }
 0x126   : >> { %v577_v40 = vpop.f32.mrf.mxu2  ;;  %v647_v42 = vpop.f32.mrf.mxu3 }
 0x128   : >> { %v420_v35 = vpop.f32.mrf.mxu0  ;;  %v496_v37 = vpop.f32.mrf.mxu1 }
 0x129   : >> { %v503_v39 = vmax.f32 %v420_v35, %v496_v37 }
 0x12b   : >> { %v584_v41 = vmax.f32 %v503_v39, %v577_v40 }
 0x12d   : >> { %v654_v43 = vmax.f32 %v584_v41, %v647_v42 }
 0x12f   : >> { %v660_v45 = vadd.f32 %v657_v62, %v654_v43 }
 0x131   : >> { %v663_v47 = vmax.f32 %v660_v45, 0.0 }
 0x133   : >> { %667 = vst.msk [vmem:[%s665_s8 + $0x8] sm:$0xff] %vm392_vm2, %v663_v47 }
 0x136   : >> { %v580_v50 = vpop.f32.mrf.mxu2  ;;  %v650_v53 = vpop.f32.mrf.mxu3 }
 0x138   : >> { %v423_v48 = vpop.f32.mrf.mxu0  ;;  %v499_v49 = vpop.f32.mrf.mxu1 }
 0x139   : >> { %v504_v29 = vmax.f32 %v423_v48, %v499_v49 }
 0x13b   : >> { %v585_v51 = vmax.f32 %v504_v29, %v580_v50 }
 0x13d   : >> { %v655_v23 = vmax.f32 %v585_v51, %v650_v53 }
 0x13f   : >> { %v661_v25 = vadd.f32 %v657_v62, %v655_v23  ;;  %333 = sbr.rel (!%p331_p4) target bundleno = 17 (0x11), region = 97 }
 0x141   : >> { %v664_v52 = vmax.f32 %v661_v25, 0.0 }
 0x143   : >> { %669 = vst.msk [vmem:[%s665_s8 + $0x10] sm:$0x7f] %vm668_vm4, %v664_v52 }
 0x144 PF: > { %s16_s21 = sadd.s32 1, %s921_s21  }
 0x145   : > { %p13_p5 = scmp.ge.s32.totalorder %s16_s21, 4  }
 0x147   :  { %15 = sbr.rel (!%p13_p5) target bundleno = 1 (0x1), region = 108 }

// kernel: forward.8
= control target key start
LH: loop header
LB: loop body
LE: loop exit
PB: predicated region body
PF: predicated region fallthrough
CT: control target
= control target key end

     0   :  { %s865_s21 = smov 0   ;;  %s1307_s0 = inlined_call_operand.vmem [shape: f32[2,12,12,64], index: 0, kind: input, shape index: {}]   ;;  %s1308_s1 = inlined_call_operand.vmem [shape: f32[2,12,12,64], index: 1, kind: input, shape index: {}]   ;;  %s1309_s2 = inlined_call_operand.vmem [shape: f32[2,12,12,64], index: 2, kind: input, shape index: {}]   ;;  %s1310_s3 = inlined_call_operand.vmem [shape: f32[2,12,12,64], index: 3, kind: input, shape index: {}]   ;;  %s1311_s4 = inlined_call_operand.vmem [shape: f32[256,128], index: 4, kind: input, shape index: {}]   ;;  %s1312_s5 = inlined_call_operand.vmem [shape: f32[1,128], index: 5, kind: input, shape index: {}]   ;;  %s1313_s6 = inlined_call_operand.vmem [shape: f32[2,11,11,128], index: 6, kind: output, shape index: {}]  }
   0x1 LB: > { %s755_s22 = sadd.s32 4294967295, %s823_s21   ;;  %p759_p0 = scmp.ge.s32.totalorder %s823_s21, 1  ;;  %s823_s21 = sphi %s865_s21, %s16_s21  }
   0x2   : > { %p242_p1 = scmp.lt.s32.totalorder %s823_s21, 3 }
   0x4   : > { %p243_p2 = pnand %p759_p0, %p242_p1 }
   0x5   : > { %p287_p3 = scmp.lt.s32.totalorder (!%p243_p2), %s755_s22, 1  ;;  %s1061_s26 = smov (!%p243_p2), 0  }
   0x6   : > { %246 = sbr.rel (%p243_p2) target bundleno = 320 (0x140), region = 44 }
   0xb   : > { %v876_v0 = vld [vmem:[%s1311_s4] sm:$0xff]  ;;  %v881_v1 = vld [vmem:[%s1311_s4 + $0x8] sm:$0xff]  ;;  %v886_v2 = vld [vmem:[%s1311_s4 + $0x10] sm:$0xff]  ;;  %s1315_s22 = smov (!%p287_p3, %s755_s22), 1 }
   0xc   : > { %v891_v3 = vld [vmem:[%s1311_s4 + $0x18] sm:$0xff]  ;;  %v896_v4 = vld [vmem:[%s1311_s4 + $0x20] sm:$0xff]  ;;  %v901_v5 = vld [vmem:[%s1311_s4 + $0x28] sm:$0xff]  ;;  %s933_s25 = smul.u32 192, %s1315_s22 }
   0xd   : > { %v906_v6 = vld [vmem:[%s1311_s4 + $0x30] sm:$0xff]  ;;  %v911_v7 = vld [vmem:[%s1311_s4 + $0x38] sm:$0xff]  ;;  %v916_v8 = vld [vmem:[%s1311_s4 + $0x40] sm:$0xff]  ;;  %s775_s8 = smul.u32 176, %s1315_s22 }
   0xe   : > { %v921_v9 = vld [vmem:[%s1311_s4 + $0x48] sm:$0xff]  ;;  %v926_v10 = vld [vmem:[%s1311_s4 + $0x50] sm:$0xff]  ;;  %v931_v11 = vld [vmem:[%s1311_s4 + $0x58] sm:$0xff]  ;;  %s291_s17 = scalar_lea.vmem %s1307_s0, %s933_s25  ;;  %s296_s19 = scalar_lea.vmem %s1308_s1, %s933_s25 }
   0xf   : > { %v938_v12 = vld [vmem:[%s1311_s4 + $0x60] sm:$0xff]  ;;  %v943_v13 = vld [vmem:[%s1311_s4 + $0x68] sm:$0xff]  ;;  %v948_v14 = vld [vmem:[%s1311_s4 + $0x70] sm:$0xff]  ;;  %s301_s7 = scalar_lea.vmem %s1309_s2, %s933_s25  ;;  %s306_s11 = scalar_lea.vmem %s1310_s3, %s933_s25 }
  0x10   : > { %v953_v15 = vld [vmem:[%s1311_s4 + $0x78] sm:$0xff]  ;;  %v958_v16 = vld [vmem:[%s1311_s4 + $0x80] sm:$0xff]  ;;  %v963_v17 = vld [vmem:[%s1311_s4 + $0x88] sm:$0xff]  ;;  %s1014_s23 = scalar_lea.vmem %s1313_s6, %s775_s8 }
  0x11   : > { %v976_v18 = vld [vmem:[%s1311_s4 + $0x90] sm:$0xff]  ;;  %v981_v19 = vld [vmem:[%s1311_s4 + $0x98] sm:$0xff]  ;;  %v986_v20 = vld [vmem:[%s1311_s4 + $0xa0] sm:$0xff] }
  0x12   : > { %v999_v21 = vld [vmem:[%s1311_s4 + $0xa8] sm:$0xff]  ;;  %v1004_v22 = vld [vmem:[%s1311_s4 + $0xb0] sm:$0xff]  ;;  %v1009_v23 = vld [vmem:[%s1311_s4 + $0xb8] sm:$0xff] }
  0x13   : > { %v1019_v24 = vld [vmem:[%s1311_s4 + $0xc0] sm:$0xff]  ;;  %v1024_v25 = vld [vmem:[%s1311_s4 + $0xc8] sm:$0xff]  ;;  %v1029_v26 = vld [vmem:[%s1311_s4 + $0xd0] sm:$0xff] }
  0x14   : > { %v1034_v27 = vld [vmem:[%s1311_s4 + $0xd8] sm:$0xff]  ;;  %v1039_v28 = vld [vmem:[%s1311_s4 + $0xe0] sm:$0xff]  ;;  %v1044_v29 = vld [vmem:[%s1311_s4 + $0xe8] sm:$0xff] }
  0x15   : > { %v1049_v30 = vld [vmem:[%s1311_s4 + $0xf0] sm:$0xff]  ;;  %v1054_v31 = vld [vmem:[%s1311_s4 + $0xf8] sm:$0xff]  ;;  %v1059_v32 = vld [vmem:[%s1312_s5] sm:$0x1] }
  0x16 LB: >> { %458 = vmatpush.msra.mxu2 %v953_v15  ;;  %481 = vmatpush.msra.mxu3 %v1054_v31  ;;  %s1071_s27 = sshll.u32 %s827_s26, 4  ;;  %vm433_vm0 = vcmask 1046528   ;;  %s829_s18 = smov 64   ;;  %vm380_vm1 = vcmask 523264   ;;  %s827_s26 = sphi %s1061_s26, %s350_s26  }
  0x17   : >> { %385 = vmatpush.msra.mxu0 %v953_v15  ;;  %408 = vmatpush.msra.mxu1 %v1054_v31  ;;  %s352_s30 = scalar_lea.vmem %s291_s17, %s1071_s27  ;;  %s358_s8 = scalar_lea.vmem %s301_s7, %s1071_s27 }
  0x18   : >> { %459 = vmatpush.msra.mxu2 %v948_v14  ;;  %482 = vmatpush.msra.mxu3 %v1049_v30  ;;  %v1089_v33 = vld [vmem:[%s352_s30] sm:$0xff]  ;;  %v1091_v34 = vld [vmem:[%s352_s30 + $0x8] sm:$0xf]  ;;  %v1108_v42 = vld [vmem:[%s352_s30 + $0x18] sm:$0xf]  ;;  %s1125_s14 = scalar_lea.vmem %s296_s19, %s1071_s27  ;;  %s361_s22 = scalar_lea.vmem %s306_s11, %s1071_s27 }
  0x19   : >> { %386 = vmatpush.msra.mxu0 %v948_v14  ;;  %409 = vmatpush.msra.mxu1 %v1049_v30  ;;  %v1093_v35 = vld [vmem:[%s358_s8] sm:$0xff]  ;;  %v1097_v36 = vld [vmem:[%s358_s8 + $0x8] sm:$0xf]  ;;  %v434_v37 = vrot.slane %v1089_v33, 1  ;;  %v435_v38 = vrot.slane %v1091_v34, 1  ;;  %v1110_v43 = vld [vmem:[%s352_s30 + $0x10] sm:$0xff]  ;;  %s640_s20 = scalar_lea.vmem %s1014_s23, %s1071_s27 }
  0x1a   : >> { %460 = vmatpush.msra.mxu2 %v943_v13  ;;  %483 = vmatpush.msra.mxu3 %v1044_v29  ;;  %v445_v39 = vrot.slane %v1093_v35, 1  ;;  %v446_v40 = vrot.slane %v1097_v36, 1  ;;  %v575_v46 = vrot.slane %v1108_v42, 1  ;;  %v574_v47 = vrot.slane %v1110_v43, 1  ;;  %v1140_v50 = vld [vmem:[%s1125_s14 + $0x8] sm:$0xf] }
  0x1b   : >> { %387 = vmatpush.msra.mxu0 %v943_v13  ;;  %410 = vmatpush.msra.mxu1 %v1044_v29  ;;  %v436_v41 = vsel %vm433_vm0, %v434_v37, %v435_v38  ;;  %v1142_v51 = vld [vmem:[%s361_s22 + $0x8] sm:$0xf]  ;;  %v1146_v52 = vld [vmem:[%s1125_s14] sm:$0xff]  ;;  %v1163_v56 = vld [vmem:[%s1125_s14 + $0x10] sm:$0xff]  ;;  %s350_s26 = sadd.s32 1, %s827_s26  }
  0x1c   : >> { %461 = vmatpush.msra.mxu2 %v938_v12  ;;  %484 = vmatpush.msra.mxu3 %v1039_v28  ;;  %v447_v44 = vsel %vm433_vm0, %v445_v39, %v446_v40  ;;  %v803_v45 = vpack.i.bf16 %v446_v40, %v435_v38  ;;  %v576_v49 = vsel %vm433_vm0, %v574_v47, %v575_v46  ;;  %v1148_v53 = vld [vmem:[%s361_s22] sm:$0xff]  ;;  %v1181_v57 = vld [vmem:[%s1125_s14 + $0x18] sm:$0xf]  ;;  %p347_p4 = scmp.ge.s32.totalorder %s350_s26, 11  }
  0x1d   : >> { %388 = vmatpush.msra.mxu0 %v938_v12  ;;  %411 = vmatpush.msra.mxu1 %v1039_v28  ;;  %v793_v48 = vpack.i.bf16 %v447_v44, %v436_v41  ;;  %v808_v54 = vpack.i.bf16 %v1142_v51, %v1140_v50  ;;  %v798_v55 = vpack.i.bf16 %v1148_v53, %v1146_v52 }
  0x1e   : >> { %462 = vmatpush.msra.mxu2 %v931_v11  ;;  %485 = vmatpush.msra.mxu3 %v1034_v27 }
  0x1f   : >> { %389 = vmatpush.msra.mxu0 %v931_v11  ;;  %412 = vmatpush.msra.mxu1 %v1034_v27 }
  0x20   : >> { %804 = vrot.lane.b32.xlu1 %v803_v45, %s829_s18  ;;  %463 = vmatpush.msra.mxu2 %v926_v10 }
  0x21   : >> { %794 = vrot.lane.b32.xlu0 %v793_v48, %s829_s18  ;;  %577 = vrot.lane.b32.xlu2 %v576_v49, %s829_s18 }
  0x22   : >> { %486 = vmatpush.msra.mxu3 %v1029_v26  ;;  %464 = vmatpush.msra.mxu2 %v921_v9 }
  0x23   : >> { %390 = vmatpush.msra.mxu0 %v926_v10  ;;  %413 = vmatpush.msra.mxu1 %v1029_v26 }
  0x24   : >> { %487 = vmatpush.msra.mxu3 %v1024_v25  ;;  %465 = vmatpush.msra.mxu2 %v916_v8 }
  0x25   : >> { %391 = vmatpush.msra.mxu0 %v921_v9  ;;  %414 = vmatpush.msra.mxu1 %v1024_v25 }
  0x26   : >> { %488 = vmatpush.msra.mxu3 %v1019_v24  ;;  %466 = vmatpush.msra.mxu2 %v911_v7 }
  0x27   : >> { %392 = vmatpush.msra.mxu0 %v916_v8  ;;  %415 = vmatpush.msra.mxu1 %v1019_v24 }
  0x28   : >> { %809 = vrot.lane.b32.xlu1 %v808_v54, %s829_s18  ;;  %489 = vmatpush.msra.mxu3 %v1009_v23 }
  0x29   : >> { %799 = vrot.lane.b32.xlu0 %v798_v55, %s829_s18  ;;  %516 = vrot.lane.b32.xlu2 %v1163_v56, %s829_s18 }
  0x2a   : >> { %467 = vmatpush.msra.mxu2 %v906_v6  ;;  %490 = vmatpush.msra.mxu3 %v1004_v22 }
  0x2b   : >> { %393 = vmatpush.msra.mxu0 %v911_v7  ;;  %416 = vmatpush.msra.mxu1 %v1009_v23 }
  0x2c   : >> { %468 = vmatpush.msra.mxu2 %v901_v5  ;;  %491 = vmatpush.msra.mxu3 %v999_v21 }
  0x2d   : >> { %394 = vmatpush.msra.mxu0 %v906_v6  ;;  %417 = vmatpush.msra.mxu1 %v1004_v22 }
  0x2e   : >> { %469 = vmatpush.msra.mxu2 %v896_v4  ;;  %492 = vmatpush.msra.mxu3 %v986_v20 }
  0x2f   : >> { %395 = vmatpush.msra.mxu0 %v901_v5  ;;  %418 = vmatpush.msra.mxu1 %v999_v21 }
  0x30   : >> { %518 = vrot.lane.b32.xlu1 %v1181_v57, %s829_s18  ;;  %470 = vmatpush.msra.mxu2 %v891_v3 }
  0x31   : >> { %579 = vrot.lane.b32.xlu0 %v575_v46, %s829_s18  ;;  %493 = vmatpush.msra.mxu3 %v981_v19 }
  0x32   : >> { %471 = vmatpush.msra.mxu2 %v886_v2  ;;  %396 = vmatpush.msra.mxu0 %v896_v4 }
  0x33   : >> { %494 = vmatpush.msra.mxu3 %v976_v18  ;;  %419 = vmatpush.msra.mxu1 %v986_v20 }
  0x34   : >> { %472 = vmatpush.msra.mxu2 %v881_v1  ;;  %397 = vmatpush.msra.mxu0 %v891_v3 }
  0x35   : >> { %495 = vmatpush.msra.mxu3 %v963_v17  ;;  %420 = vmatpush.msra.mxu1 %v981_v19 }
  0x36   : >> { %473 = vmatpush.msra.mxu2 %v876_v0  ;;  %398 = vmatpush.msra.mxu0 %v886_v2 }
  0x37   : >> { %496 = vmatpush.msra.mxu3 %v958_v16  ;;  %421 = vmatpush.msra.mxu1 %v976_v18 }
  0x38   : >> { %585 = vmatpush.msrb.mxu2 %v953_v15  ;;  %399 = vmatpush.msra.mxu0 %v881_v1 }
  0x39   : >> { %608 = vmatpush.msrb.mxu3 %v1054_v31  ;;  %422 = vmatpush.msra.mxu1 %v963_v17 }
  0x3a   : >> { %586 = vmatpush.msrb.mxu2 %v948_v14  ;;  %400 = vmatpush.msra.mxu0 %v876_v0 }
  0x3b   : >> { %609 = vmatpush.msrb.mxu3 %v1049_v30  ;;  %423 = vmatpush.msra.mxu1 %v958_v16 }
  0x3c   : >> { %587 = vmatpush.msrb.mxu2 %v943_v13  ;;  %524 = vmatpush.msrb.mxu0 %v953_v15 }
  0x3d   : >> { %610 = vmatpush.msrb.mxu3 %v1044_v29  ;;  %547 = vmatpush.msrb.mxu1 %v1054_v31 }
  0x3e   : >> { %588 = vmatpush.msrb.mxu2 %v938_v12  ;;  %525 = vmatpush.msrb.mxu0 %v948_v14 }
  0x3f   : >> { %611 = vmatpush.msrb.mxu3 %v1039_v28  ;;  %548 = vmatpush.msrb.mxu1 %v1049_v30 }
  0x40   : >> { %589 = vmatpush.msrb.mxu2 %v931_v11  ;;  %526 = vmatpush.msrb.mxu0 %v943_v13 }
  0x41   : >> { %612 = vmatpush.msrb.mxu3 %v1034_v27  ;;  %549 = vmatpush.msrb.mxu1 %v1044_v29 }
  0x42   : >> { %590 = vmatpush.msrb.mxu2 %v926_v10  ;;  %527 = vmatpush.msrb.mxu0 %v938_v12 }
  0x43   : >> { %613 = vmatpush.msrb.mxu3 %v1029_v26  ;;  %550 = vmatpush.msrb.mxu1 %v1039_v28 }
  0x44   : >> { %591 = vmatpush.msrb.mxu2 %v921_v9  ;;  %528 = vmatpush.msrb.mxu0 %v931_v11 }
  0x45   : >> { %614 = vmatpush.msrb.mxu3 %v1024_v25  ;;  %551 = vmatpush.msrb.mxu1 %v1034_v27 }
  0x46   : >> { %592 = vmatpush.msrb.mxu2 %v916_v8  ;;  %529 = vmatpush.msrb.mxu0 %v926_v10 }
  0x47   : >> { %615 = vmatpush.msrb.mxu3 %v1019_v24  ;;  %552 = vmatpush.msrb.mxu1 %v1029_v26 }
  0x48   : >> { %593 = vmatpush.msrb.mxu2 %v911_v7  ;;  %530 = vmatpush.msrb.mxu0 %v921_v9 }
  0x49   : >> { %616 = vmatpush.msrb.mxu3 %v1009_v23  ;;  %553 = vmatpush.msrb.mxu1 %v1024_v25 }
  0x4a   : >> { %594 = vmatpush.msrb.mxu2 %v906_v6  ;;  %531 = vmatpush.msrb.mxu0 %v916_v8 }
  0x4b   : >> { %617 = vmatpush.msrb.mxu3 %v1004_v22  ;;  %554 = vmatpush.msrb.mxu1 %v1019_v24 }
  0x4c   : >> { %595 = vmatpush.msrb.mxu2 %v901_v5  ;;  %532 = vmatpush.msrb.mxu0 %v911_v7 }
  0x4d   : >> { %618 = vmatpush.msrb.mxu3 %v999_v21  ;;  %555 = vmatpush.msrb.mxu1 %v1009_v23 }
  0x4e   : >> { %596 = vmatpush.msrb.mxu2 %v896_v4  ;;  %533 = vmatpush.msrb.mxu0 %v906_v6 }
  0x4f   : >> { %619 = vmatpush.msrb.mxu3 %v986_v20  ;;  %556 = vmatpush.msrb.mxu1 %v1004_v22 }
  0x50   : >> { %597 = vmatpush.msrb.mxu2 %v891_v3  ;;  %534 = vmatpush.msrb.mxu0 %v901_v5 }
  0x51   : >> { %620 = vmatpush.msrb.mxu3 %v981_v19  ;;  %557 = vmatpush.msrb.mxu1 %v999_v21 }
  0x52   : >> { %598 = vmatpush.msrb.mxu2 %v886_v2  ;;  %535 = vmatpush.msrb.mxu0 %v896_v4 }
  0x53   : >> { %621 = vmatpush.msrb.mxu3 %v976_v18  ;;  %558 = vmatpush.msrb.mxu1 %v986_v20 }
  0x54   : >> { %599 = vmatpush.msrb.mxu2 %v881_v1  ;;  %536 = vmatpush.msrb.mxu0 %v891_v3 }
  0x55   : >> { %622 = vmatpush.msrb.mxu3 %v963_v17  ;;  %559 = vmatpush.msrb.mxu1 %v981_v19 }
  0x56   : >> { %600 = vmatpush.msrb.mxu2 %v876_v0  ;;  %537 = vmatpush.msrb.mxu0 %v886_v2 }
  0x57   : >> { %623 = vmatpush.msrb.mxu3 %v958_v16  ;;  %560 = vmatpush.msrb.mxu1 %v976_v18 }
  0x58   : >> { %538 = vmatpush.msrb.mxu0 %v881_v1 }
  0x59   : >> { %561 = vmatpush.msrb.mxu1 %v963_v17 }
  0x5a   : >> { %539 = vmatpush.msrb.mxu0 %v876_v0 }
  0x5b   : >> { %562 = vmatpush.msrb.mxu1 %v958_v16 }
  0x7b   : >> { %v578_v49 = vpop.permute.xlu2 %577 }
  0x7c   : >> { %v583_v54 = vsel %vm380_vm1, %v1163_v56, %v578_v49 }
  0x92   : >> { %v805_v59 = vpop.permute.xlu1 %804 }
  0x93   : >> { %v795_v58 = vpop.permute.xlu0 %794  ;;  %v807_v37 = vunpack.i.h.bf16 %v805_v59  ;;  %v806_v38 = vunpack.i.l.bf16 %v805_v59 }
  0x94   : >> { %v797_v60 = vunpack.i.h.bf16 %v795_v58  ;;  %v796_v61 = vunpack.i.l.bf16 %v795_v58 }
  0x95   : >> { %v455_v44 = vsel %vm380_vm1, %v1140_v50, %v806_v38  ;;  %v457_v45 = vsel %vm380_vm1, %v1142_v51, %v807_v37 }
  0x96   : >> { %v454_v62 = vsel %vm380_vm1, %v1146_v52, %v796_v61  ;;  %v456_v63 = vsel %vm380_vm1, %v1148_v53, %v797_v60 }
  0x97   : >> { %474 = vmatmul.f32.vlgmr.msra.gmra.mxu2 %v454_v62  ;;  %497 = vmatmul.f32.vlgmr.msra.gmra.mxu3 %v456_v63 }
  0x9a   : >> { %v810_v46 = vpop.permute.xlu1 %809 }
  0x9b   : >> { %v800_v39 = vpop.permute.xlu0 %799  ;;  %v812_v52 = vunpack.i.h.bf16 %v810_v46  ;;  %v811_v53 = vunpack.i.l.bf16 %v810_v46 }
  0x9c   : >> { %v802_v40 = vunpack.i.h.bf16 %v800_v39  ;;  %v801_v41 = vunpack.i.l.bf16 %v800_v39 }
  0x9d   : >> { %v382_v50 = vsel %vm380_vm1, %v1091_v34, %v811_v53  ;;  %v384_v51 = vsel %vm380_vm1, %v1097_v36, %v812_v52 }
  0x9e   : >> { %v381_v47 = vsel %vm380_vm1, %v1089_v33, %v801_v41  ;;  %v383_v48 = vsel %vm380_vm1, %v1093_v35, %v802_v40  ;;  %v517_v33 = vpop.permute.xlu2 %516 }
  0x9f   : >> { %401 = vmatmul.f32.vlgmr.msra.gmra.mxu0 %v381_v47  ;;  %424 = vmatmul.f32.vlgmr.msra.gmra.mxu1 %v383_v48  ;;  %v522_v55 = vsel %vm380_vm1, %v1110_v43, %v517_v33 }
  0xa0   : >> { %477 = vmatmul.f32.gmra.mxu2 %v455_v44  ;;  %500 = vmatmul.f32.gmra.mxu3 %v457_v45 }
  0xa2   : >> { %v519_v34 = vpop.permute.xlu1 %518 }
  0xa3   : >> { %v580_v35 = vpop.permute.xlu0 %579  ;;  %v523_v36 = vsel %vm380_vm1, %v1108_v42, %v519_v34 }
  0xa4   : >> { %v584_v58 = vsel %vm380_vm1, %v1181_v57, %v580_v35 }
  0xa7   : >> { %404 = vmatmul.f32.gmra.mxu0 %v382_v50  ;;  %427 = vmatmul.f32.gmra.mxu1 %v384_v51 }
  0xa8   : >> { %601 = vmatmul.f32.vlgmr.msrb.gmra.mxu2 %v456_v63  ;;  %624 = vmatmul.f32.vlgmr.msrb.gmra.mxu3 %v583_v54 }
  0xaf   : >> { %540 = vmatmul.f32.vlgmr.msrb.gmra.mxu0 %v383_v48  ;;  %563 = vmatmul.f32.vlgmr.msrb.gmra.mxu1 %v522_v55  ;;  %v634_v48 = vperm.slane %v1059_v32, 0 }
  0xb0   : >> { %604 = vmatmul.f32.gmra.mxu2 %v457_v45  ;;  %627 = vmatmul.f32.gmra.mxu3 %v584_v58 }
  0xb7   : >> { %543 = vmatmul.f32.gmra.mxu0 %v384_v51  ;;  %566 = vmatmul.f32.gmra.mxu1 %v523_v36 }
 0x11a   : >> { %v475_v56 = vpop.f32.mrf.mxu2  ;;  %v498_v59 = vpop.f32.mrf.mxu3 }
 0x11b   : >> { %v499_v57 = vadd.f32 %v498_v59, %v475_v56 }
 0x11c   : >> { %v402_v60 = vpop.f32.mrf.mxu0  ;;  %v425_v61 = vpop.f32.mrf.mxu1 }
 0x11d   : >> { %v426_v38 = vadd.f32 %v425_v61, %v402_v60 }
 0x11f   : >> { %v504_v45 = vmax.f32 %v426_v38, %v499_v57 }
 0x123   : >> { %v478_v62 = vpop.f32.mrf.mxu2  ;;  %v501_v63 = vpop.f32.mrf.mxu3 }
 0x124   : >> { %v405_v43 = vpop.f32.mrf.mxu0  ;;  %v428_v37 = vpop.f32.mrf.mxu1  ;;  %v502_v53 = vadd.f32 %v501_v63, %v478_v62 }
 0x125   : >> { %v429_v49 = vadd.f32 %v428_v37, %v405_v43 }
 0x127   : >> { %v505_v55 = vmax.f32 %v429_v49, %v502_v53 }
 0x12b   : >> { %v602_v39 = vpop.f32.mrf.mxu2  ;;  %v625_v40 = vpop.f32.mrf.mxu3 }
 0x12c   : >> { %v541_v41 = vpop.f32.mrf.mxu0  ;;  %v564_v44 = vpop.f32.mrf.mxu1  ;;  %v626_v46 = vadd.f32 %v625_v40, %v602_v39 }
 0x12d   : >> { %v565_v42 = vadd.f32 %v564_v44, %v541_v41 }
 0x12f   : >> { %v570_v47 = vmax.f32 %v504_v45, %v565_v42 }
 0x131   : >> { %v631_v52 = vmax.f32 %v570_v47, %v626_v46 }
 0x133   : >> { %v636_v50 = vadd.f32 %v634_v48, %v631_v52  ;;  %v605_v51 = vpop.f32.mrf.mxu2  ;;  %v628_v54 = vpop.f32.mrf.mxu3 }
 0x134   : >> { %v544_v33 = vpop.f32.mrf.mxu0  ;;  %v567_v35 = vpop.f32.mrf.mxu1  ;;  %v629_v36 = vadd.f32 %v628_v54, %v605_v51 }
 0x135   : >> { %v638_v58 = vmax.f32 %v636_v50, 0.0  ;;  %v568_v34 = vadd.f32 %v567_v35, %v544_v33 }
 0x137   : >> { %641 = vst [vmem:[%s640_s20] sm:$0xff] %v638_v58  ;;  %v571_v56 = vmax.f32 %v505_v55, %v568_v34 }
 0x139   : >> { %v632_v59 = vmax.f32 %v571_v56, %v629_v36 }
 0x13b   : >> { %v637_v60 = vadd.f32 %v634_v48, %v632_v59  ;;  %349 = sbr.rel (!%p347_p4) target bundleno = 22 (0x16), region = 97 }
 0x13d   : >> { %v639_v61 = vmax.f32 %v637_v60, 0.0 }
 0x13f   : >> { %642 = vst [vmem:[%s640_s20 + $0x8] sm:$0x7] %v639_v61 }
 0x140 PF: > { %s16_s21 = sadd.s32 1, %s823_s21  }
 0x141   : > { %p13_p5 = scmp.ge.s32.totalorder %s16_s21, 4  }
 0x143   :  { %15 = sbr.rel (!%p13_p5) target bundleno = 1 (0x1), region = 108 }

// kernel: forward.9
= control target key start
LH: loop header
LB: loop body
LE: loop exit
PB: predicated region body
PF: predicated region fallthrough
CT: control target
= control target key end

     0   :  { %8 = vsyncpa [#allocation4], 0  ;;  %s2005_s0 = inlined_call_operand.vmem [shape: f32[8,15488], index: 0, kind: input, shape index: {}]   ;;  %s2006_s1 = inlined_call_operand.hbm [shape: f32[15488,512], index: 1, kind: input, shape index: {}]   ;;  %s2007_s2 = inlined_call_operand.vmem [shape: f32[1,512], index: 2, kind: input, shape index: {}]   ;;  %s2008_s3 = inlined_call_operand.vmem [shape: f32[8,512], index: 3, kind: output, shape index: {}]  }
   0x1   :  { %10 = vsyncpa [#allocation4 + $0x1], 0  ;;  %s1462_s12 = smov 0   ;;  %s1464_s13 = smov 0  }
   0x2   :  { %s1466_s14 = smov 0   ;;  %s1468_s15 = smov 0  }
   0x3   :  { %s1470_s16 = smov 0   ;;  %s1472_s17 = smov 0  }
   0x4   :  { %s1474_s18 = smov 0   ;;  %s1476_s19 = smov 0  }
   0x5 LB: > { %s1246_s20 = sadd.s32 4294967295, %s1436_s19   ;;  %s28_s21 = sadd.s32 1, %s1428_s17  ;;  %s1436_s19 = sphi %s1476_s19, %s16_s19   ;;  %s1432_s18 = sphi %s1474_s18, %s2020_s18   ;;  %s1428_s17 = sphi %s1472_s17, %s2019_s17   ;;  %s1424_s16 = sphi %s1470_s16, %s2018_s16   ;;  %s1420_s15 = sphi %s1468_s15, %s2017_s15   ;;  %s1416_s14 = sphi %s1466_s14, %s2016_s14   ;;  %s1412_s13 = sphi %s1464_s13, %s2015_s13   ;;  %s1408_s12 = sphi %s1462_s12, %s2014_s12  }
   0x6   : > { %p29_p0 = scmp.ge.s32.totalorder %s28_s21, 11  ;;  %s31_s22 = sadd.s32 1, %s1432_s18 }
   0x7   : > { %s72_s23 = sadd.s32 1, %s1416_s14  ;;  %p79_p1 = scmp.ne.s32.totalorder %s1416_s14, %s1412_s13 }
   0x8   : > { %s2022_s21 = smov (%p29_p0, %s28_s21), 0  ;;  %s2024_s22 = smov (!%p29_p0, %s31_s22), %s1432_s18 }
   0x9   : > { %s67_s24 = ssub.s32 %s1428_s17, %s2022_s21  ;;  %p80_p2 = scmp.eq.s32.totalorder %s1436_s19, 0 }
   0xa   : > { %p33_p3 = scmp.ge.s32.totalorder %s2024_s22, 2  ;;  %p85_p4 = scmp.ne.s32.totalorder %s1412_s13, %s1408_s12 }
   0xb   : > { %p1513_p5 = por %p80_p2, %p79_p1  ;;  %p86_p6 = scmp.eq.s32.totalorder %s1246_s20, 0 }
   0xc   : > { %s2026_s22 = smov (%p33_p3, %s2024_s22), 0  ;;  %p1271_p8 = scmp.lt.s32.totalorder %s1436_s19, 22 }
   0xd   : > { %2011 = sst [smem:[#allocation6_spill]] %s2026_s22  ;;  %p1519_p7 = por %p86_p6, %p85_p4 }
   0xe   : > { %s68_s27 = ssub.s32 %s1432_s18, %s2026_s22  ;;  %s176_s29 = sand.u32 1, %s1416_s14  }
   0xf   : > { %s69_s28 = sor.u32 %s68_s27, %s67_s24  ;;  %s1263_s30 = smul.u32 2816, %s176_s29 }
  0x10   : > { %p70_p9 = scmp.eq.s32.totalorder %s69_s28, 0  ;;  %s1250_s4 = sshll.u32 %s1432_s18, 1 }
  0x11   : > { %s1262_s6 = smul.u32 704, %s1428_s17  ;;  %s180_s7 = scalar_lea.vmem [#allocation3], %s1263_s30 }
  0x12   : > { %s1529_s5 = scalar_select %p70_p9, %s1416_s14, %s72_s23  }
  0x13   : > { %s191_s8 = sshll.u32 %s180_s7, 4  ;;  %p1268_p10 = pnand %p1271_p8, %p1513_p5  ;;  %s192_s8 = int_to_ptr.vmem [resolvable:$true] %s191_s8 }
  0x14   : > { %s186_s9 = sadd.s32 %s1262_s6, %s1250_s4  ;;  %s177_s27 = scalar_lea.sflag [#allocation4], %s176_s29 }
  0x15   : > { %s1252_s10 = sshll.u32 %s186_s9, 3  ;;  %s1438_s28 = smov 512  }
  0x16   : > { %s188_s20 = scalar_lea.hbm %s2006_s1, %s1252_s10  ;;  %s1439_s23 = smov 256  }
  0x17   : > { %s189_s24 = sshll.u32 %s188_s20, 4  ;;  %s1440_s22 = smov 16   ;;  %s190_s24 = int_to_ptr.hbm [resolvable:$true] %s189_s24 }
  0x18   : > { %1270 = dma.hbm_to_vmem [thread:$0]  (!%p1268_p10), %s190_s24, 45056, %s192_s8, %s177_s27, %s1438_s28, %s1439_s23, %s1440_s22  }
  0x19   : > { %p1253_p11 = scmp.ge.s32.totalorder %s1436_s19, 1  ;;  %p207_p12 = scmp.lt.s32.totalorder %s1436_s19, 23 }
  0x1b   : > { %p208_p13 = pnand %p1253_p11, %p207_p12 }
  0x1c   : > { %s213_s25 = sand.u32 (!%p208_p13), 1, %s1412_s13  }
  0x1d   : > { %211 = sbr.rel (%p208_p13) target bundleno = 391 (0x187), region = 32  ;;  %s214_s4 = scalar_lea.sflag (!%p208_p13), [#allocation4], %s213_s25 }
  0x1e   : > { %s1264_s30 = smul.u32 (!%p208_p13), 2816, %s213_s25 }
  0x20   : > { %s1540_s6 = scalar_lea.vmem (!%p208_p13), [#allocation3], %s1264_s30 }
  0x22   : > { %1403 = dma.done.wait (%p1519_p7), %s214_s4, 45056  }
  0x23   : > { %1405 = vsyncadd (%p1519_p7), %s214_s4, 4294922240  ;;  %s258_s29 = smul.u32 11, %s1420_s15  ;;  %s1255_s22 = sshll.u32 %s1424_s16, 1 }
  0x24   : > { %p271_p0 = scmp.lt.s32.totalorder %s1255_s22, 3  ;;  %p1258_p2 = scmp.ne.s32.totalorder %s1420_s15, 0 }
  0x25   : > { %p261_p1 = scmp.lt.s32.totalorder %s258_s29, 120 }
  0x26   : > { %s2028_s22 = smov (!%p271_p0, %s1255_s22), 3  ;;  %288 = sbr.rel (%p1258_p2) target bundleno = 46 (0x2e), region = 40 }
  0x27   : > { %s2030_s29 = smov (!%p261_p1, %s258_s29), 120  ;;  %s273_s9 = scalar_lea.vmem %s2007_s2, %s2028_s22 }
  0x28   : > { %s1257_s10 = sshll.u32 %s2028_s22, 3  ;;  %s1254_s11 = sshll.u32 %s2030_s29, 3 }
  0x29   : > { %s1558_s20 = scalar_lea.vmem %s2008_s3, %s1257_s10  ;;  %s1563_s27 = scalar_lea.vmem %s2005_s0, %s1254_s11 }
  0x2b   : > { %v1441_v0 = vmov 0.0  }
  0x2c   : > { %289 = vst [vmem:[#allocation2] sm:$0xff] %v1441_v0 }
  0x2d   : > { %290 = vst [vmem:[#allocation2 + $0x8] sm:$0xff] %v1441_v0 }
  0x2e PF: > { %v334_v1 = vld [vmem:[%s1540_s6 + $0xf0] sm:$0xff]  ;;  %v332_v3 = vld [vmem:[%s1540_s6 + $0xe0] sm:$0xff]  ;;  %p1259_p3 = scmp.ne.s32.totalorder %s1420_s15, 10 }
  0x2f   : > { %v398_v2 = vld [vmem:[%s1540_s6 + $0x2f0] sm:$0xff]  ;;  %656 = vmatpush.msra.mxu0 %v334_v1  ;;  %v396_v5 = vld [vmem:[%s1540_s6 + $0x2e0] sm:$0xff] }
  0x30   : > { %696 = vmatpush.msra.mxu2 %v398_v2  ;;  %v366_v4 = vld [vmem:[%s1540_s6 + $0x1f0] sm:$0xff]  ;;  %v364_v7 = vld [vmem:[%s1540_s6 + $0x1e0] sm:$0xff] }
  0x31   : > { %676 = vmatpush.msra.mxu1 %v366_v4  ;;  %v330_v6 = vld [vmem:[%s1540_s6 + $0xd0] sm:$0xff]  ;;  %657 = vmatpush.msra.mxu0 %v332_v3  ;;  %v328_v11 = vld [vmem:[%s1540_s6 + $0xc0] sm:$0xff] }
  0x32   : > { %v394_v8 = vld [vmem:[%s1540_s6 + $0x2d0] sm:$0xff]  ;;  %697 = vmatpush.msra.mxu2 %v396_v5  ;;  %v392_v12 = vld [vmem:[%s1540_s6 + $0x2c0] sm:$0xff] }
  0x33   : > { %v362_v9 = vld [vmem:[%s1540_s6 + $0x1d0] sm:$0xff]  ;;  %677 = vmatpush.msra.mxu1 %v364_v7  ;;  %658 = vmatpush.msra.mxu0 %v330_v6  ;;  %v360_v13 = vld [vmem:[%s1540_s6 + $0x1c0] sm:$0xff] }
  0x34   : > { %v430_v10 = vld [vmem:[%s1540_s6 + $0x3f0] sm:$0xff]  ;;  %698 = vmatpush.msra.mxu2 %v394_v8  ;;  %v428_v14 = vld [vmem:[%s1540_s6 + $0x3e0] sm:$0xff] }
  0x35   : > { %716 = vmatpush.msra.mxu3 %v430_v10  ;;  %678 = vmatpush.msra.mxu1 %v362_v9  ;;  %v326_v15 = vld [vmem:[%s1540_s6 + $0xb0] sm:$0xff]  ;;  %v424_v19 = vld [vmem:[%s1540_s6 + $0x3c0] sm:$0xff] }
  0x36   : > { %v390_v16 = vld [vmem:[%s1540_s6 + $0x2b0] sm:$0xff]  ;;  %659 = vmatpush.msra.mxu0 %v328_v11  ;;  %699 = vmatpush.msra.mxu2 %v392_v12  ;;  %v324_v20 = vld [vmem:[%s1540_s6 + $0xa0] sm:$0xff] }
  0x37   : > { %717 = vmatpush.msra.mxu3 %v428_v14  ;;  %v426_v17 = vld [vmem:[%s1540_s6 + $0x3d0] sm:$0xff]  ;;  %679 = vmatpush.msra.mxu1 %v360_v13  ;;  %v388_v21 = vld [vmem:[%s1540_s6 + $0x2a0] sm:$0xff] }
  0x38   : > { %v358_v18 = vld [vmem:[%s1540_s6 + $0x1b0] sm:$0xff]  ;;  %660 = vmatpush.msra.mxu0 %v326_v15  ;;  %700 = vmatpush.msra.mxu2 %v390_v16  ;;  %v356_v22 = vld [vmem:[%s1540_s6 + $0x1a0] sm:$0xff] }
  0x39   : > { %718 = vmatpush.msra.mxu3 %v426_v17  ;;  %v422_v23 = vld [vmem:[%s1540_s6 + $0x3b0] sm:$0xff]  ;;  %680 = vmatpush.msra.mxu1 %v358_v18  ;;  %v420_v27 = vld [vmem:[%s1540_s6 + $0x3a0] sm:$0xff] }
  0x3a   : > { %v322_v24 = vld [vmem:[%s1540_s6 + $0x90] sm:$0xff]  ;;  %661 = vmatpush.msra.mxu0 %v324_v20  ;;  %701 = vmatpush.msra.mxu2 %v388_v21  ;;  %v320_v28 = vld [vmem:[%s1540_s6 + $0x80] sm:$0xff] }
  0x3b   : > { %v386_v25 = vld [vmem:[%s1540_s6 + $0x290] sm:$0xff]  ;;  %719 = vmatpush.msra.mxu3 %v424_v19  ;;  %681 = vmatpush.msra.mxu1 %v356_v22  ;;  %v384_v29 = vld [vmem:[%s1540_s6 + $0x280] sm:$0xff] }
  0x3c   : > { %v354_v26 = vld [vmem:[%s1540_s6 + $0x190] sm:$0xff]  ;;  %662 = vmatpush.msra.mxu0 %v322_v24  ;;  %702 = vmatpush.msra.mxu2 %v386_v25  ;;  %v352_v30 = vld [vmem:[%s1540_s6 + $0x180] sm:$0xff] }
  0x3d   : > { %720 = vmatpush.msra.mxu3 %v422_v23  ;;  %v418_v31 = vld [vmem:[%s1540_s6 + $0x390] sm:$0xff]  ;;  %682 = vmatpush.msra.mxu1 %v354_v26  ;;  %v416_v35 = vld [vmem:[%s1540_s6 + $0x380] sm:$0xff] }
  0x3e   : > { %v318_v32 = vld [vmem:[%s1540_s6 + $0x70] sm:$0xff]  ;;  %663 = vmatpush.msra.mxu0 %v320_v28  ;;  %703 = vmatpush.msra.mxu2 %v384_v29  ;;  %v316_v36 = vld [vmem:[%s1540_s6 + $0x60] sm:$0xff] }
  0x3f   : > { %v382_v33 = vld [vmem:[%s1540_s6 + $0x270] sm:$0xff]  ;;  %721 = vmatpush.msra.mxu3 %v420_v27  ;;  %683 = vmatpush.msra.mxu1 %v352_v30  ;;  %v380_v37 = vld [vmem:[%s1540_s6 + $0x260] sm:$0xff] }
  0x40   : > { %v350_v34 = vld [vmem:[%s1540_s6 + $0x170] sm:$0xff]  ;;  %664 = vmatpush.msra.mxu0 %v318_v32  ;;  %704 = vmatpush.msra.mxu2 %v382_v33  ;;  %v348_v38 = vld [vmem:[%s1540_s6 + $0x160] sm:$0xff] }
  0x41   : > { %722 = vmatpush.msra.mxu3 %v418_v31  ;;  %v414_v39 = vld [vmem:[%s1540_s6 + $0x370] sm:$0xff]  ;;  %684 = vmatpush.msra.mxu1 %v350_v34  ;;  %v412_v43 = vld [vmem:[%s1540_s6 + $0x360] sm:$0xff] }
  0x42   : > { %v314_v40 = vld [vmem:[%s1540_s6 + $0x50] sm:$0xff]  ;;  %665 = vmatpush.msra.mxu0 %v316_v36  ;;  %705 = vmatpush.msra.mxu2 %v380_v37  ;;  %v312_v44 = vld [vmem:[%s1540_s6 + $0x40] sm:$0xff] }
  0x43   : > { %v378_v41 = vld [vmem:[%s1540_s6 + $0x250] sm:$0xff]  ;;  %723 = vmatpush.msra.mxu3 %v416_v35  ;;  %685 = vmatpush.msra.mxu1 %v348_v38  ;;  %v376_v45 = vld [vmem:[%s1540_s6 + $0x240] sm:$0xff] }
  0x44   : > { %v346_v42 = vld [vmem:[%s1540_s6 + $0x150] sm:$0xff]  ;;  %666 = vmatpush.msra.mxu0 %v314_v40  ;;  %706 = vmatpush.msra.mxu2 %v378_v41  ;;  %v344_v46 = vld [vmem:[%s1540_s6 + $0x140] sm:$0xff] }
  0x45   : > { %724 = vmatpush.msra.mxu3 %v414_v39  ;;  %v410_v47 = vld [vmem:[%s1540_s6 + $0x350] sm:$0xff]  ;;  %686 = vmatpush.msra.mxu1 %v346_v42  ;;  %v408_v51 = vld [vmem:[%s1540_s6 + $0x340] sm:$0xff] }
  0x46   : > { %v310_v48 = vld [vmem:[%s1540_s6 + $0x30] sm:$0xff]  ;;  %667 = vmatpush.msra.mxu0 %v312_v44  ;;  %707 = vmatpush.msra.mxu2 %v376_v45  ;;  %v308_v52 = vld [vmem:[%s1540_s6 + $0x20] sm:$0xff] }
  0x47   : > { %v374_v49 = vld [vmem:[%s1540_s6 + $0x230] sm:$0xff]  ;;  %725 = vmatpush.msra.mxu3 %v412_v43  ;;  %687 = vmatpush.msra.mxu1 %v344_v46  ;;  %v372_v53 = vld [vmem:[%s1540_s6 + $0x220] sm:$0xff] }
  0x48   : > { %v342_v50 = vld [vmem:[%s1540_s6 + $0x130] sm:$0xff]  ;;  %668 = vmatpush.msra.mxu0 %v310_v48  ;;  %708 = vmatpush.msra.mxu2 %v374_v49  ;;  %v340_v54 = vld [vmem:[%s1540_s6 + $0x120] sm:$0xff] }
  0x49   : > { %726 = vmatpush.msra.mxu3 %v410_v47  ;;  %v406_v55 = vld [vmem:[%s1540_s6 + $0x330] sm:$0xff]  ;;  %688 = vmatpush.msra.mxu1 %v342_v50  ;;  %v404_v59 = vld [vmem:[%s1540_s6 + $0x320] sm:$0xff] }
  0x4a   : > { %v306_v56 = vld [vmem:[%s1540_s6 + $0x10] sm:$0xff]  ;;  %669 = vmatpush.msra.mxu0 %v308_v52  ;;  %709 = vmatpush.msra.mxu2 %v372_v53  ;;  %v304_v60 = vld [vmem:[%s1540_s6] sm:$0xff] }
  0x4b   : > { %v370_v57 = vld [vmem:[%s1540_s6 + $0x210] sm:$0xff]  ;;  %727 = vmatpush.msra.mxu3 %v408_v51  ;;  %689 = vmatpush.msra.mxu1 %v340_v54  ;;  %v368_v61 = vld [vmem:[%s1540_s6 + $0x200] sm:$0xff] }
  0x4c   : > { %v338_v58 = vld [vmem:[%s1540_s6 + $0x110] sm:$0xff]  ;;  %670 = vmatpush.msra.mxu0 %v306_v56  ;;  %710 = vmatpush.msra.mxu2 %v370_v57  ;;  %v336_v0 = vld [vmem:[%s1540_s6 + $0x100] sm:$0xff] }
  0x4d   : > { %728 = vmatpush.msra.mxu3 %v406_v55  ;;  %v462_v62 = vld [vmem:[%s1540_s6 + $0x4f0] sm:$0xff]  ;;  %690 = vmatpush.msra.mxu1 %v338_v58  ;;  %v460_v2 = vld [vmem:[%s1540_s6 + $0x4e0] sm:$0xff] }
  0x4e   : > { %v526_v63 = vld [vmem:[%s1540_s6 + $0x6f0] sm:$0xff]  ;;  %671 = vmatpush.msra.mxu0 %v304_v60  ;;  %711 = vmatpush.msra.mxu2 %v368_v61  ;;  %v524_v4 = vld [vmem:[%s1540_s6 + $0x6e0] sm:$0xff] }
  0x4f   : > { %729 = vmatpush.msra.mxu3 %v404_v59  ;;  %v402_v1 = vld [vmem:[%s1540_s6 + $0x310] sm:$0xff]  ;;  %v400_v5 = vld [vmem:[%s1540_s6 + $0x300] sm:$0xff]  ;;  %691 = vmatpush.msra.mxu1 %v336_v0  ;;  %v1693_v59 = vld [vmem:[%s1563_s27 + $0x18] sm:$0xff] }
  0x50   : > { %v494_v3 = vld [vmem:[%s1540_s6 + $0x5f0] sm:$0xff]  ;;  %736 = vmatpush.msrb.mxu0 %v462_v62  ;;  %776 = vmatpush.msrb.mxu2 %v526_v63  ;;  %v492_v7 = vld [vmem:[%s1540_s6 + $0x5e0] sm:$0xff]  ;;  %v1703_v0 = vld [vmem:[%s1563_s27 + $0x8] sm:$0xff] }
  0x51   : > { %730 = vmatpush.msra.mxu3 %v402_v1  ;;  %v458_v6 = vld [vmem:[%s1540_s6 + $0x4d0] sm:$0xff]  ;;  %756 = vmatpush.msrb.mxu1 %v494_v3  ;;  %v456_v10 = vld [vmem:[%s1540_s6 + $0x4c0] sm:$0xff] }
  0x52   : > { %737 = vmatpush.msrb.mxu0 %v460_v2  ;;  %v522_v8 = vld [vmem:[%s1540_s6 + $0x6d0] sm:$0xff]  ;;  %777 = vmatpush.msrb.mxu2 %v524_v4  ;;  %v520_v12 = vld [vmem:[%s1540_s6 + $0x6c0] sm:$0xff] }
  0x53   : > { %v558_v9 = vld [vmem:[%s1540_s6 + $0x7f0] sm:$0xff]  ;;  %731 = vmatpush.msra.mxu3 %v400_v5  ;;  %757 = vmatpush.msrb.mxu1 %v492_v7  ;;  %v556_v13 = vld [vmem:[%s1540_s6 + $0x7e0] sm:$0xff] }
  0x54   : > { %v490_v11 = vld [vmem:[%s1540_s6 + $0x5d0] sm:$0xff]  ;;  %738 = vmatpush.msrb.mxu0 %v458_v6  ;;  %778 = vmatpush.msrb.mxu2 %v522_v8  ;;  %v488_v15 = vld [vmem:[%s1540_s6 + $0x5c0] sm:$0xff] }
  0x55   : > { %796 = vmatpush.msrb.mxu3 %v558_v9  ;;  %v454_v14 = vld [vmem:[%s1540_s6 + $0x4b0] sm:$0xff]  ;;  %758 = vmatpush.msrb.mxu1 %v490_v11  ;;  %v452_v18 = vld [vmem:[%s1540_s6 + $0x4a0] sm:$0xff] }
  0x56   : > { %739 = vmatpush.msrb.mxu0 %v456_v10  ;;  %v518_v16 = vld [vmem:[%s1540_s6 + $0x6b0] sm:$0xff]  ;;  %779 = vmatpush.msrb.mxu2 %v520_v12  ;;  %v516_v20 = vld [vmem:[%s1540_s6 + $0x6a0] sm:$0xff] }
  0x57   : > { %v554_v17 = vld [vmem:[%s1540_s6 + $0x7d0] sm:$0xff]  ;;  %797 = vmatpush.msrb.mxu3 %v556_v13  ;;  %759 = vmatpush.msrb.mxu1 %v488_v15  ;;  %v552_v21 = vld [vmem:[%s1540_s6 + $0x7c0] sm:$0xff]  ;;  %v1726_v15 = vld [vmem:[%s1563_s27 + $0x38] sm:$0xff] }
  0x58   : > { %v486_v19 = vld [vmem:[%s1540_s6 + $0x5b0] sm:$0xff]  ;;  %740 = vmatpush.msrb.mxu0 %v454_v14  ;;  %780 = vmatpush.msrb.mxu2 %v518_v16  ;;  %v484_v23 = vld [vmem:[%s1540_s6 + $0x5a0] sm:$0xff] }
  0x59   : > { %798 = vmatpush.msrb.mxu3 %v554_v17  ;;  %v450_v22 = vld [vmem:[%s1540_s6 + $0x490] sm:$0xff]  ;;  %760 = vmatpush.msrb.mxu1 %v486_v19  ;;  %v448_v26 = vld [vmem:[%s1540_s6 + $0x480] sm:$0xff]  ;;  %v335_v19 = vld [vmem:[%s1540_s6 + $0xf8] sm:$0xff] }
  0x5a   : > { %741 = vmatpush.msrb.mxu0 %v452_v18  ;;  %v514_v24 = vld [vmem:[%s1540_s6 + $0x690] sm:$0xff]  ;;  %781 = vmatpush.msrb.mxu2 %v516_v20  ;;  %v512_v28 = vld [vmem:[%s1540_s6 + $0x680] sm:$0xff]  ;;  %v1735_v20 = vld [vmem:[%s1563_s27 + $0x28] sm:$0xff] }
  0x5b   : > { %v550_v25 = vld [vmem:[%s1540_s6 + $0x7b0] sm:$0xff]  ;;  %799 = vmatpush.msrb.mxu3 %v552_v21  ;;  %761 = vmatpush.msrb.mxu1 %v484_v23  ;;  %v548_v29 = vld [vmem:[%s1540_s6 + $0x7a0] sm:$0xff] }
  0x5c   : > { %v482_v27 = vld [vmem:[%s1540_s6 + $0x590] sm:$0xff]  ;;  %742 = vmatpush.msrb.mxu0 %v450_v22  ;;  %782 = vmatpush.msrb.mxu2 %v514_v24  ;;  %v480_v31 = vld [vmem:[%s1540_s6 + $0x580] sm:$0xff]  ;;  %v333_v24 = vld [vmem:[%s1540_s6 + $0xe8] sm:$0xff] }
  0x5d   : > { %800 = vmatpush.msrb.mxu3 %v550_v25  ;;  %v446_v30 = vld [vmem:[%s1540_s6 + $0x470] sm:$0xff]  ;;  %762 = vmatpush.msrb.mxu1 %v482_v27  ;;  %v444_v34 = vld [vmem:[%s1540_s6 + $0x460] sm:$0xff] }
  0x5e   : > { %743 = vmatpush.msrb.mxu0 %v448_v26  ;;  %v510_v32 = vld [vmem:[%s1540_s6 + $0x670] sm:$0xff]  ;;  %783 = vmatpush.msrb.mxu2 %v512_v28  ;;  %v508_v36 = vld [vmem:[%s1540_s6 + $0x660] sm:$0xff]  ;;  %v331_v28 = vld [vmem:[%s1540_s6 + $0xd8] sm:$0xff] }
  0x5f   : > { %v546_v33 = vld [vmem:[%s1540_s6 + $0x790] sm:$0xff]  ;;  %801 = vmatpush.msrb.mxu3 %v548_v29  ;;  %763 = vmatpush.msrb.mxu1 %v480_v31  ;;  %v544_v37 = vld [vmem:[%s1540_s6 + $0x780] sm:$0xff] }
  0x60   : > { %v478_v35 = vld [vmem:[%s1540_s6 + $0x570] sm:$0xff]  ;;  %744 = vmatpush.msrb.mxu0 %v446_v30  ;;  %784 = vmatpush.msrb.mxu2 %v510_v32  ;;  %v476_v39 = vld [vmem:[%s1540_s6 + $0x560] sm:$0xff]  ;;  %v329_v32 = vld [vmem:[%s1540_s6 + $0xc8] sm:$0xff] }
  0x61   : > { %802 = vmatpush.msrb.mxu3 %v546_v33  ;;  %v442_v38 = vld [vmem:[%s1540_s6 + $0x450] sm:$0xff]  ;;  %764 = vmatpush.msrb.mxu1 %v478_v35  ;;  %v440_v42 = vld [vmem:[%s1540_s6 + $0x440] sm:$0xff] }
  0x62   : > { %745 = vmatpush.msrb.mxu0 %v444_v34  ;;  %v506_v40 = vld [vmem:[%s1540_s6 + $0x650] sm:$0xff]  ;;  %785 = vmatpush.msrb.mxu2 %v508_v36  ;;  %v504_v44 = vld [vmem:[%s1540_s6 + $0x640] sm:$0xff]  ;;  %v327_v36 = vld [vmem:[%s1540_s6 + $0xb8] sm:$0xff] }
  0x63   : > { %v542_v41 = vld [vmem:[%s1540_s6 + $0x770] sm:$0xff]  ;;  %803 = vmatpush.msrb.mxu3 %v544_v37  ;;  %765 = vmatpush.msrb.mxu1 %v476_v39  ;;  %v540_v45 = vld [vmem:[%s1540_s6 + $0x760] sm:$0xff] }
  0x64   : > { %v474_v43 = vld [vmem:[%s1540_s6 + $0x550] sm:$0xff]  ;;  %746 = vmatpush.msrb.mxu0 %v442_v38  ;;  %786 = vmatpush.msrb.mxu2 %v506_v40  ;;  %v472_v47 = vld [vmem:[%s1540_s6 + $0x540] sm:$0xff]  ;;  %v325_v40 = vld [vmem:[%s1540_s6 + $0xa8] sm:$0xff] }
  0x65   : > { %804 = vmatpush.msrb.mxu3 %v542_v41  ;;  %v438_v46 = vld [vmem:[%s1540_s6 + $0x430] sm:$0xff]  ;;  %766 = vmatpush.msrb.mxu1 %v474_v43  ;;  %v436_v50 = vld [vmem:[%s1540_s6 + $0x420] sm:$0xff] }
  0x66   : > { %747 = vmatpush.msrb.mxu0 %v440_v42  ;;  %v502_v48 = vld [vmem:[%s1540_s6 + $0x630] sm:$0xff]  ;;  %787 = vmatpush.msrb.mxu2 %v504_v44  ;;  %v500_v52 = vld [vmem:[%s1540_s6 + $0x620] sm:$0xff]  ;;  %v323_v44 = vld [vmem:[%s1540_s6 + $0x98] sm:$0xff] }
  0x67   : > { %v538_v49 = vld [vmem:[%s1540_s6 + $0x750] sm:$0xff]  ;;  %805 = vmatpush.msrb.mxu3 %v540_v45  ;;  %767 = vmatpush.msrb.mxu1 %v472_v47  ;;  %v536_v53 = vld [vmem:[%s1540_s6 + $0x740] sm:$0xff] }
  0x68   : > { %v470_v51 = vld [vmem:[%s1540_s6 + $0x530] sm:$0xff]  ;;  %748 = vmatpush.msrb.mxu0 %v438_v46  ;;  %788 = vmatpush.msrb.mxu2 %v502_v48  ;;  %v1684_v54 = vld [vmem:[%s1563_s27 + $0x10] sm:$0xff]  ;;  %v321_v48 = vld [vmem:[%s1540_s6 + $0x88] sm:$0xff] }
  0x69   : > { %806 = vmatpush.msrb.mxu3 %v538_v49  ;;  %v434_v55 = vld [vmem:[%s1540_s6 + $0x410] sm:$0xff]  ;;  %768 = vmatpush.msrb.mxu1 %v470_v51  ;;  %v468_v56 = vld [vmem:[%s1540_s6 + $0x520] sm:$0xff] }
  0x6a   : > { %749 = vmatpush.msrb.mxu0 %v436_v50  ;;  %v498_v57 = vld [vmem:[%s1540_s6 + $0x610] sm:$0xff]  ;;  %789 = vmatpush.msrb.mxu2 %v500_v52  ;;  %v432_v60 = vld [vmem:[%s1540_s6 + $0x400] sm:$0xff]  ;;  %v319_v52 = vld [vmem:[%s1540_s6 + $0x78] sm:$0xff] }
  0x6b   : > { %807 = vmatpush.msrb.mxu3 %v536_v53  ;;  %v1690_v58 = vld [vmem:[%s1563_s27] sm:$0xff]  ;;  %712 = vmatmul.f32.vlgmr.msra.gmra.mxu2 %v1684_v54  ;;  %v496_v62 = vld [vmem:[%s1540_s6 + $0x600] sm:$0xff] }
  0x6c   : > { %750 = vmatpush.msrb.mxu0 %v434_v55  ;;  %v466_v61 = vld [vmem:[%s1540_s6 + $0x510] sm:$0xff]  ;;  %769 = vmatpush.msrb.mxu1 %v468_v56  ;;  %v464_v3 = vld [vmem:[%s1540_s6 + $0x500] sm:$0xff] }
  0x6d   : > { %790 = vmatpush.msrb.mxu2 %v498_v57  ;;  %v534_v63 = vld [vmem:[%s1540_s6 + $0x730] sm:$0xff]  ;;  %672 = vmatmul.f32.vlgmr.msra.gmra.mxu0 %v1690_v58  ;;  %v532_v4 = vld [vmem:[%s1540_s6 + $0x720] sm:$0xff]  ;;  %v317_v57 = vld [vmem:[%s1540_s6 + $0x68] sm:$0xff] }
  0x6e   : > { %732 = vmatmul.f32.vlgmr.msra.gmra.mxu3 %v1693_v59  ;;  %v590_v1 = vld [vmem:[%s1540_s6 + $0x8f0] sm:$0xff]  ;;  %751 = vmatpush.msrb.mxu0 %v432_v60  ;;  %v588_v5 = vld [vmem:[%s1540_s6 + $0x8e0] sm:$0xff] }
  0x6f   : > { %770 = vmatpush.msrb.mxu1 %v466_v61  ;;  %v654_v2 = vld [vmem:[%s1540_s6 + $0xaf0] sm:$0xff]  ;;  %791 = vmatpush.msrb.mxu2 %v496_v62  ;;  %v652_v7 = vld [vmem:[%s1540_s6 + $0xae0] sm:$0xff] }
  0x70   : > { %808 = vmatpush.msrb.mxu3 %v534_v63  ;;  %692 = vmatmul.f32.vlgmr.msra.gmra.mxu1 %v1703_v0  ;;  %v622_v6 = vld [vmem:[%s1540_s6 + $0x9f0] sm:$0xff]  ;;  %v1715_v9 = vld [vmem:[%s1563_s27 + $0x30] sm:$0xff]  ;;  %v315_v63 = vld [vmem:[%s1540_s6 + $0x58] sm:$0xff] }
  0x71   : > { %816 = vmatpush.msra.mxu0 %v590_v1  ;;  %856 = vmatpush.msra.mxu2 %v654_v2  ;;  %v530_v8 = vld [vmem:[%s1540_s6 + $0x710] sm:$0xff]  ;;  %v620_v11 = vld [vmem:[%s1540_s6 + $0x9e0] sm:$0xff] }
  0x72   : > { %771 = vmatpush.msrb.mxu1 %v464_v3  ;;  %809 = vmatpush.msrb.mxu3 %v532_v4  ;;  %v586_v10 = vld [vmem:[%s1540_s6 + $0x8d0] sm:$0xff]  ;;  %v528_v13 = vld [vmem:[%s1540_s6 + $0x700] sm:$0xff]  ;;  %v313_v4 = vld [vmem:[%s1540_s6 + $0x48] sm:$0xff] }
  0x73   : > { %817 = vmatpush.msra.mxu0 %v588_v5  ;;  %857 = vmatpush.msra.mxu2 %v652_v7  ;;  %v650_v12 = vld [vmem:[%s1540_s6 + $0xad0] sm:$0xff]  ;;  %v584_v16 = vld [vmem:[%s1540_s6 + $0x8c0] sm:$0xff] }
  0x74   : > { %836 = vmatpush.msra.mxu1 %v622_v6  ;;  %810 = vmatpush.msrb.mxu3 %v530_v8  ;;  %v1723_v14 = vld [vmem:[%s1563_s27 + $0x20] sm:$0xff]  ;;  %v648_v18 = vld [vmem:[%s1540_s6 + $0xac0] sm:$0xff]  ;;  %v311_v8 = vld [vmem:[%s1540_s6 + $0x38] sm:$0xff] }
  0x75   : > { %792 = vmatmul.f32.vlgmr.msrb.gmra.mxu2 %v1715_v9  ;;  %818 = vmatpush.msra.mxu0 %v586_v10  ;;  %v618_v17 = vld [vmem:[%s1540_s6 + $0x9d0] sm:$0xff]  ;;  %v616_v22 = vld [vmem:[%s1540_s6 + $0x9c0] sm:$0xff] }
  0x76   : > { %837 = vmatpush.msra.mxu1 %v620_v11  ;;  %858 = vmatpush.msra.mxu2 %v650_v12  ;;  %v582_v21 = vld [vmem:[%s1540_s6 + $0x8b0] sm:$0xff]  ;;  %v580_v25 = vld [vmem:[%s1540_s6 + $0x8a0] sm:$0xff]  ;;  %v367_v12 = vld [vmem:[%s1540_s6 + $0x1f8] sm:$0xff] }
  0x77   : > { %811 = vmatpush.msrb.mxu3 %v528_v13  ;;  %752 = vmatmul.f32.vlgmr.msrb.gmra.mxu0 %v1723_v14  ;;  %v646_v23 = vld [vmem:[%s1540_s6 + $0xab0] sm:$0xff]  ;;  %v644_v27 = vld [vmem:[%s1540_s6 + $0xaa0] sm:$0xff] }
  0x78   : > { %812 = vmatmul.f32.vlgmr.msrb.gmra.mxu3 %v1726_v15  ;;  %819 = vmatpush.msra.mxu0 %v584_v16  ;;  %v614_v26 = vld [vmem:[%s1540_s6 + $0x9b0] sm:$0xff]  ;;  %v612_v30 = vld [vmem:[%s1540_s6 + $0x9a0] sm:$0xff]  ;;  %v309_v16 = vld [vmem:[%s1540_s6 + $0x28] sm:$0xff] }
  0x79   : > { %838 = vmatpush.msra.mxu1 %v618_v17  ;;  %859 = vmatpush.msra.mxu2 %v648_v18  ;;  %v578_v29 = vld [vmem:[%s1540_s6 + $0x890] sm:$0xff]  ;;  %v576_v33 = vld [vmem:[%s1540_s6 + $0x880] sm:$0xff]  ;;  %v1797_v17 = vld [vmem:[%s1563_s27 + $0x48] sm:$0xff] }
  0x7a   : > { %876 = vmatpush.msra.mxu3 %v335_v19  ;;  %772 = vmatmul.f32.vlgmr.msrb.gmra.mxu1 %v1735_v20  ;;  %v642_v31 = vld [vmem:[%s1540_s6 + $0xa90] sm:$0xff]  ;;  %v640_v35 = vld [vmem:[%s1540_s6 + $0xa80] sm:$0xff]  ;;  %v365_v18 = vld [vmem:[%s1540_s6 + $0x1e8] sm:$0xff] }
  0x7b   : > { %820 = vmatpush.msra.mxu0 %v582_v21  ;;  %839 = vmatpush.msra.mxu1 %v616_v22  ;;  %v610_v34 = vld [vmem:[%s1540_s6 + $0x990] sm:$0xff]  ;;  %v608_v38 = vld [vmem:[%s1540_s6 + $0x980] sm:$0xff]  ;;  %v399_v19 = vld [vmem:[%s1540_s6 + $0x2f8] sm:$0xff] }
  0x7c   : > { %860 = vmatpush.msra.mxu2 %v646_v23  ;;  %877 = vmatpush.msra.mxu3 %v333_v24  ;;  %v574_v37 = vld [vmem:[%s1540_s6 + $0x870] sm:$0xff]  ;;  %v572_v41 = vld [vmem:[%s1540_s6 + $0x860] sm:$0xff]  ;;  %v307_v21 = vld [vmem:[%s1540_s6 + $0x18] sm:$0xff] }
  0x7d   : > { %821 = vmatpush.msra.mxu0 %v580_v25  ;;  %840 = vmatpush.msra.mxu1 %v614_v26  ;;  %v638_v39 = vld [vmem:[%s1540_s6 + $0xa70] sm:$0xff]  ;;  %v636_v43 = vld [vmem:[%s1540_s6 + $0xa60] sm:$0xff]  ;;  %v363_v22 = vld [vmem:[%s1540_s6 + $0x1d8] sm:$0xff] }
  0x7e   : > { %861 = vmatpush.msra.mxu2 %v644_v27  ;;  %878 = vmatpush.msra.mxu3 %v331_v28  ;;  %v606_v42 = vld [vmem:[%s1540_s6 + $0x970] sm:$0xff]  ;;  %v604_v46 = vld [vmem:[%s1540_s6 + $0x960] sm:$0xff]  ;;  %v431_v23 = vld [vmem:[%s1540_s6 + $0x3f8] sm:$0xff] }
  0x7f   : > { %822 = vmatpush.msra.mxu0 %v578_v29  ;;  %841 = vmatpush.msra.mxu1 %v612_v30  ;;  %v570_v45 = vld [vmem:[%s1540_s6 + $0x850] sm:$0xff]  ;;  %v568_v49 = vld [vmem:[%s1540_s6 + $0x840] sm:$0xff]  ;;  %v397_v24 = vld [vmem:[%s1540_s6 + $0x2e8] sm:$0xff] }
  0x80   : > { %862 = vmatpush.msra.mxu2 %v642_v31  ;;  %879 = vmatpush.msra.mxu3 %v329_v32  ;;  %v634_v47 = vld [vmem:[%s1540_s6 + $0xa50] sm:$0xff]  ;;  %v632_v51 = vld [vmem:[%s1540_s6 + $0xa40] sm:$0xff]  ;;  %v305_v25 = vld [vmem:[%s1540_s6 + $0x8] sm:$0xff] }
  0x81   : > { %823 = vmatpush.msra.mxu0 %v576_v33  ;;  %842 = vmatpush.msra.mxu1 %v610_v34  ;;  %v602_v50 = vld [vmem:[%s1540_s6 + $0x950] sm:$0xff]  ;;  %v600_v55 = vld [vmem:[%s1540_s6 + $0x940] sm:$0xff]  ;;  %v361_v26 = vld [vmem:[%s1540_s6 + $0x1c8] sm:$0xff] }
  0x82   : > { %863 = vmatpush.msra.mxu2 %v640_v35  ;;  %880 = vmatpush.msra.mxu3 %v327_v36  ;;  %v566_v53 = vld [vmem:[%s1540_s6 + $0x830] sm:$0xff]  ;;  %v564_v60 = vld [vmem:[%s1540_s6 + $0x820] sm:$0xff]  ;;  %v429_v27 = vld [vmem:[%s1540_s6 + $0x3e8] sm:$0xff] }
  0x83   : > { %824 = vmatpush.msra.mxu0 %v574_v37  ;;  %843 = vmatpush.msra.mxu1 %v608_v38  ;;  %v630_v56 = vld [vmem:[%s1540_s6 + $0xa30] sm:$0xff]  ;;  %v628_v62 = vld [vmem:[%s1540_s6 + $0xa20] sm:$0xff]  ;;  %v395_v28 = vld [vmem:[%s1540_s6 + $0x2d8] sm:$0xff] }
  0x84   : > { %864 = vmatpush.msra.mxu2 %v638_v39  ;;  %881 = vmatpush.msra.mxu3 %v325_v40  ;;  %v598_v61 = vld [vmem:[%s1540_s6 + $0x930] sm:$0xff]  ;;  %v596_v2 = vld [vmem:[%s1540_s6 + $0x920] sm:$0xff]  ;;  %v463_v29 = vld [vmem:[%s1540_s6 + $0x4f8] sm:$0xff] }
  0x85   : > { %825 = vmatpush.msra.mxu0 %v572_v41  ;;  %844 = vmatpush.msra.mxu1 %v606_v42  ;;  %v562_v1 = vld [vmem:[%s1540_s6 + $0x810] sm:$0xff]  ;;  %v560_v5 = vld [vmem:[%s1540_s6 + $0x800] sm:$0xff]  ;;  %v359_v30 = vld [vmem:[%s1540_s6 + $0x1b8] sm:$0xff] }
  0x86   : > { %865 = vmatpush.msra.mxu2 %v636_v43  ;;  %882 = vmatpush.msra.mxu3 %v323_v44  ;;  %v626_v3 = vld [vmem:[%s1540_s6 + $0xa10] sm:$0xff]  ;;  %v624_v7 = vld [vmem:[%s1540_s6 + $0xa00] sm:$0xff]  ;;  %v427_v31 = vld [vmem:[%s1540_s6 + $0x3d8] sm:$0xff] }
  0x87   : > { %826 = vmatpush.msra.mxu0 %v570_v45  ;;  %845 = vmatpush.msra.mxu1 %v604_v46  ;;  %v594_v6 = vld [vmem:[%s1540_s6 + $0x910] sm:$0xff]  ;;  %v1790_v11 = vld [vmem:[%s1563_s27 + $0x50] sm:$0xff]  ;;  %v393_v32 = vld [vmem:[%s1540_s6 + $0x2c8] sm:$0xff] }
  0x88   : > { %866 = vmatpush.msra.mxu2 %v634_v47  ;;  %883 = vmatpush.msra.mxu3 %v321_v48  ;;  %v1787_v10 = vld [vmem:[%s1563_s27 + $0x40] sm:$0xff]  ;;  %v592_v13 = vld [vmem:[%s1540_s6 + $0x900] sm:$0xff]  ;;  %v461_v33 = vld [vmem:[%s1540_s6 + $0x4e8] sm:$0xff] }
  0x89   : > { %827 = vmatpush.msra.mxu0 %v568_v49  ;;  %846 = vmatpush.msra.mxu1 %v602_v50  ;;  %v357_v34 = vld [vmem:[%s1540_s6 + $0x1a8] sm:$0xff]  ;;  %v391_v36 = vld [vmem:[%s1540_s6 + $0x2b8] sm:$0xff] }
  0x8a   : > { %867 = vmatpush.msra.mxu2 %v632_v51  ;;  %884 = vmatpush.msra.mxu3 %v319_v52  ;;  %v425_v35 = vld [vmem:[%s1540_s6 + $0x3c8] sm:$0xff]  ;;  %v459_v37 = vld [vmem:[%s1540_s6 + $0x4d8] sm:$0xff] }
  0x8b   : > { %828 = vmatpush.msra.mxu0 %v566_v53  ;;  %847 = vmatpush.msra.mxu1 %v600_v55  ;;  %v355_v38 = vld [vmem:[%s1540_s6 + $0x198] sm:$0xff]  ;;  %v389_v40 = vld [vmem:[%s1540_s6 + $0x2a8] sm:$0xff] }
  0x8c   : > { %868 = vmatpush.msra.mxu2 %v630_v56  ;;  %885 = vmatpush.msra.mxu3 %v317_v57  ;;  %v423_v39 = vld [vmem:[%s1540_s6 + $0x3b8] sm:$0xff]  ;;  %v457_v41 = vld [vmem:[%s1540_s6 + $0x4c8] sm:$0xff] }
  0x8d   : > { %829 = vmatpush.msra.mxu0 %v564_v60  ;;  %848 = vmatpush.msra.mxu1 %v598_v61  ;;  %v353_v42 = vld [vmem:[%s1540_s6 + $0x188] sm:$0xff]  ;;  %v387_v44 = vld [vmem:[%s1540_s6 + $0x298] sm:$0xff] }
  0x8e   : > { %869 = vmatpush.msra.mxu2 %v628_v62  ;;  %886 = vmatpush.msra.mxu3 %v315_v63  ;;  %v421_v43 = vld [vmem:[%s1540_s6 + $0x3a8] sm:$0xff]  ;;  %v455_v45 = vld [vmem:[%s1540_s6 + $0x4b8] sm:$0xff] }
  0x8f   : > { %830 = vmatpush.msra.mxu0 %v562_v1  ;;  %849 = vmatpush.msra.mxu1 %v596_v2  ;;  %v351_v46 = vld [vmem:[%s1540_s6 + $0x178] sm:$0xff]  ;;  %v385_v48 = vld [vmem:[%s1540_s6 + $0x288] sm:$0xff] }
  0x90   : > { %870 = vmatpush.msra.mxu2 %v626_v3  ;;  %887 = vmatpush.msra.mxu3 %v313_v4  ;;  %v419_v47 = vld [vmem:[%s1540_s6 + $0x398] sm:$0xff]  ;;  %v453_v49 = vld [vmem:[%s1540_s6 + $0x4a8] sm:$0xff] }
  0x91   : > { %831 = vmatpush.msra.mxu0 %v560_v5  ;;  %850 = vmatpush.msra.mxu1 %v594_v6  ;;  %v349_v50 = vld [vmem:[%s1540_s6 + $0x168] sm:$0xff]  ;;  %v383_v52 = vld [vmem:[%s1540_s6 + $0x278] sm:$0xff] }
  0x92   : > { %871 = vmatpush.msra.mxu2 %v624_v7  ;;  %888 = vmatpush.msra.mxu3 %v311_v8  ;;  %v417_v51 = vld [vmem:[%s1540_s6 + $0x388] sm:$0xff]  ;;  %v451_v53 = vld [vmem:[%s1540_s6 + $0x498] sm:$0xff] }
  0x93   : > { %832 = vmatmul.f32.vlgmr.msra.gmra.mxu0 %v1787_v10  ;;  %872 = vmatmul.f32.vlgmr.msra.gmra.mxu2 %v1790_v11  ;;  %v347_v55 = vld [vmem:[%s1540_s6 + $0x158] sm:$0xff]  ;;  %v381_v57 = vld [vmem:[%s1540_s6 + $0x268] sm:$0xff] }
  0x94   : > { %896 = vmatpush.msrb.mxu0 %v367_v12  ;;  %851 = vmatpush.msra.mxu1 %v592_v13  ;;  %v415_v56 = vld [vmem:[%s1540_s6 + $0x378] sm:$0xff]  ;;  %v449_v60 = vld [vmem:[%s1540_s6 + $0x488] sm:$0xff] }
  0x95   : > { %889 = vmatpush.msra.mxu3 %v309_v16  ;;  %852 = vmatmul.f32.vlgmr.msra.gmra.mxu1 %v1797_v17  ;;  %v345_v61 = vld [vmem:[%s1540_s6 + $0x148] sm:$0xff]  ;;  %v379_v63 = vld [vmem:[%s1540_s6 + $0x258] sm:$0xff] }
  0x96   : > { %897 = vmatpush.msrb.mxu0 %v365_v18  ;;  %916 = vmatpush.msrb.mxu1 %v399_v19  ;;  %v413_v62 = vld [vmem:[%s1540_s6 + $0x368] sm:$0xff]  ;;  %v447_v1 = vld [vmem:[%s1540_s6 + $0x478] sm:$0xff] }
  0x97   : > { %890 = vmatpush.msra.mxu3 %v307_v21  ;;  %936 = vmatpush.msrb.mxu2 %v431_v23  ;;  %v343_v2 = vld [vmem:[%s1540_s6 + $0x138] sm:$0xff]  ;;  %v377_v4 = vld [vmem:[%s1540_s6 + $0x248] sm:$0xff] }
  0x98   : > { %898 = vmatpush.msrb.mxu0 %v363_v22  ;;  %917 = vmatpush.msrb.mxu1 %v397_v24  ;;  %v411_v3 = vld [vmem:[%s1540_s6 + $0x358] sm:$0xff]  ;;  %v445_v5 = vld [vmem:[%s1540_s6 + $0x468] sm:$0xff] }
  0x99   : > { %891 = vmatpush.msra.mxu3 %v305_v25  ;;  %937 = vmatpush.msrb.mxu2 %v429_v27  ;;  %v341_v6 = vld [vmem:[%s1540_s6 + $0x128] sm:$0xff]  ;;  %v375_v8 = vld [vmem:[%s1540_s6 + $0x238] sm:$0xff] }
  0x9a   : > { %899 = vmatpush.msrb.mxu0 %v361_v26  ;;  %918 = vmatpush.msrb.mxu1 %v395_v28  ;;  %v409_v7 = vld [vmem:[%s1540_s6 + $0x348] sm:$0xff]  ;;  %v443_v12 = vld [vmem:[%s1540_s6 + $0x458] sm:$0xff] }
  0x9b   : > { %956 = vmatpush.msrb.mxu3 %v463_v29  ;;  %938 = vmatpush.msrb.mxu2 %v427_v31  ;;  %v339_v13 = vld [vmem:[%s1540_s6 + $0x118] sm:$0xff]  ;;  %v373_v18 = vld [vmem:[%s1540_s6 + $0x228] sm:$0xff] }
  0x9c   : > { %900 = vmatpush.msrb.mxu0 %v359_v30  ;;  %919 = vmatpush.msrb.mxu1 %v393_v32  ;;  %v407_v16 = vld [vmem:[%s1540_s6 + $0x338] sm:$0xff]  ;;  %v441_v19 = vld [vmem:[%s1540_s6 + $0x448] sm:$0xff] }
  0x9d   : > { %957 = vmatpush.msrb.mxu3 %v461_v33  ;;  %939 = vmatpush.msrb.mxu2 %v425_v35  ;;  %v337_v21 = vld [vmem:[%s1540_s6 + $0x108] sm:$0xff]  ;;  %v371_v23 = vld [vmem:[%s1540_s6 + $0x218] sm:$0xff] }
  0x9e   : > { %901 = vmatpush.msrb.mxu0 %v357_v34  ;;  %920 = vmatpush.msrb.mxu1 %v391_v36  ;;  %v405_v22 = vld [vmem:[%s1540_s6 + $0x328] sm:$0xff]  ;;  %v439_v24 = vld [vmem:[%s1540_s6 + $0x438] sm:$0xff] }
  0x9f   : > { %958 = vmatpush.msrb.mxu3 %v459_v37  ;;  %940 = vmatpush.msrb.mxu2 %v423_v39  ;;  %v495_v25 = vld [vmem:[%s1540_s6 + $0x5f8] sm:$0xff]  ;;  %v369_v27 = vld [vmem:[%s1540_s6 + $0x208] sm:$0xff] }
  0xa0   : > { %902 = vmatpush.msrb.mxu0 %v355_v38  ;;  %921 = vmatpush.msrb.mxu1 %v389_v40  ;;  %v403_v26 = vld [vmem:[%s1540_s6 + $0x318] sm:$0xff]  ;;  %v437_v28 = vld [vmem:[%s1540_s6 + $0x428] sm:$0xff] }
  0xa1   : > { %959 = vmatpush.msrb.mxu3 %v457_v41  ;;  %941 = vmatpush.msrb.mxu2 %v421_v43  ;;  %v493_v29 = vld [vmem:[%s1540_s6 + $0x5e8] sm:$0xff]  ;;  %v527_v30 = vld [vmem:[%s1540_s6 + $0x6f8] sm:$0xff] }
  0xa2   : > { %903 = vmatpush.msrb.mxu0 %v353_v42  ;;  %922 = vmatpush.msrb.mxu1 %v387_v44  ;;  %v401_v31 = vld [vmem:[%s1540_s6 + $0x308] sm:$0xff]  ;;  %v435_v32 = vld [vmem:[%s1540_s6 + $0x418] sm:$0xff] }
  0xa3   : > { %960 = vmatpush.msrb.mxu3 %v455_v45  ;;  %942 = vmatpush.msrb.mxu2 %v419_v47  ;;  %v491_v33 = vld [vmem:[%s1540_s6 + $0x5d8] sm:$0xff]  ;;  %v525_v34 = vld [vmem:[%s1540_s6 + $0x6e8] sm:$0xff] }
  0xa4   : > { %904 = vmatpush.msrb.mxu0 %v351_v46  ;;  %923 = vmatpush.msrb.mxu1 %v385_v48  ;;  %v559_v35 = vld [vmem:[%s1540_s6 + $0x7f8] sm:$0xff]  ;;  %v433_v36 = vld [vmem:[%s1540_s6 + $0x408] sm:$0xff] }
  0xa5   : > { %961 = vmatpush.msrb.mxu3 %v453_v49  ;;  %943 = vmatpush.msrb.mxu2 %v417_v51  ;;  %v489_v37 = vld [vmem:[%s1540_s6 + $0x5c8] sm:$0xff]  ;;  %v523_v38 = vld [vmem:[%s1540_s6 + $0x6d8] sm:$0xff] }
  0xa6   : > { %905 = vmatpush.msrb.mxu0 %v349_v50  ;;  %924 = vmatpush.msrb.mxu1 %v383_v52  ;;  %v557_v39 = vld [vmem:[%s1540_s6 + $0x7e8] sm:$0xff]  ;;  %v591_v40 = vld [vmem:[%s1540_s6 + $0x8f8] sm:$0xff] }
  0xa7   : > { %962 = vmatpush.msrb.mxu3 %v451_v53  ;;  %944 = vmatpush.msrb.mxu2 %v415_v56  ;;  %v487_v41 = vld [vmem:[%s1540_s6 + $0x5b8] sm:$0xff]  ;;  %v521_v42 = vld [vmem:[%s1540_s6 + $0x6c8] sm:$0xff] }
  0xa8   : > { %906 = vmatpush.msrb.mxu0 %v347_v55  ;;  %925 = vmatpush.msrb.mxu1 %v381_v57  ;;  %v555_v43 = vld [vmem:[%s1540_s6 + $0x7d8] sm:$0xff]  ;;  %v589_v44 = vld [vmem:[%s1540_s6 + $0x8e8] sm:$0xff] }
  0xa9   : > { %963 = vmatpush.msrb.mxu3 %v449_v60  ;;  %945 = vmatpush.msrb.mxu2 %v413_v62  ;;  %v485_v45 = vld [vmem:[%s1540_s6 + $0x5a8] sm:$0xff]  ;;  %v519_v46 = vld [vmem:[%s1540_s6 + $0x6b8] sm:$0xff] }
  0xaa   : > { %907 = vmatpush.msrb.mxu0 %v345_v61  ;;  %926 = vmatpush.msrb.mxu1 %v379_v63  ;;  %v553_v47 = vld [vmem:[%s1540_s6 + $0x7c8] sm:$0xff]  ;;  %v483_v48 = vld [vmem:[%s1540_s6 + $0x598] sm:$0xff] }
  0xab   : > { %964 = vmatpush.msrb.mxu3 %v447_v1  ;;  %946 = vmatpush.msrb.mxu2 %v411_v3  ;;  %v517_v49 = vld [vmem:[%s1540_s6 + $0x6a8] sm:$0xff]  ;;  %v551_v50 = vld [vmem:[%s1540_s6 + $0x7b8] sm:$0xff] }
  0xac   : > { %908 = vmatpush.msrb.mxu0 %v343_v2  ;;  %927 = vmatpush.msrb.mxu1 %v377_v4  ;;  %v585_v51 = vld [vmem:[%s1540_s6 + $0x8c8] sm:$0xff]  ;;  %v515_v53 = vld [vmem:[%s1540_s6 + $0x698] sm:$0xff] }
  0xad   : > { %965 = vmatpush.msrb.mxu3 %v445_v5  ;;  %947 = vmatpush.msrb.mxu2 %v409_v7  ;;  %v481_v52 = vld [vmem:[%s1540_s6 + $0x588] sm:$0xff]  ;;  %v583_v56 = vld [vmem:[%s1540_s6 + $0x8b8] sm:$0xff] }
  0xae   : > { %909 = vmatpush.msrb.mxu0 %v341_v6  ;;  %928 = vmatpush.msrb.mxu1 %v375_v8  ;;  %v549_v55 = vld [vmem:[%s1540_s6 + $0x7a8] sm:$0xff]  ;;  %v479_v57 = vld [vmem:[%s1540_s6 + $0x578] sm:$0xff] }
  0xaf   : > { %966 = vmatpush.msrb.mxu3 %v443_v12  ;;  %948 = vmatpush.msrb.mxu2 %v407_v16  ;;  %v513_v60 = vld [vmem:[%s1540_s6 + $0x688] sm:$0xff]  ;;  %v547_v61 = vld [vmem:[%s1540_s6 + $0x798] sm:$0xff] }
  0xb0   : > { %910 = vmatpush.msrb.mxu0 %v339_v13  ;;  %929 = vmatpush.msrb.mxu1 %v373_v18  ;;  %v581_v62 = vld [vmem:[%s1540_s6 + $0x8a8] sm:$0xff]  ;;  %v511_v1 = vld [vmem:[%s1540_s6 + $0x678] sm:$0xff] }
  0xb1   : > { %967 = vmatpush.msrb.mxu3 %v441_v19  ;;  %949 = vmatpush.msrb.mxu2 %v405_v22  ;;  %v477_v63 = vld [vmem:[%s1540_s6 + $0x568] sm:$0xff]  ;;  %v579_v3 = vld [vmem:[%s1540_s6 + $0x898] sm:$0xff] }
  0xb2   : > { %911 = vmatpush.msrb.mxu0 %v337_v21  ;;  %930 = vmatpush.msrb.mxu1 %v371_v23  ;;  %v545_v2 = vld [vmem:[%s1540_s6 + $0x788] sm:$0xff]  ;;  %v475_v4 = vld [vmem:[%s1540_s6 + $0x558] sm:$0xff] }
  0xb3   : > { %968 = vmatpush.msrb.mxu3 %v439_v24  ;;  %950 = vmatpush.msrb.mxu2 %v403_v26  ;;  %v509_v5 = vld [vmem:[%s1540_s6 + $0x668] sm:$0xff]  ;;  %v543_v6 = vld [vmem:[%s1540_s6 + $0x778] sm:$0xff] }
  0xb4   : > { %976 = vmatpush.msra.mxu0 %v495_v25  ;;  %931 = vmatpush.msrb.mxu1 %v369_v27  ;;  %v577_v7 = vld [vmem:[%s1540_s6 + $0x888] sm:$0xff]  ;;  %v507_v12 = vld [vmem:[%s1540_s6 + $0x658] sm:$0xff] }
  0xb5   : > { %969 = vmatpush.msrb.mxu3 %v437_v28  ;;  %951 = vmatpush.msrb.mxu2 %v401_v31  ;;  %v473_v8 = vld [vmem:[%s1540_s6 + $0x548] sm:$0xff]  ;;  %v575_v16 = vld [vmem:[%s1540_s6 + $0x878] sm:$0xff] }
  0xb6   : > { %977 = vmatpush.msra.mxu0 %v493_v29  ;;  %996 = vmatpush.msra.mxu1 %v527_v30  ;;  %v541_v13 = vld [vmem:[%s1540_s6 + $0x768] sm:$0xff]  ;;  %v471_v18 = vld [vmem:[%s1540_s6 + $0x538] sm:$0xff] }
  0xb7   : > { %970 = vmatpush.msrb.mxu3 %v435_v32  ;;  %1016 = vmatpush.msra.mxu2 %v559_v35  ;;  %v505_v19 = vld [vmem:[%s1540_s6 + $0x648] sm:$0xff]  ;;  %v539_v21 = vld [vmem:[%s1540_s6 + $0x758] sm:$0xff] }
  0xb8   : > { %978 = vmatpush.msra.mxu0 %v491_v33  ;;  %997 = vmatpush.msra.mxu1 %v525_v34  ;;  %v573_v22 = vld [vmem:[%s1540_s6 + $0x868] sm:$0xff]  ;;  %v503_v24 = vld [vmem:[%s1540_s6 + $0x638] sm:$0xff] }
  0xb9   : > { %971 = vmatpush.msrb.mxu3 %v433_v36  ;;  %1017 = vmatpush.msra.mxu2 %v557_v39  ;;  %v469_v23 = vld [vmem:[%s1540_s6 + $0x528] sm:$0xff]  ;;  %v571_v26 = vld [vmem:[%s1540_s6 + $0x858] sm:$0xff] }
  0xba   : > { %892 = vmatmul.f32.vlgmr.msra.gmra.mxu3 %v1690_v58  ;;  %979 = vmatpush.msra.mxu0 %v489_v37  ;;  %v587_v58 = vld [vmem:[%s1540_s6 + $0x8d8] sm:$0xff]  ;;  %v537_v25 = vld [vmem:[%s1540_s6 + $0x748] sm:$0xff] }
  0xbb   : > { %998 = vmatpush.msra.mxu1 %v523_v38  ;;  %1036 = vmatpush.msra.mxu3 %v591_v40  ;;  %v467_v27 = vld [vmem:[%s1540_s6 + $0x518] sm:$0xff]  ;;  %v501_v28 = vld [vmem:[%s1540_s6 + $0x628] sm:$0xff] }
  0xbc   : > { %980 = vmatpush.msra.mxu0 %v487_v41  ;;  %1018 = vmatpush.msra.mxu2 %v555_v43  ;;  %v535_v29 = vld [vmem:[%s1540_s6 + $0x738] sm:$0xff]  ;;  %v569_v30 = vld [vmem:[%s1540_s6 + $0x848] sm:$0xff] }
  0xbd   : > { %999 = vmatpush.msra.mxu1 %v521_v42  ;;  %1037 = vmatpush.msra.mxu3 %v589_v44  ;;  %v465_v31 = vld [vmem:[%s1540_s6 + $0x508] sm:$0xff]  ;;  %v499_v32 = vld [vmem:[%s1540_s6 + $0x618] sm:$0xff] }
  0xbe   : > { %981 = vmatpush.msra.mxu0 %v485_v45  ;;  %1019 = vmatpush.msra.mxu2 %v553_v47  ;;  %v533_v33 = vld [vmem:[%s1540_s6 + $0x728] sm:$0xff]  ;;  %v567_v34 = vld [vmem:[%s1540_s6 + $0x838] sm:$0xff] }
  0xbf   : > { %1000 = vmatpush.msra.mxu1 %v519_v46  ;;  %1038 = vmatpush.msra.mxu3 %v587_v58  ;;  %v623_v35 = vld [vmem:[%s1540_s6 + $0x9f8] sm:$0xff]  ;;  %v565_v37 = vld [vmem:[%s1540_s6 + $0x828] sm:$0xff] }
  0xc0   : > { %982 = vmatpush.msra.mxu0 %v483_v48  ;;  %1020 = vmatpush.msra.mxu2 %v551_v50  ;;  %v531_v36 = vld [vmem:[%s1540_s6 + $0x718] sm:$0xff]  ;;  %v621_v38 = vld [vmem:[%s1540_s6 + $0x9e8] sm:$0xff] }
  0xc1   : > { %1001 = vmatpush.msra.mxu1 %v517_v49  ;;  %1039 = vmatpush.msra.mxu3 %v585_v51  ;;  %v529_v39 = vld [vmem:[%s1540_s6 + $0x708] sm:$0xff]  ;;  %v619_v40 = vld [vmem:[%s1540_s6 + $0x9d8] sm:$0xff] }
  0xc2   : > { %983 = vmatpush.msra.mxu0 %v481_v52  ;;  %1021 = vmatpush.msra.mxu2 %v549_v55  ;;  %v653_v41 = vld [vmem:[%s1540_s6 + $0xae8] sm:$0xff]  ;;  %v651_v43 = vld [vmem:[%s1540_s6 + $0xad8] sm:$0xff] }
  0xc3   : > { %1002 = vmatpush.msra.mxu1 %v515_v53  ;;  %1040 = vmatpush.msra.mxu3 %v583_v56  ;;  %v561_v42 = vld [vmem:[%s1540_s6 + $0x808] sm:$0xff]  ;;  %v615_v44 = vld [vmem:[%s1540_s6 + $0x9b8] sm:$0xff] }
  0xc4   : > { %984 = vmatpush.msra.mxu0 %v479_v57  ;;  %1022 = vmatpush.msra.mxu2 %v547_v61  ;;  %v649_v45 = vld [vmem:[%s1540_s6 + $0xac8] sm:$0xff]  ;;  %v647_v46 = vld [vmem:[%s1540_s6 + $0xab8] sm:$0xff] }
  0xc5   : > { %1003 = vmatpush.msra.mxu1 %v513_v60  ;;  %1041 = vmatpush.msra.mxu3 %v581_v62  ;;  %v611_v47 = vld [vmem:[%s1540_s6 + $0x998] sm:$0xff]  ;;  %v605_v49 = vld [vmem:[%s1540_s6 + $0x968] sm:$0xff] }
  0xc6   : > { %985 = vmatpush.msra.mxu0 %v477_v63  ;;  %1023 = vmatpush.msra.mxu2 %v545_v2  ;;  %v643_v58 = vld [vmem:[%s1540_s6 + $0xa98] sm:$0xff]  ;;  %v637_v52 = vld [vmem:[%s1540_s6 + $0xa68] sm:$0xff] }
  0xc7   : > { %1004 = vmatpush.msra.mxu1 %v511_v1  ;;  %1042 = vmatpush.msra.mxu3 %v579_v3  ;;  %v607_v48 = vld [vmem:[%s1540_s6 + $0x978] sm:$0xff]  ;;  %v601_v53 = vld [vmem:[%s1540_s6 + $0x948] sm:$0xff] }
  0xc8   : > { %986 = vmatpush.msra.mxu0 %v475_v4  ;;  %1024 = vmatpush.msra.mxu2 %v543_v6  ;;  %v639_v50 = vld [vmem:[%s1540_s6 + $0xa78] sm:$0xff]  ;;  %v633_v57 = vld [vmem:[%s1540_s6 + $0xa48] sm:$0xff] }
  0xc9   : > { %1005 = vmatpush.msra.mxu1 %v509_v5  ;;  %1043 = vmatpush.msra.mxu3 %v577_v7  ;;  %v603_v51 = vld [vmem:[%s1540_s6 + $0x958] sm:$0xff]  ;;  %v597_v60 = vld [vmem:[%s1540_s6 + $0x928] sm:$0xff] }
  0xca   : > { %987 = vmatpush.msra.mxu0 %v473_v8  ;;  %1025 = vmatpush.msra.mxu2 %v541_v13  ;;  %v635_v55 = vld [vmem:[%s1540_s6 + $0xa58] sm:$0xff]  ;;  %v629_v63 = vld [vmem:[%s1540_s6 + $0xa28] sm:$0xff] }
  0xcb   : > { %1006 = vmatpush.msra.mxu1 %v507_v12  ;;  %1044 = vmatpush.msra.mxu3 %v575_v16  ;;  %v599_v56 = vld [vmem:[%s1540_s6 + $0x938] sm:$0xff]  ;;  %v593_v1 = vld [vmem:[%s1540_s6 + $0x908] sm:$0xff] }
  0xcc   : > { %988 = vmatpush.msra.mxu0 %v471_v18  ;;  %1026 = vmatpush.msra.mxu2 %v539_v21  ;;  %v631_v61 = vld [vmem:[%s1540_s6 + $0xa38] sm:$0xff]  ;;  %v625_v4 = vld [vmem:[%s1540_s6 + $0xa08] sm:$0xff] }
  0xcd   : > { %1007 = vmatpush.msra.mxu1 %v505_v19  ;;  %1045 = vmatpush.msra.mxu3 %v573_v22  ;;  %v595_v62 = vld [vmem:[%s1540_s6 + $0x918] sm:$0xff] }
  0xce   : > { %989 = vmatpush.msra.mxu0 %v469_v23  ;;  %1027 = vmatpush.msra.mxu2 %v537_v25  ;;  %v627_v2 = vld [vmem:[%s1540_s6 + $0xa18] sm:$0xff] }
  0xcf   : > { %1008 = vmatpush.msra.mxu1 %v503_v24  ;;  %1046 = vmatpush.msra.mxu3 %v571_v26 }
  0xd0   : > { %952 = vmatmul.f32.vlgmr.msrb.gmra.mxu2 %v1693_v59  ;;  %990 = vmatpush.msra.mxu0 %v467_v27  ;;  %v497_v59 = vld [vmem:[%s1540_s6 + $0x608] sm:$0xff] }
  0xd1   : > { %1009 = vmatpush.msra.mxu1 %v501_v28  ;;  %1028 = vmatpush.msra.mxu2 %v535_v29  ;;  %v291_v29 = vld [vmem:[#allocation2] sm:$0xff] }
  0xd2   : > { %1047 = vmatpush.msra.mxu3 %v569_v30  ;;  %912 = vmatmul.f32.vlgmr.msrb.gmra.mxu0 %v1703_v0  ;;  %v655_v0 = vld [vmem:[%s1540_s6 + $0xaf8] sm:$0xff] }
  0xd3   : > { %972 = vmatmul.f32.vlgmr.msrb.gmra.mxu3 %v1723_v14  ;;  %991 = vmatpush.msra.mxu0 %v465_v31  ;;  %v563_v14 = vld [vmem:[%s1540_s6 + $0x818] sm:$0xff] }
  0xd4   : > { %1010 = vmatpush.msra.mxu1 %v499_v32  ;;  %1029 = vmatpush.msra.mxu2 %v533_v33 }
  0xd5   : > { %1048 = vmatpush.msra.mxu3 %v567_v34  ;;  %932 = vmatmul.f32.vlgmr.msrb.gmra.mxu1 %v1684_v54  ;;  %v617_v54 = vld [vmem:[%s1540_s6 + $0x9c8] sm:$0xff] }
  0xd6   : > { %1056 = vmatpush.msrb.mxu0 %v623_v35  ;;  %1011 = vmatpush.msra.mxu1 %v497_v59 }
  0xd7   : > { %1030 = vmatpush.msra.mxu2 %v531_v36  ;;  %1049 = vmatpush.msra.mxu3 %v565_v37 }
  0xd8   : > { %1057 = vmatpush.msrb.mxu0 %v621_v38  ;;  %1076 = vmatpush.msrb.mxu1 %v655_v0 }
  0xd9   : > { %1031 = vmatpush.msra.mxu2 %v529_v39  ;;  %1050 = vmatpush.msra.mxu3 %v563_v14 }
  0xda   : > { %1032 = vmatmul.f32.vlgmr.msra.gmra.mxu2 %v1726_v15  ;;  %1058 = vmatpush.msrb.mxu0 %v619_v40  ;;  %v613_v15 = vld [vmem:[%s1540_s6 + $0x9a8] sm:$0xff] }
  0xdb   : > { %1077 = vmatpush.msrb.mxu1 %v653_v41  ;;  %1051 = vmatpush.msra.mxu3 %v561_v42 }
  0xdc   : > { %992 = vmatmul.f32.vlgmr.msra.gmra.mxu0 %v1735_v20  ;;  %1052 = vmatmul.f32.vlgmr.msra.gmra.mxu3 %v1787_v10  ;;  %v645_v20 = vld [vmem:[%s1540_s6 + $0xaa8] sm:$0xff] }
  0xdd   : > { %1059 = vmatpush.msrb.mxu0 %v617_v54  ;;  %1078 = vmatpush.msrb.mxu1 %v651_v43  ;;  %v609_v10 = vld [vmem:[%s1540_s6 + $0x988] sm:$0xff] }
  0xde   : > { %1012 = vmatmul.f32.vlgmr.msra.gmra.mxu1 %v1715_v9  ;;  %v641_v9 = vld [vmem:[%s1540_s6 + $0xa88] sm:$0xff] }
  0xdf   : > { %1060 = vmatpush.msrb.mxu0 %v615_v44  ;;  %1079 = vmatpush.msrb.mxu1 %v649_v45 }
  0xe1   : > { %1061 = vmatpush.msrb.mxu0 %v613_v15  ;;  %1080 = vmatpush.msrb.mxu1 %v647_v46  ;;  %v292_v46 = vld [vmem:[#allocation2 + $0x8] sm:$0xff] }
  0xe3   : > { %1062 = vmatpush.msrb.mxu0 %v611_v47  ;;  %1081 = vmatpush.msrb.mxu1 %v645_v20 }
  0xe5   : > { %1063 = vmatpush.msrb.mxu0 %v609_v10  ;;  %1082 = vmatpush.msrb.mxu1 %v643_v58 }
  0xe7   : > { %1064 = vmatpush.msrb.mxu0 %v607_v48  ;;  %1083 = vmatpush.msrb.mxu1 %v641_v9 }
  0xe9   : > { %1065 = vmatpush.msrb.mxu0 %v605_v49  ;;  %1084 = vmatpush.msrb.mxu1 %v639_v50 }
  0xea   : > { %v673_v5 = vpop.f32.mrf.mxu0 }
  0xeb   : > { %1066 = vmatpush.msrb.mxu0 %v603_v51  ;;  %1085 = vmatpush.msrb.mxu1 %v637_v52 }
  0xed   : > { %1067 = vmatpush.msrb.mxu0 %v601_v53  ;;  %1086 = vmatpush.msrb.mxu1 %v635_v55  ;;  %v693_v3 = vpop.f32.mrf.mxu1 }
  0xee   : > { %v694_v6 = vadd.f32 %v693_v3, %v673_v5  ;;  %v713_v7 = vpop.f32.mrf.mxu2 }
  0xef   : > { %1068 = vmatpush.msrb.mxu0 %v599_v56  ;;  %1087 = vmatpush.msrb.mxu1 %v633_v57 }
  0xf0   : > { %v714_v8 = vadd.f32 %v713_v7, %v694_v6 }
  0xf1   : > { %1069 = vmatpush.msrb.mxu0 %v597_v60  ;;  %1088 = vmatpush.msrb.mxu1 %v631_v61  ;;  %v733_v12 = vpop.f32.mrf.mxu3 }
  0xf2   : > { %v734_v13 = vadd.f32 %v733_v12, %v714_v8 }
  0xf3   : > { %1070 = vmatpush.msrb.mxu0 %v595_v62  ;;  %1089 = vmatpush.msrb.mxu1 %v629_v63 }
  0xf4   : > { %v753_v16 = vpop.f32.mrf.mxu0 }
  0xf5   : > { %1071 = vmatpush.msrb.mxu0 %v593_v1  ;;  %1090 = vmatpush.msrb.mxu1 %v627_v2  ;;  %v754_v18 = vadd.f32 %v753_v16, %v734_v13 }
  0xf6   : > { %1072 = vmatmul.f32.vlgmr.msrb.gmra.mxu0 %v1797_v17 }
  0xf7   : > { %1091 = vmatpush.msrb.mxu1 %v625_v4  ;;  %v773_v19 = vpop.f32.mrf.mxu1 }
  0xf8   : > { %1092 = vmatmul.f32.vlgmr.msrb.gmra.mxu1 %v1790_v11  ;;  %v774_v21 = vadd.f32 %v773_v19, %v754_v18  ;;  %v793_v22 = vpop.f32.mrf.mxu2 }
  0xfa   : > { %v794_v23 = vadd.f32 %v793_v22, %v774_v21 }
  0xfb   : > { %v813_v24 = vpop.f32.mrf.mxu3 }
  0xfc   : > { %v814_v25 = vadd.f32 %v813_v24, %v794_v23 }
 0x110   : > { %v833_v26 = vpop.f32.mrf.mxu0 }
 0x111   : > { %v834_v27 = vadd.f32 %v833_v26, %v814_v25 }
 0x112   : > { %v853_v17 = vpop.f32.mrf.mxu1 }
 0x113   : > { %v854_v28 = vadd.f32 %v853_v17, %v834_v27 }
 0x116   : > { %v873_v30 = vpop.f32.mrf.mxu2 }
 0x117   : > { %v874_v31 = vadd.f32 %v873_v30, %v854_v28 }
 0x119   : > { %v1096_v11 = vadd.f32 %v874_v31, %v291_v29 }
 0x11b   : > { %1098 = vst [vmem:[#allocation2] sm:$0xff] %v1096_v11 }
 0x13d   : > { %v893_v33 = vpop.f32.mrf.mxu3 }
 0x14f   : > { %v913_v32 = vpop.f32.mrf.mxu0 }
 0x150   : > { %v914_v34 = vadd.f32 %v913_v32, %v893_v33 }
 0x152   : > { %v933_v35 = vpop.f32.mrf.mxu1 }
 0x153   : > { %v934_v59 = vadd.f32 %v933_v35, %v914_v34  ;;  %v953_v36 = vpop.f32.mrf.mxu2 }
 0x155   : > { %v954_v37 = vadd.f32 %v953_v36, %v934_v59 }
 0x156   : > { %v973_v38 = vpop.f32.mrf.mxu3 }
 0x157   : > { %v974_v0 = vadd.f32 %v973_v38, %v954_v37 }
 0x159   : > { %v993_v39 = vpop.f32.mrf.mxu0 }
 0x15a   : > { %v994_v14 = vadd.f32 %v993_v39, %v974_v0 }
 0x15b   : > { %v1013_v40 = vpop.f32.mrf.mxu1 }
 0x15c   : > { %v1014_v41 = vadd.f32 %v1013_v40, %v994_v14 }
 0x15d   : > { %v1033_v42 = vpop.f32.mrf.mxu2 }
 0x15e   : > { %v1034_v54 = vadd.f32 %v1033_v42, %v1014_v41 }
 0x15f   : > { %v1053_v43 = vpop.f32.mrf.mxu3 }
 0x160   : > { %v1054_v44 = vadd.f32 %v1053_v43, %v1034_v54 }
 0x173   : > { %v1073_v45 = vpop.f32.mrf.mxu0 }
 0x174   : > { %v1074_v15 = vadd.f32 %v1073_v45, %v1054_v44 }
 0x175   : > { %v1093_v47 = vpop.f32.mrf.mxu1 }
 0x176   : > { %v1094_v20 = vadd.f32 %v1093_v47, %v1074_v15  ;;  %1103 = sbr.rel (%p1259_p3) target bundleno = 391 (0x187), region = 44 }
 0x178   : > { %v1097_v10 = vadd.f32 %v1094_v20, %v292_v46 }
 0x17a   : > { %1099 = vst [vmem:[#allocation2 + $0x8] sm:$0xff] %v1097_v10 }
 0x17b   : > { %v1104_v58 = vld [vmem:[#allocation2] sm:$0xff] }
 0x17c   : > { %v1106_v48 = vld [vmem:[%s273_s9] sm:$0x3] }
 0x17d   : > { %v1108_v49 = vperm.slane %v1106_v48, 0  ;;  %v1109_v50 = vperm.slane %v1106_v48, 1 }
 0x17f   : > { %v1112_v51 = vadd.f32 %v1108_v49, %v1104_v58 }
 0x181   : > { %v1105_v9 = vld [vmem:[#allocation2 + $0x8] sm:$0xff]  ;;  %v1114_v53 = vmax.f32 %v1112_v51, 0.0 }
 0x182   : > { %v1113_v52 = vadd.f32 %v1109_v50, %v1105_v9 }
 0x183   : > { %1116 = vst [vmem:[%s1558_s20] sm:$0xff] %v1114_v53 }
 0x184   : > { %v1115_v55 = vmax.f32 %v1113_v52, 0.0 }
 0x186   : > { %1117 = vst [vmem:[%s1558_s20 + $0x8] sm:$0xff] %v1115_v55 }
 0x187 PF: > { %s16_s19 = sadd.s32 1, %s1436_s19   ;;  %s2013_s25 = sld [smem:[#allocation6_spill]] }
 0x188   : > { %p13_p4 = scmp.ge.s32.totalorder %s16_s19, 24   ;;  %s2014_s12 = smov %s1412_s13 }
 0x189   : > { %s2015_s13 = smov %s1416_s14  ;;  %s2016_s14 = smov %s1529_s5 }
 0x18a   : > { %s2017_s15 = smov %s1428_s17  ;;  %s2018_s16 = smov %s1432_s18 }
 0x18b   : > { %s2019_s17 = smov %s2022_s21  ;;  %15 = sbr.rel (!%p13_p4) target bundleno = 5 (0x5), region = 86 }
 0x18d   : > { %s2020_s18 = smov %s2013_s25 }
 0x190   :  { %1148 = vsyncpa [#allocation4], 1 }
 0x191   :  { %1150 = vsyncpa [#allocation4 + $0x1], 1 }

// kernel: forward.11
= control target key start
LH: loop header
LB: loop body
LE: loop exit
PB: predicated region body
PF: predicated region fallthrough
CT: control target
= control target key end

     0   :  { %s415_s1 = inlined_call_operand.vmem [shape: f32[512,128], index: 1, kind: input, shape index: {}]   ;;  %s416_s0 = inlined_call_operand.vmem [shape: f32[8,512], index: 0, kind: input, shape index: {}]   ;;  %s417_s2 = inlined_call_operand.vmem [shape: f32[1,128], index: 2, kind: input, shape index: {}]   ;;  %s418_s3 = inlined_call_operand.vmem [shape: f32[8,128], index: 3, kind: output, shape index: {}]  }
   0x1   :  { %v71_v0 = vld [vmem:[%s415_s1 + $0x178] sm:$0xff]  ;;  %v70_v1 = vld [vmem:[%s415_s1 + $0x170] sm:$0xff]  ;;  %v69_v5 = vld [vmem:[%s415_s1 + $0x168] sm:$0xff] }
   0x2   :  { %v87_v2 = vld [vmem:[%s415_s1 + $0x1f8] sm:$0xff]  ;;  %128 = vmatpush.msra.mxu2 %v71_v0  ;;  %v86_v6 = vld [vmem:[%s415_s1 + $0x1f0] sm:$0xff]  ;;  %v85_v9 = vld [vmem:[%s415_s1 + $0x1e8] sm:$0xff] }
   0x3   :  { %148 = vmatpush.msra.mxu3 %v87_v2  ;;  %v39_v3 = vld [vmem:[%s415_s1 + $0x78] sm:$0xff]  ;;  %v38_v7 = vld [vmem:[%s415_s1 + $0x70] sm:$0xff]  ;;  %v37_v10 = vld [vmem:[%s415_s1 + $0x68] sm:$0xff] }
   0x4   :  { %v55_v4 = vld [vmem:[%s415_s1 + $0xf8] sm:$0xff]  ;;  %88 = vmatpush.msra.mxu0 %v39_v3  ;;  %v54_v8 = vld [vmem:[%s415_s1 + $0xf0] sm:$0xff]  ;;  %129 = vmatpush.msra.mxu2 %v70_v1  ;;  %v68_v11 = vld [vmem:[%s415_s1 + $0x160] sm:$0xff] }
   0x5   :  { %108 = vmatpush.msra.mxu1 %v55_v4  ;;  %149 = vmatpush.msra.mxu3 %v86_v6  ;;  %v53_v12 = vld [vmem:[%s415_s1 + $0xe8] sm:$0xff]  ;;  %v84_v13 = vld [vmem:[%s415_s1 + $0x1e0] sm:$0xff]  ;;  %v67_v16 = vld [vmem:[%s415_s1 + $0x158] sm:$0xff] }
   0x6   :  { %89 = vmatpush.msra.mxu0 %v38_v7  ;;  %130 = vmatpush.msra.mxu2 %v69_v5  ;;  %v36_v14 = vld [vmem:[%s415_s1 + $0x60] sm:$0xff]  ;;  %v83_v17 = vld [vmem:[%s415_s1 + $0x1d8] sm:$0xff]  ;;  %v66_v20 = vld [vmem:[%s415_s1 + $0x150] sm:$0xff] }
   0x7   :  { %109 = vmatpush.msra.mxu1 %v54_v8  ;;  %150 = vmatpush.msra.mxu3 %v85_v9  ;;  %v52_v15 = vld [vmem:[%s415_s1 + $0xe0] sm:$0xff]  ;;  %v35_v18 = vld [vmem:[%s415_s1 + $0x58] sm:$0xff]  ;;  %v82_v21 = vld [vmem:[%s415_s1 + $0x1d0] sm:$0xff] }
   0x8   :  { %90 = vmatpush.msra.mxu0 %v37_v10  ;;  %131 = vmatpush.msra.mxu2 %v68_v11  ;;  %v51_v19 = vld [vmem:[%s415_s1 + $0xd8] sm:$0xff]  ;;  %v34_v22 = vld [vmem:[%s415_s1 + $0x50] sm:$0xff]  ;;  %v65_v24 = vld [vmem:[%s415_s1 + $0x148] sm:$0xff] }
   0x9   :  { %110 = vmatpush.msra.mxu1 %v53_v12  ;;  %151 = vmatpush.msra.mxu3 %v84_v13  ;;  %v50_v23 = vld [vmem:[%s415_s1 + $0xd0] sm:$0xff]  ;;  %v81_v25 = vld [vmem:[%s415_s1 + $0x1c8] sm:$0xff]  ;;  %v64_v28 = vld [vmem:[%s415_s1 + $0x140] sm:$0xff] }
   0xa   :  { %91 = vmatpush.msra.mxu0 %v36_v14  ;;  %132 = vmatpush.msra.mxu2 %v67_v16  ;;  %v33_v26 = vld [vmem:[%s415_s1 + $0x48] sm:$0xff]  ;;  %v80_v29 = vld [vmem:[%s415_s1 + $0x1c0] sm:$0xff]  ;;  %v63_v32 = vld [vmem:[%s415_s1 + $0x138] sm:$0xff] }
   0xb   :  { %111 = vmatpush.msra.mxu1 %v52_v15  ;;  %152 = vmatpush.msra.mxu3 %v83_v17  ;;  %v49_v27 = vld [vmem:[%s415_s1 + $0xc8] sm:$0xff]  ;;  %v32_v30 = vld [vmem:[%s415_s1 + $0x40] sm:$0xff]  ;;  %v79_v33 = vld [vmem:[%s415_s1 + $0x1b8] sm:$0xff] }
   0xc   :  { %92 = vmatpush.msra.mxu0 %v35_v18  ;;  %133 = vmatpush.msra.mxu2 %v66_v20  ;;  %v48_v31 = vld [vmem:[%s415_s1 + $0xc0] sm:$0xff]  ;;  %v31_v34 = vld [vmem:[%s415_s1 + $0x38] sm:$0xff]  ;;  %v62_v36 = vld [vmem:[%s415_s1 + $0x130] sm:$0xff] }
   0xd   :  { %112 = vmatpush.msra.mxu1 %v51_v19  ;;  %153 = vmatpush.msra.mxu3 %v82_v21  ;;  %v47_v35 = vld [vmem:[%s415_s1 + $0xb8] sm:$0xff]  ;;  %v78_v37 = vld [vmem:[%s415_s1 + $0x1b0] sm:$0xff]  ;;  %v61_v40 = vld [vmem:[%s415_s1 + $0x128] sm:$0xff] }
   0xe   :  { %93 = vmatpush.msra.mxu0 %v34_v22  ;;  %134 = vmatpush.msra.mxu2 %v65_v24  ;;  %v30_v38 = vld [vmem:[%s415_s1 + $0x30] sm:$0xff]  ;;  %v77_v41 = vld [vmem:[%s415_s1 + $0x1a8] sm:$0xff]  ;;  %v60_v44 = vld [vmem:[%s415_s1 + $0x120] sm:$0xff] }
   0xf   :  { %113 = vmatpush.msra.mxu1 %v50_v23  ;;  %154 = vmatpush.msra.mxu3 %v81_v25  ;;  %v46_v39 = vld [vmem:[%s415_s1 + $0xb0] sm:$0xff]  ;;  %v29_v42 = vld [vmem:[%s415_s1 + $0x28] sm:$0xff]  ;;  %v76_v45 = vld [vmem:[%s415_s1 + $0x1a0] sm:$0xff] }
  0x10   :  { %94 = vmatpush.msra.mxu0 %v33_v26  ;;  %135 = vmatpush.msra.mxu2 %v64_v28  ;;  %v45_v43 = vld [vmem:[%s415_s1 + $0xa8] sm:$0xff]  ;;  %v28_v46 = vld [vmem:[%s415_s1 + $0x20] sm:$0xff]  ;;  %v59_v48 = vld [vmem:[%s415_s1 + $0x118] sm:$0xff] }
  0x11   :  { %114 = vmatpush.msra.mxu1 %v49_v27  ;;  %155 = vmatpush.msra.mxu3 %v80_v29  ;;  %v44_v47 = vld [vmem:[%s415_s1 + $0xa0] sm:$0xff]  ;;  %v75_v49 = vld [vmem:[%s415_s1 + $0x198] sm:$0xff]  ;;  %v58_v52 = vld [vmem:[%s415_s1 + $0x110] sm:$0xff] }
  0x12   :  { %95 = vmatpush.msra.mxu0 %v32_v30  ;;  %136 = vmatpush.msra.mxu2 %v63_v32  ;;  %v27_v50 = vld [vmem:[%s415_s1 + $0x18] sm:$0xff]  ;;  %v74_v53 = vld [vmem:[%s415_s1 + $0x190] sm:$0xff]  ;;  %v57_v56 = vld [vmem:[%s415_s1 + $0x108] sm:$0xff] }
  0x13   :  { %115 = vmatpush.msra.mxu1 %v48_v31  ;;  %156 = vmatpush.msra.mxu3 %v79_v33  ;;  %v43_v51 = vld [vmem:[%s415_s1 + $0x98] sm:$0xff]  ;;  %v26_v54 = vld [vmem:[%s415_s1 + $0x10] sm:$0xff]  ;;  %v73_v57 = vld [vmem:[%s415_s1 + $0x188] sm:$0xff] }
  0x14   :  { %96 = vmatpush.msra.mxu0 %v31_v34  ;;  %137 = vmatpush.msra.mxu2 %v62_v36  ;;  %v42_v55 = vld [vmem:[%s415_s1 + $0x90] sm:$0xff]  ;;  %v25_v58 = vld [vmem:[%s415_s1 + $0x8] sm:$0xff]  ;;  %v56_v60 = vld [vmem:[%s415_s1 + $0x100] sm:$0xff] }
  0x15   :  { %116 = vmatpush.msra.mxu1 %v47_v35  ;;  %157 = vmatpush.msra.mxu3 %v78_v37  ;;  %v41_v59 = vld [vmem:[%s415_s1 + $0x88] sm:$0xff]  ;;  %v72_v61 = vld [vmem:[%s415_s1 + $0x180] sm:$0xff]  ;;  %v22_v62 = vld [vmem:[%s416_s0 + $0x10] sm:$0xff] }
  0x16   :  { %97 = vmatpush.msra.mxu0 %v30_v38  ;;  %138 = vmatpush.msra.mxu2 %v61_v40  ;;  %v23_v63 = vld [vmem:[%s416_s0 + $0x18] sm:$0xff]  ;;  %v24_v0 = vld [vmem:[%s415_s1] sm:$0xff]  ;;  %v21_v3 = vld [vmem:[%s416_s0 + $0x8] sm:$0xff] }
  0x17   :  { %117 = vmatpush.msra.mxu1 %v46_v39  ;;  %158 = vmatpush.msra.mxu3 %v77_v41  ;;  %v40_v1 = vld [vmem:[%s415_s1 + $0x80] sm:$0xff] }
  0x18   :  { %98 = vmatpush.msra.mxu0 %v29_v42  ;;  %139 = vmatpush.msra.mxu2 %v60_v44  ;;  %v20_v2 = vld [vmem:[%s416_s0] sm:$0xff] }
  0x19   :  { %118 = vmatpush.msra.mxu1 %v45_v43  ;;  %159 = vmatpush.msra.mxu3 %v76_v45  ;;  %v184_v10 = vld [vmem:[%s417_s2] ss:$0 sm:$0xff] }
  0x1a   :  { %99 = vmatpush.msra.mxu0 %v28_v46  ;;  %140 = vmatpush.msra.mxu2 %v59_v48 }
  0x1b   :  { %119 = vmatpush.msra.mxu1 %v44_v47  ;;  %160 = vmatpush.msra.mxu3 %v75_v49 }
  0x1c   :  { %100 = vmatpush.msra.mxu0 %v27_v50  ;;  %141 = vmatpush.msra.mxu2 %v58_v52 }
  0x1d   :  { %120 = vmatpush.msra.mxu1 %v43_v51  ;;  %161 = vmatpush.msra.mxu3 %v74_v53 }
  0x1e   :  { %101 = vmatpush.msra.mxu0 %v26_v54  ;;  %142 = vmatpush.msra.mxu2 %v57_v56 }
  0x1f   :  { %121 = vmatpush.msra.mxu1 %v42_v55  ;;  %162 = vmatpush.msra.mxu3 %v73_v57 }
  0x20   :  { %102 = vmatpush.msra.mxu0 %v25_v58  ;;  %143 = vmatpush.msra.mxu2 %v56_v60 }
  0x21   :  { %122 = vmatpush.msra.mxu1 %v41_v59  ;;  %163 = vmatpush.msra.mxu3 %v72_v61 }
  0x22   :  { %144 = vmatmul.f32.vlgmr.msra.gmra.mxu2 %v22_v62  ;;  %164 = vmatmul.f32.vlgmr.msra.gmra.mxu3 %v23_v63 }
  0x23   :  { %103 = vmatpush.msra.mxu0 %v24_v0  ;;  %123 = vmatpush.msra.mxu1 %v40_v1 }
  0x24   :  { %104 = vmatmul.f32.vlgmr.msra.gmra.mxu0 %v20_v2  ;;  %124 = vmatmul.f32.vlgmr.msra.gmra.mxu1 %v21_v3 }
  0xa1   :  { %v105_v4 = vpop.f32.mrf.mxu0  ;;  %v125_v5 = vpop.f32.mrf.mxu1 }
  0xa2   :  { %v126_v6 = vadd.f32 %v125_v5, %v105_v4 }
  0xa5   :  { %v145_v7 = vpop.f32.mrf.mxu2  ;;  %v165_v8 = vpop.f32.mrf.mxu3 }
  0xa6   :  { %v146_v9 = vadd.f32 %v145_v7, %v126_v6 }
  0xa8   :  { %v166_v11 = vadd.f32 %v165_v8, %v146_v9 }
  0xaa   :  { %v178_v12 = vadd.f32 %v184_v10, %v166_v11 }
  0xac   :  { %179 = vst [vmem:[%s418_s3] sm:$0xff] %v178_v12 }

// kernel: forward.10
= control target key start
LH: loop header
LB: loop body
LE: loop exit
PB: predicated region body
PF: predicated region fallthrough
CT: control target
= control target key end

     0   :  { %s1486_s1 = inlined_call_operand.vmem [shape: f32[512,512], index: 1, kind: input, shape index: {}]   ;;  %s1487_s0 = inlined_call_operand.vmem [shape: f32[8,512], index: 0, kind: input, shape index: {}]   ;;  %s1488_s2 = inlined_call_operand.vmem [shape: f32[1,512], index: 2, kind: input, shape index: {}]   ;;  %s1489_s3 = inlined_call_operand.vmem [shape: f32[8,512], index: 3, kind: output, shape index: {}]  }
   0x1   :  { %v218_v0 = vld [vmem:[%s1486_s1 + $0x5e0] sm:$0xff]  ;;  %v219_v62 = vld [vmem:[%s1486_s1 + $0x5e8] sm:$0xff] }
   0x2   :  { %v214_v1 = vld [vmem:[%s1486_s1 + $0x5c0] sm:$0xff]  ;;  %326 = vmatpush.msra.mxu2 %v218_v0  ;;  %v283_v63 = vld [vmem:[%s1486_s1 + $0x7e8] sm:$0xff] }
   0x3   :  { %v282_v2 = vld [vmem:[%s1486_s1 + $0x7e0] sm:$0xff] }
   0x4   :  { %346 = vmatpush.msra.mxu3 %v282_v2  ;;  %v90_v3 = vld [vmem:[%s1486_s1 + $0x1e0] sm:$0xff]  ;;  %327 = vmatpush.msra.mxu2 %v214_v1  ;;  %v215_v2 = vld [vmem:[%s1486_s1 + $0x5c8] sm:$0xff] }
   0x5   :  { %v154_v4 = vld [vmem:[%s1486_s1 + $0x3e0] sm:$0xff]  ;;  %286 = vmatpush.msra.mxu0 %v90_v3  ;;  %v91_v3 = vld [vmem:[%s1486_s1 + $0x1e8] sm:$0xff] }
   0x6   :  { %v210_v5 = vld [vmem:[%s1486_s1 + $0x5a0] sm:$0xff]  ;;  %306 = vmatpush.msra.mxu1 %v154_v4  ;;  %v155_v4 = vld [vmem:[%s1486_s1 + $0x3e8] sm:$0xff] }
   0x7   :  { %v278_v6 = vld [vmem:[%s1486_s1 + $0x7c0] sm:$0xff]  ;;  %328 = vmatpush.msra.mxu2 %v210_v5  ;;  %v279_v5 = vld [vmem:[%s1486_s1 + $0x7c8] sm:$0xff] }
   0x8   :  { %v86_v7 = vld [vmem:[%s1486_s1 + $0x1c0] sm:$0xff]  ;;  %347 = vmatpush.msra.mxu3 %v278_v6  ;;  %v211_v6 = vld [vmem:[%s1486_s1 + $0x5a8] sm:$0xff] }
   0x9   :  { %v150_v8 = vld [vmem:[%s1486_s1 + $0x3c0] sm:$0xff]  ;;  %287 = vmatpush.msra.mxu0 %v86_v7  ;;  %v87_v7 = vld [vmem:[%s1486_s1 + $0x1c8] sm:$0xff] }
   0xa   :  { %v274_v9 = vld [vmem:[%s1486_s1 + $0x7a0] sm:$0xff]  ;;  %307 = vmatpush.msra.mxu1 %v150_v8  ;;  %v151_v8 = vld [vmem:[%s1486_s1 + $0x3c8] sm:$0xff] }
   0xb   :  { %v82_v10 = vld [vmem:[%s1486_s1 + $0x1a0] sm:$0xff]  ;;  %348 = vmatpush.msra.mxu3 %v274_v9  ;;  %v275_v9 = vld [vmem:[%s1486_s1 + $0x7a8] sm:$0xff] }
   0xc   :  { %v206_v11 = vld [vmem:[%s1486_s1 + $0x580] sm:$0xff]  ;;  %288 = vmatpush.msra.mxu0 %v82_v10  ;;  %v207_v10 = vld [vmem:[%s1486_s1 + $0x588] sm:$0xff] }
   0xd   :  { %v146_v12 = vld [vmem:[%s1486_s1 + $0x3a0] sm:$0xff]  ;;  %329 = vmatpush.msra.mxu2 %v206_v11  ;;  %v83_v11 = vld [vmem:[%s1486_s1 + $0x1a8] sm:$0xff] }
   0xe   :  { %v270_v13 = vld [vmem:[%s1486_s1 + $0x780] sm:$0xff]  ;;  %308 = vmatpush.msra.mxu1 %v146_v12  ;;  %v147_v12 = vld [vmem:[%s1486_s1 + $0x3a8] sm:$0xff] }
   0xf   :  { %v78_v14 = vld [vmem:[%s1486_s1 + $0x180] sm:$0xff]  ;;  %349 = vmatpush.msra.mxu3 %v270_v13  ;;  %v271_v13 = vld [vmem:[%s1486_s1 + $0x788] sm:$0xff] }
  0x10   :  { %v142_v15 = vld [vmem:[%s1486_s1 + $0x380] sm:$0xff]  ;;  %289 = vmatpush.msra.mxu0 %v78_v14  ;;  %v203_v14 = vld [vmem:[%s1486_s1 + $0x568] sm:$0xff] }
  0x11   :  { %v202_v16 = vld [vmem:[%s1486_s1 + $0x560] sm:$0xff]  ;;  %309 = vmatpush.msra.mxu1 %v142_v15  ;;  %v79_v15 = vld [vmem:[%s1486_s1 + $0x188] sm:$0xff] }
  0x12   :  { %v266_v17 = vld [vmem:[%s1486_s1 + $0x760] sm:$0xff]  ;;  %330 = vmatpush.msra.mxu2 %v202_v16  ;;  %v143_v16 = vld [vmem:[%s1486_s1 + $0x388] sm:$0xff] }
  0x13   :  { %v74_v18 = vld [vmem:[%s1486_s1 + $0x160] sm:$0xff]  ;;  %350 = vmatpush.msra.mxu3 %v266_v17  ;;  %v267_v17 = vld [vmem:[%s1486_s1 + $0x768] sm:$0xff] }
  0x14   :  { %v138_v19 = vld [vmem:[%s1486_s1 + $0x360] sm:$0xff]  ;;  %290 = vmatpush.msra.mxu0 %v74_v18  ;;  %v199_v18 = vld [vmem:[%s1486_s1 + $0x548] sm:$0xff] }
  0x15   :  { %v198_v20 = vld [vmem:[%s1486_s1 + $0x540] sm:$0xff]  ;;  %310 = vmatpush.msra.mxu1 %v138_v19  ;;  %v75_v19 = vld [vmem:[%s1486_s1 + $0x168] sm:$0xff] }
  0x16   :  { %v262_v21 = vld [vmem:[%s1486_s1 + $0x740] sm:$0xff]  ;;  %331 = vmatpush.msra.mxu2 %v198_v20  ;;  %v139_v20 = vld [vmem:[%s1486_s1 + $0x368] sm:$0xff] }
  0x17   :  { %v70_v22 = vld [vmem:[%s1486_s1 + $0x140] sm:$0xff]  ;;  %351 = vmatpush.msra.mxu3 %v262_v21  ;;  %v263_v21 = vld [vmem:[%s1486_s1 + $0x748] sm:$0xff] }
  0x18   :  { %v134_v23 = vld [vmem:[%s1486_s1 + $0x340] sm:$0xff]  ;;  %291 = vmatpush.msra.mxu0 %v70_v22  ;;  %v195_v22 = vld [vmem:[%s1486_s1 + $0x528] sm:$0xff] }
  0x19   :  { %v194_v24 = vld [vmem:[%s1486_s1 + $0x520] sm:$0xff]  ;;  %311 = vmatpush.msra.mxu1 %v134_v23  ;;  %v71_v23 = vld [vmem:[%s1486_s1 + $0x148] sm:$0xff] }
  0x1a   :  { %v258_v25 = vld [vmem:[%s1486_s1 + $0x720] sm:$0xff]  ;;  %332 = vmatpush.msra.mxu2 %v194_v24  ;;  %v135_v24 = vld [vmem:[%s1486_s1 + $0x348] sm:$0xff] }
  0x1b   :  { %v66_v26 = vld [vmem:[%s1486_s1 + $0x120] sm:$0xff]  ;;  %352 = vmatpush.msra.mxu3 %v258_v25  ;;  %v259_v25 = vld [vmem:[%s1486_s1 + $0x728] sm:$0xff] }
  0x1c   :  { %v130_v27 = vld [vmem:[%s1486_s1 + $0x320] sm:$0xff]  ;;  %292 = vmatpush.msra.mxu0 %v66_v26  ;;  %v191_v26 = vld [vmem:[%s1486_s1 + $0x508] sm:$0xff] }
  0x1d   :  { %v190_v28 = vld [vmem:[%s1486_s1 + $0x500] sm:$0xff]  ;;  %312 = vmatpush.msra.mxu1 %v130_v27  ;;  %v67_v27 = vld [vmem:[%s1486_s1 + $0x128] sm:$0xff] }
  0x1e   :  { %v254_v29 = vld [vmem:[%s1486_s1 + $0x700] sm:$0xff]  ;;  %333 = vmatpush.msra.mxu2 %v190_v28  ;;  %v131_v28 = vld [vmem:[%s1486_s1 + $0x328] sm:$0xff] }
  0x1f   :  { %v62_v30 = vld [vmem:[%s1486_s1 + $0x100] sm:$0xff]  ;;  %353 = vmatpush.msra.mxu3 %v254_v29  ;;  %v255_v29 = vld [vmem:[%s1486_s1 + $0x708] sm:$0xff] }
  0x20   :  { %v126_v31 = vld [vmem:[%s1486_s1 + $0x300] sm:$0xff]  ;;  %293 = vmatpush.msra.mxu0 %v62_v30  ;;  %v187_v30 = vld [vmem:[%s1486_s1 + $0x4e8] sm:$0xff] }
  0x21   :  { %v186_v32 = vld [vmem:[%s1486_s1 + $0x4e0] sm:$0xff]  ;;  %313 = vmatpush.msra.mxu1 %v126_v31  ;;  %v63_v31 = vld [vmem:[%s1486_s1 + $0x108] sm:$0xff] }
  0x22   :  { %v250_v33 = vld [vmem:[%s1486_s1 + $0x6e0] sm:$0xff]  ;;  %334 = vmatpush.msra.mxu2 %v186_v32  ;;  %v127_v32 = vld [vmem:[%s1486_s1 + $0x308] sm:$0xff] }
  0x23   :  { %v58_v34 = vld [vmem:[%s1486_s1 + $0xe0] sm:$0xff]  ;;  %354 = vmatpush.msra.mxu3 %v250_v33  ;;  %v251_v33 = vld [vmem:[%s1486_s1 + $0x6e8] sm:$0xff] }
  0x24   :  { %v122_v35 = vld [vmem:[%s1486_s1 + $0x2e0] sm:$0xff]  ;;  %294 = vmatpush.msra.mxu0 %v58_v34  ;;  %v183_v34 = vld [vmem:[%s1486_s1 + $0x4c8] sm:$0xff] }
  0x25   :  { %v182_v36 = vld [vmem:[%s1486_s1 + $0x4c0] sm:$0xff]  ;;  %314 = vmatpush.msra.mxu1 %v122_v35  ;;  %v59_v35 = vld [vmem:[%s1486_s1 + $0xe8] sm:$0xff] }
  0x26   :  { %v246_v37 = vld [vmem:[%s1486_s1 + $0x6c0] sm:$0xff]  ;;  %335 = vmatpush.msra.mxu2 %v182_v36  ;;  %v123_v36 = vld [vmem:[%s1486_s1 + $0x2e8] sm:$0xff] }
  0x27   :  { %v54_v38 = vld [vmem:[%s1486_s1 + $0xc0] sm:$0xff]  ;;  %355 = vmatpush.msra.mxu3 %v246_v37  ;;  %v247_v37 = vld [vmem:[%s1486_s1 + $0x6c8] sm:$0xff] }
  0x28   :  { %v118_v39 = vld [vmem:[%s1486_s1 + $0x2c0] sm:$0xff]  ;;  %295 = vmatpush.msra.mxu0 %v54_v38  ;;  %v179_v38 = vld [vmem:[%s1486_s1 + $0x4a8] sm:$0xff] }
  0x29   :  { %v178_v40 = vld [vmem:[%s1486_s1 + $0x4a0] sm:$0xff]  ;;  %315 = vmatpush.msra.mxu1 %v118_v39  ;;  %v55_v39 = vld [vmem:[%s1486_s1 + $0xc8] sm:$0xff] }
  0x2a   :  { %v242_v41 = vld [vmem:[%s1486_s1 + $0x6a0] sm:$0xff]  ;;  %336 = vmatpush.msra.mxu2 %v178_v40  ;;  %v119_v40 = vld [vmem:[%s1486_s1 + $0x2c8] sm:$0xff] }
  0x2b   :  { %v50_v42 = vld [vmem:[%s1486_s1 + $0xa0] sm:$0xff]  ;;  %356 = vmatpush.msra.mxu3 %v242_v41  ;;  %v243_v41 = vld [vmem:[%s1486_s1 + $0x6a8] sm:$0xff] }
  0x2c   :  { %v114_v43 = vld [vmem:[%s1486_s1 + $0x2a0] sm:$0xff]  ;;  %296 = vmatpush.msra.mxu0 %v50_v42  ;;  %v175_v42 = vld [vmem:[%s1486_s1 + $0x488] sm:$0xff] }
  0x2d   :  { %v174_v44 = vld [vmem:[%s1486_s1 + $0x480] sm:$0xff]  ;;  %316 = vmatpush.msra.mxu1 %v114_v43  ;;  %v51_v43 = vld [vmem:[%s1486_s1 + $0xa8] sm:$0xff] }
  0x2e   :  { %v238_v45 = vld [vmem:[%s1486_s1 + $0x680] sm:$0xff]  ;;  %337 = vmatpush.msra.mxu2 %v174_v44  ;;  %v115_v44 = vld [vmem:[%s1486_s1 + $0x2a8] sm:$0xff] }
  0x2f   :  { %v46_v46 = vld [vmem:[%s1486_s1 + $0x80] sm:$0xff]  ;;  %357 = vmatpush.msra.mxu3 %v238_v45  ;;  %v239_v45 = vld [vmem:[%s1486_s1 + $0x688] sm:$0xff] }
  0x30   :  { %v110_v47 = vld [vmem:[%s1486_s1 + $0x280] sm:$0xff]  ;;  %297 = vmatpush.msra.mxu0 %v46_v46  ;;  %v171_v46 = vld [vmem:[%s1486_s1 + $0x468] sm:$0xff] }
  0x31   :  { %v170_v48 = vld [vmem:[%s1486_s1 + $0x460] sm:$0xff]  ;;  %317 = vmatpush.msra.mxu1 %v110_v47  ;;  %v47_v47 = vld [vmem:[%s1486_s1 + $0x88] sm:$0xff] }
  0x32   :  { %v234_v49 = vld [vmem:[%s1486_s1 + $0x660] sm:$0xff]  ;;  %338 = vmatpush.msra.mxu2 %v170_v48  ;;  %v111_v48 = vld [vmem:[%s1486_s1 + $0x288] sm:$0xff] }
  0x33   :  { %v42_v50 = vld [vmem:[%s1486_s1 + $0x60] sm:$0xff]  ;;  %358 = vmatpush.msra.mxu3 %v234_v49  ;;  %v235_v49 = vld [vmem:[%s1486_s1 + $0x668] sm:$0xff] }
  0x34   :  { %v106_v51 = vld [vmem:[%s1486_s1 + $0x260] sm:$0xff]  ;;  %298 = vmatpush.msra.mxu0 %v42_v50  ;;  %v167_v50 = vld [vmem:[%s1486_s1 + $0x448] sm:$0xff] }
  0x35   :  { %v166_v52 = vld [vmem:[%s1486_s1 + $0x440] sm:$0xff]  ;;  %318 = vmatpush.msra.mxu1 %v106_v51  ;;  %v43_v51 = vld [vmem:[%s1486_s1 + $0x68] sm:$0xff] }
  0x36   :  { %v230_v53 = vld [vmem:[%s1486_s1 + $0x640] sm:$0xff]  ;;  %339 = vmatpush.msra.mxu2 %v166_v52  ;;  %v107_v52 = vld [vmem:[%s1486_s1 + $0x268] sm:$0xff] }
  0x37   :  { %v38_v54 = vld [vmem:[%s1486_s1 + $0x40] sm:$0xff]  ;;  %359 = vmatpush.msra.mxu3 %v230_v53  ;;  %v231_v53 = vld [vmem:[%s1486_s1 + $0x648] sm:$0xff] }
  0x38   :  { %v102_v55 = vld [vmem:[%s1486_s1 + $0x240] sm:$0xff]  ;;  %299 = vmatpush.msra.mxu0 %v38_v54  ;;  %v163_v54 = vld [vmem:[%s1486_s1 + $0x428] sm:$0xff] }
  0x39   :  { %v162_v56 = vld [vmem:[%s1486_s1 + $0x420] sm:$0xff]  ;;  %319 = vmatpush.msra.mxu1 %v102_v55  ;;  %v39_v55 = vld [vmem:[%s1486_s1 + $0x48] sm:$0xff] }
  0x3a   :  { %v226_v57 = vld [vmem:[%s1486_s1 + $0x620] sm:$0xff]  ;;  %340 = vmatpush.msra.mxu2 %v162_v56  ;;  %v103_v56 = vld [vmem:[%s1486_s1 + $0x248] sm:$0xff] }
  0x3b   :  { %v34_v58 = vld [vmem:[%s1486_s1 + $0x20] sm:$0xff]  ;;  %360 = vmatpush.msra.mxu3 %v226_v57  ;;  %v227_v57 = vld [vmem:[%s1486_s1 + $0x628] sm:$0xff] }
  0x3c   :  { %v98_v59 = vld [vmem:[%s1486_s1 + $0x220] sm:$0xff]  ;;  %300 = vmatpush.msra.mxu0 %v34_v58  ;;  %v159_v58 = vld [vmem:[%s1486_s1 + $0x408] sm:$0xff] }
  0x3d   :  { %v158_v60 = vld [vmem:[%s1486_s1 + $0x400] sm:$0xff]  ;;  %320 = vmatpush.msra.mxu1 %v98_v59  ;;  %v35_v59 = vld [vmem:[%s1486_s1 + $0x28] sm:$0xff] }
  0x3e   :  { %v222_v61 = vld [vmem:[%s1486_s1 + $0x600] sm:$0xff]  ;;  %341 = vmatpush.msra.mxu2 %v158_v60  ;;  %v1042_v60 = vld [vmem:[%s1487_s0 + $0x10] sm:$0xff] }
  0x3f   :  { %v30_v0 = vld [vmem:[%s1486_s1] sm:$0xff]  ;;  %361 = vmatpush.msra.mxu3 %v222_v61  ;;  %v99_v61 = vld [vmem:[%s1486_s1 + $0x228] sm:$0xff]  ;;  %342 = vmatmul.f32.vlgmr.msra.gmra.mxu2 %v1042_v60 }
  0x40   :  { %v94_v1 = vld [vmem:[%s1486_s1 + $0x200] sm:$0xff]  ;;  %406 = vmatpush.msrb.mxu2 %v219_v62  ;;  %301 = vmatpush.msra.mxu0 %v30_v0  ;;  %v220_v62 = vld [vmem:[%s1486_s1 + $0x5f0] sm:$0xff]  ;;  %v1056_v0 = vld [vmem:[%s1487_s0 + $0x18] sm:$0xff] }
  0x41   :  { %426 = vmatpush.msrb.mxu3 %v283_v63  ;;  %321 = vmatpush.msra.mxu1 %v94_v1  ;;  %v223_v63 = vld [vmem:[%s1486_s1 + $0x608] sm:$0xff] }
  0x42   :  { %407 = vmatpush.msrb.mxu2 %v215_v2  ;;  %366 = vmatpush.msrb.mxu0 %v91_v3  ;;  %v31_v1 = vld [vmem:[%s1486_s1 + $0x8] sm:$0xff]  ;;  %v216_v2 = vld [vmem:[%s1486_s1 + $0x5d0] sm:$0xff] }
  0x43   :  { %386 = vmatpush.msrb.mxu1 %v155_v4  ;;  %427 = vmatpush.msrb.mxu3 %v279_v5  ;;  %v284_v3 = vld [vmem:[%s1486_s1 + $0x7f0] sm:$0xff]  ;;  %v95_v4 = vld [vmem:[%s1486_s1 + $0x208] sm:$0xff]  ;;  %v1074_v5 = vld [vmem:[%s1487_s0] sm:$0xff] }
  0x44   :  { %408 = vmatpush.msrb.mxu2 %v211_v6  ;;  %367 = vmatpush.msrb.mxu0 %v87_v7  ;;  %v1080_v6 = vld [vmem:[%s1487_s0 + $0x8] sm:$0xff]  ;;  %v92_v7 = vld [vmem:[%s1486_s1 + $0x1f0] sm:$0xff] }
  0x45   :  { %387 = vmatpush.msrb.mxu1 %v151_v8  ;;  %428 = vmatpush.msrb.mxu3 %v275_v9  ;;  %v156_v8 = vld [vmem:[%s1486_s1 + $0x3f0] sm:$0xff] }
  0x46   :  { %409 = vmatpush.msrb.mxu2 %v207_v10  ;;  %368 = vmatpush.msrb.mxu0 %v83_v11  ;;  %v212_v9 = vld [vmem:[%s1486_s1 + $0x5b0] sm:$0xff] }
  0x47   :  { %388 = vmatpush.msrb.mxu1 %v147_v12  ;;  %429 = vmatpush.msrb.mxu3 %v271_v13  ;;  %v280_v10 = vld [vmem:[%s1486_s1 + $0x7d0] sm:$0xff] }
  0x48   :  { %410 = vmatpush.msrb.mxu2 %v203_v14  ;;  %369 = vmatpush.msrb.mxu0 %v79_v15  ;;  %v88_v11 = vld [vmem:[%s1486_s1 + $0x1d0] sm:$0xff] }
  0x49   :  { %389 = vmatpush.msrb.mxu1 %v143_v16  ;;  %430 = vmatpush.msrb.mxu3 %v267_v17  ;;  %v152_v12 = vld [vmem:[%s1486_s1 + $0x3d0] sm:$0xff] }
  0x4a   :  { %411 = vmatpush.msrb.mxu2 %v199_v18  ;;  %370 = vmatpush.msrb.mxu0 %v75_v19  ;;  %v208_v13 = vld [vmem:[%s1486_s1 + $0x590] sm:$0xff] }
  0x4b   :  { %390 = vmatpush.msrb.mxu1 %v139_v20  ;;  %431 = vmatpush.msrb.mxu3 %v263_v21  ;;  %v276_v14 = vld [vmem:[%s1486_s1 + $0x7b0] sm:$0xff] }
  0x4c   :  { %412 = vmatpush.msrb.mxu2 %v195_v22  ;;  %371 = vmatpush.msrb.mxu0 %v71_v23  ;;  %v84_v15 = vld [vmem:[%s1486_s1 + $0x1b0] sm:$0xff] }
  0x4d   :  { %391 = vmatpush.msrb.mxu1 %v135_v24  ;;  %432 = vmatpush.msrb.mxu3 %v259_v25  ;;  %v148_v16 = vld [vmem:[%s1486_s1 + $0x3b0] sm:$0xff] }
  0x4e   :  { %413 = vmatpush.msrb.mxu2 %v191_v26  ;;  %372 = vmatpush.msrb.mxu0 %v67_v27  ;;  %v204_v17 = vld [vmem:[%s1486_s1 + $0x570] sm:$0xff] }
  0x4f   :  { %392 = vmatpush.msrb.mxu1 %v131_v28  ;;  %433 = vmatpush.msrb.mxu3 %v255_v29  ;;  %v272_v18 = vld [vmem:[%s1486_s1 + $0x790] sm:$0xff] }
  0x50   :  { %414 = vmatpush.msrb.mxu2 %v187_v30  ;;  %373 = vmatpush.msrb.mxu0 %v63_v31  ;;  %v80_v19 = vld [vmem:[%s1486_s1 + $0x190] sm:$0xff] }
  0x51   :  { %393 = vmatpush.msrb.mxu1 %v127_v32  ;;  %434 = vmatpush.msrb.mxu3 %v251_v33  ;;  %v144_v20 = vld [vmem:[%s1486_s1 + $0x390] sm:$0xff] }
  0x52   :  { %415 = vmatpush.msrb.mxu2 %v183_v34  ;;  %374 = vmatpush.msrb.mxu0 %v59_v35  ;;  %v200_v21 = vld [vmem:[%s1486_s1 + $0x550] sm:$0xff] }
  0x53   :  { %394 = vmatpush.msrb.mxu1 %v123_v36  ;;  %435 = vmatpush.msrb.mxu3 %v247_v37  ;;  %v268_v22 = vld [vmem:[%s1486_s1 + $0x770] sm:$0xff] }
  0x54   :  { %416 = vmatpush.msrb.mxu2 %v179_v38  ;;  %375 = vmatpush.msrb.mxu0 %v55_v39  ;;  %v76_v23 = vld [vmem:[%s1486_s1 + $0x170] sm:$0xff] }
  0x55   :  { %395 = vmatpush.msrb.mxu1 %v119_v40  ;;  %436 = vmatpush.msrb.mxu3 %v243_v41  ;;  %v140_v24 = vld [vmem:[%s1486_s1 + $0x370] sm:$0xff] }
  0x56   :  { %417 = vmatpush.msrb.mxu2 %v175_v42  ;;  %376 = vmatpush.msrb.mxu0 %v51_v43  ;;  %v196_v25 = vld [vmem:[%s1486_s1 + $0x530] sm:$0xff] }
  0x57   :  { %396 = vmatpush.msrb.mxu1 %v115_v44  ;;  %437 = vmatpush.msrb.mxu3 %v239_v45  ;;  %v264_v26 = vld [vmem:[%s1486_s1 + $0x750] sm:$0xff] }
  0x58   :  { %418 = vmatpush.msrb.mxu2 %v171_v46  ;;  %377 = vmatpush.msrb.mxu0 %v47_v47  ;;  %v72_v27 = vld [vmem:[%s1486_s1 + $0x150] sm:$0xff] }
  0x59   :  { %397 = vmatpush.msrb.mxu1 %v111_v48  ;;  %438 = vmatpush.msrb.mxu3 %v235_v49  ;;  %v136_v28 = vld [vmem:[%s1486_s1 + $0x350] sm:$0xff] }
  0x5a   :  { %419 = vmatpush.msrb.mxu2 %v167_v50  ;;  %378 = vmatpush.msrb.mxu0 %v43_v51  ;;  %v192_v29 = vld [vmem:[%s1486_s1 + $0x510] sm:$0xff] }
  0x5b   :  { %398 = vmatpush.msrb.mxu1 %v107_v52  ;;  %439 = vmatpush.msrb.mxu3 %v231_v53  ;;  %v260_v30 = vld [vmem:[%s1486_s1 + $0x730] sm:$0xff] }
  0x5c   :  { %420 = vmatpush.msrb.mxu2 %v163_v54  ;;  %379 = vmatpush.msrb.mxu0 %v39_v55  ;;  %v68_v31 = vld [vmem:[%s1486_s1 + $0x130] sm:$0xff] }
  0x5d   :  { %399 = vmatpush.msrb.mxu1 %v103_v56  ;;  %440 = vmatpush.msrb.mxu3 %v227_v57  ;;  %v132_v32 = vld [vmem:[%s1486_s1 + $0x330] sm:$0xff] }
  0x5e   :  { %421 = vmatpush.msrb.mxu2 %v159_v58  ;;  %380 = vmatpush.msrb.mxu0 %v35_v59  ;;  %v188_v33 = vld [vmem:[%s1486_s1 + $0x4f0] sm:$0xff] }
  0x5f   :  { %400 = vmatpush.msrb.mxu1 %v99_v61  ;;  %441 = vmatpush.msrb.mxu3 %v223_v63  ;;  %v256_v34 = vld [vmem:[%s1486_s1 + $0x710] sm:$0xff] }
  0x60   :  { %486 = vmatpush.msra.mxu2 %v220_v62  ;;  %362 = vmatmul.f32.vlgmr.msra.gmra.mxu3 %v1056_v0  ;;  %v64_v35 = vld [vmem:[%s1486_s1 + $0x110] sm:$0xff] }
  0x61   :  { %381 = vmatpush.msrb.mxu0 %v31_v1  ;;  %506 = vmatpush.msra.mxu3 %v284_v3  ;;  %v128_v36 = vld [vmem:[%s1486_s1 + $0x310] sm:$0xff]  ;;  %v221_v1 = vld [vmem:[%s1486_s1 + $0x5f8] sm:$0xff] }
  0x62   :  { %487 = vmatpush.msra.mxu2 %v216_v2  ;;  %401 = vmatpush.msrb.mxu1 %v95_v4  ;;  %v184_v37 = vld [vmem:[%s1486_s1 + $0x4d0] sm:$0xff] }
  0x63   :  { %302 = vmatmul.f32.vlgmr.msra.gmra.mxu0 %v1074_v5  ;;  %322 = vmatmul.f32.vlgmr.msra.gmra.mxu1 %v1080_v6  ;;  %v252_v38 = vld [vmem:[%s1486_s1 + $0x6f0] sm:$0xff] }
  0x64   :  { %446 = vmatpush.msra.mxu0 %v92_v7  ;;  %466 = vmatpush.msra.mxu1 %v156_v8  ;;  %v60_v39 = vld [vmem:[%s1486_s1 + $0xf0] sm:$0xff]  ;;  %v217_v7 = vld [vmem:[%s1486_s1 + $0x5d8] sm:$0xff] }
  0x65   :  { %488 = vmatpush.msra.mxu2 %v212_v9  ;;  %507 = vmatpush.msra.mxu3 %v280_v10  ;;  %v124_v40 = vld [vmem:[%s1486_s1 + $0x2f0] sm:$0xff]  ;;  %v285_v8 = vld [vmem:[%s1486_s1 + $0x7f8] sm:$0xff] }
  0x66   :  { %447 = vmatpush.msra.mxu0 %v88_v11  ;;  %467 = vmatpush.msra.mxu1 %v152_v12  ;;  %v180_v41 = vld [vmem:[%s1486_s1 + $0x4b0] sm:$0xff]  ;;  %v93_v11 = vld [vmem:[%s1486_s1 + $0x1f8] sm:$0xff] }
  0x67   :  { %489 = vmatpush.msra.mxu2 %v208_v13  ;;  %508 = vmatpush.msra.mxu3 %v276_v14  ;;  %v248_v42 = vld [vmem:[%s1486_s1 + $0x6d0] sm:$0xff]  ;;  %v157_v12 = vld [vmem:[%s1486_s1 + $0x3f8] sm:$0xff] }
  0x68   :  { %448 = vmatpush.msra.mxu0 %v84_v15  ;;  %468 = vmatpush.msra.mxu1 %v148_v16  ;;  %v56_v43 = vld [vmem:[%s1486_s1 + $0xd0] sm:$0xff]  ;;  %v213_v13 = vld [vmem:[%s1486_s1 + $0x5b8] sm:$0xff] }
  0x69   :  { %490 = vmatpush.msra.mxu2 %v204_v17  ;;  %509 = vmatpush.msra.mxu3 %v272_v18  ;;  %v120_v44 = vld [vmem:[%s1486_s1 + $0x2d0] sm:$0xff]  ;;  %v281_v14 = vld [vmem:[%s1486_s1 + $0x7d8] sm:$0xff] }
  0x6a   :  { %449 = vmatpush.msra.mxu0 %v80_v19  ;;  %469 = vmatpush.msra.mxu1 %v144_v20  ;;  %v176_v45 = vld [vmem:[%s1486_s1 + $0x490] sm:$0xff]  ;;  %v89_v15 = vld [vmem:[%s1486_s1 + $0x1d8] sm:$0xff] }
  0x6b   :  { %491 = vmatpush.msra.mxu2 %v200_v21  ;;  %510 = vmatpush.msra.mxu3 %v268_v22  ;;  %v244_v46 = vld [vmem:[%s1486_s1 + $0x6b0] sm:$0xff]  ;;  %v153_v16 = vld [vmem:[%s1486_s1 + $0x3d8] sm:$0xff] }
  0x6c   :  { %450 = vmatpush.msra.mxu0 %v76_v23  ;;  %470 = vmatpush.msra.mxu1 %v140_v24  ;;  %v52_v47 = vld [vmem:[%s1486_s1 + $0xb0] sm:$0xff]  ;;  %v209_v17 = vld [vmem:[%s1486_s1 + $0x598] sm:$0xff] }
  0x6d   :  { %492 = vmatpush.msra.mxu2 %v196_v25  ;;  %511 = vmatpush.msra.mxu3 %v264_v26  ;;  %v116_v48 = vld [vmem:[%s1486_s1 + $0x2b0] sm:$0xff]  ;;  %v277_v18 = vld [vmem:[%s1486_s1 + $0x7b8] sm:$0xff] }
  0x6e   :  { %451 = vmatpush.msra.mxu0 %v72_v27  ;;  %471 = vmatpush.msra.mxu1 %v136_v28  ;;  %v172_v49 = vld [vmem:[%s1486_s1 + $0x470] sm:$0xff]  ;;  %v85_v19 = vld [vmem:[%s1486_s1 + $0x1b8] sm:$0xff] }
  0x6f   :  { %493 = vmatpush.msra.mxu2 %v192_v29  ;;  %512 = vmatpush.msra.mxu3 %v260_v30  ;;  %v240_v50 = vld [vmem:[%s1486_s1 + $0x690] sm:$0xff]  ;;  %v149_v20 = vld [vmem:[%s1486_s1 + $0x3b8] sm:$0xff] }
  0x70   :  { %452 = vmatpush.msra.mxu0 %v68_v31  ;;  %472 = vmatpush.msra.mxu1 %v132_v32  ;;  %v48_v51 = vld [vmem:[%s1486_s1 + $0x90] sm:$0xff]  ;;  %v205_v21 = vld [vmem:[%s1486_s1 + $0x578] sm:$0xff] }
  0x71   :  { %494 = vmatpush.msra.mxu2 %v188_v33  ;;  %513 = vmatpush.msra.mxu3 %v256_v34  ;;  %v112_v52 = vld [vmem:[%s1486_s1 + $0x290] sm:$0xff]  ;;  %v273_v22 = vld [vmem:[%s1486_s1 + $0x798] sm:$0xff] }
  0x72   :  { %453 = vmatpush.msra.mxu0 %v64_v35  ;;  %473 = vmatpush.msra.mxu1 %v128_v36  ;;  %v168_v53 = vld [vmem:[%s1486_s1 + $0x450] sm:$0xff]  ;;  %v81_v23 = vld [vmem:[%s1486_s1 + $0x198] sm:$0xff] }
  0x73   :  { %495 = vmatpush.msra.mxu2 %v184_v37  ;;  %514 = vmatpush.msra.mxu3 %v252_v38  ;;  %v236_v54 = vld [vmem:[%s1486_s1 + $0x670] sm:$0xff]  ;;  %v145_v24 = vld [vmem:[%s1486_s1 + $0x398] sm:$0xff] }
  0x74   :  { %454 = vmatpush.msra.mxu0 %v60_v39  ;;  %474 = vmatpush.msra.mxu1 %v124_v40  ;;  %v44_v55 = vld [vmem:[%s1486_s1 + $0x70] sm:$0xff]  ;;  %v201_v25 = vld [vmem:[%s1486_s1 + $0x558] sm:$0xff] }
  0x75   :  { %496 = vmatpush.msra.mxu2 %v180_v41  ;;  %515 = vmatpush.msra.mxu3 %v248_v42  ;;  %v108_v56 = vld [vmem:[%s1486_s1 + $0x270] sm:$0xff]  ;;  %v269_v26 = vld [vmem:[%s1486_s1 + $0x778] sm:$0xff] }
  0x76   :  { %455 = vmatpush.msra.mxu0 %v56_v43  ;;  %475 = vmatpush.msra.mxu1 %v120_v44  ;;  %v164_v57 = vld [vmem:[%s1486_s1 + $0x430] sm:$0xff]  ;;  %v77_v27 = vld [vmem:[%s1486_s1 + $0x178] sm:$0xff] }
  0x77   :  { %497 = vmatpush.msra.mxu2 %v176_v45  ;;  %516 = vmatpush.msra.mxu3 %v244_v46  ;;  %v232_v58 = vld [vmem:[%s1486_s1 + $0x650] sm:$0xff]  ;;  %v141_v28 = vld [vmem:[%s1486_s1 + $0x378] sm:$0xff] }
  0x78   :  { %456 = vmatpush.msra.mxu0 %v52_v47  ;;  %476 = vmatpush.msra.mxu1 %v116_v48  ;;  %v40_v59 = vld [vmem:[%s1486_s1 + $0x50] sm:$0xff]  ;;  %v197_v29 = vld [vmem:[%s1486_s1 + $0x538] sm:$0xff] }
  0x79   :  { %498 = vmatpush.msra.mxu2 %v172_v49  ;;  %517 = vmatpush.msra.mxu3 %v240_v50  ;;  %v104_v61 = vld [vmem:[%s1486_s1 + $0x250] sm:$0xff]  ;;  %v265_v30 = vld [vmem:[%s1486_s1 + $0x758] sm:$0xff] }
  0x7a   :  { %457 = vmatpush.msra.mxu0 %v48_v51  ;;  %477 = vmatpush.msra.mxu1 %v112_v52  ;;  %v160_v62 = vld [vmem:[%s1486_s1 + $0x410] sm:$0xff]  ;;  %v73_v31 = vld [vmem:[%s1486_s1 + $0x158] sm:$0xff] }
  0x7b   :  { %499 = vmatpush.msra.mxu2 %v168_v53  ;;  %518 = vmatpush.msra.mxu3 %v236_v54  ;;  %v228_v63 = vld [vmem:[%s1486_s1 + $0x630] sm:$0xff]  ;;  %v137_v32 = vld [vmem:[%s1486_s1 + $0x358] sm:$0xff] }
  0x7c   :  { %458 = vmatpush.msra.mxu0 %v44_v55  ;;  %478 = vmatpush.msra.mxu1 %v108_v56  ;;  %v36_v2 = vld [vmem:[%s1486_s1 + $0x30] sm:$0xff]  ;;  %v193_v33 = vld [vmem:[%s1486_s1 + $0x518] sm:$0xff] }
  0x7d   :  { %500 = vmatpush.msra.mxu2 %v164_v57  ;;  %519 = vmatpush.msra.mxu3 %v232_v58  ;;  %v100_v3 = vld [vmem:[%s1486_s1 + $0x230] sm:$0xff]  ;;  %v261_v34 = vld [vmem:[%s1486_s1 + $0x738] sm:$0xff] }
  0x7e   :  { %459 = vmatpush.msra.mxu0 %v40_v59  ;;  %479 = vmatpush.msra.mxu1 %v104_v61  ;;  %v224_v4 = vld [vmem:[%s1486_s1 + $0x610] sm:$0xff]  ;;  %v69_v35 = vld [vmem:[%s1486_s1 + $0x138] sm:$0xff] }
  0x7f   :  { %501 = vmatpush.msra.mxu2 %v160_v62  ;;  %520 = vmatpush.msra.mxu3 %v228_v63  ;;  %v32_v9 = vld [vmem:[%s1486_s1 + $0x10] sm:$0xff]  ;;  %v133_v36 = vld [vmem:[%s1486_s1 + $0x338] sm:$0xff] }
  0x80   :  { %422 = vmatmul.f32.vlgmr.msrb.gmra.mxu2 %v1042_v60  ;;  %460 = vmatpush.msra.mxu0 %v36_v2  ;;  %v96_v10 = vld [vmem:[%s1486_s1 + $0x210] sm:$0xff]  ;;  %v189_v37 = vld [vmem:[%s1486_s1 + $0x4f8] sm:$0xff] }
  0x81   :  { %566 = vmatpush.msrb.mxu2 %v221_v1  ;;  %480 = vmatpush.msra.mxu1 %v100_v3  ;;  %v257_v38 = vld [vmem:[%s1486_s1 + $0x718] sm:$0xff] }
  0x82   :  { %521 = vmatpush.msra.mxu3 %v224_v4  ;;  %461 = vmatpush.msra.mxu0 %v32_v9  ;;  %v65_v39 = vld [vmem:[%s1486_s1 + $0x118] sm:$0xff] }
  0x83   :  { %442 = vmatmul.f32.vlgmr.msrb.gmra.mxu3 %v1056_v0  ;;  %567 = vmatpush.msrb.mxu2 %v217_v7  ;;  %v129_v40 = vld [vmem:[%s1486_s1 + $0x318] sm:$0xff] }
  0x84   :  { %586 = vmatpush.msrb.mxu3 %v285_v8  ;;  %481 = vmatpush.msra.mxu1 %v96_v10  ;;  %v185_v41 = vld [vmem:[%s1486_s1 + $0x4d8] sm:$0xff] }
  0x85   :  { %382 = vmatmul.f32.vlgmr.msrb.gmra.mxu0 %v1074_v5  ;;  %402 = vmatmul.f32.vlgmr.msrb.gmra.mxu1 %v1080_v6  ;;  %v253_v42 = vld [vmem:[%s1486_s1 + $0x6f8] sm:$0xff] }
  0x86   :  { %526 = vmatpush.msrb.mxu0 %v93_v11  ;;  %546 = vmatpush.msrb.mxu1 %v157_v12  ;;  %v61_v43 = vld [vmem:[%s1486_s1 + $0xf8] sm:$0xff] }
  0x87   :  { %568 = vmatpush.msrb.mxu2 %v213_v13  ;;  %587 = vmatpush.msrb.mxu3 %v281_v14  ;;  %v125_v44 = vld [vmem:[%s1486_s1 + $0x2f8] sm:$0xff]  ;;  %v621_v13 = vld [vmem:[%s1488_s2] sm:$0xf] }
  0x88   :  { %527 = vmatpush.msrb.mxu0 %v89_v15  ;;  %547 = vmatpush.msrb.mxu1 %v153_v16  ;;  %v181_v45 = vld [vmem:[%s1486_s1 + $0x4b8] sm:$0xff] }
  0x89   :  { %569 = vmatpush.msrb.mxu2 %v209_v17  ;;  %588 = vmatpush.msrb.mxu3 %v277_v18  ;;  %v249_v46 = vld [vmem:[%s1486_s1 + $0x6d8] sm:$0xff]  ;;  %v623_v18 = vperm.slane %v621_v13, 0 }
  0x8a   :  { %528 = vmatpush.msrb.mxu0 %v85_v19  ;;  %548 = vmatpush.msrb.mxu1 %v149_v20  ;;  %v57_v47 = vld [vmem:[%s1486_s1 + $0xd8] sm:$0xff] }
  0x8b   :  { %570 = vmatpush.msrb.mxu2 %v205_v21  ;;  %589 = vmatpush.msrb.mxu3 %v273_v22  ;;  %v121_v48 = vld [vmem:[%s1486_s1 + $0x2d8] sm:$0xff] }
  0x8c   :  { %529 = vmatpush.msrb.mxu0 %v81_v23  ;;  %549 = vmatpush.msrb.mxu1 %v145_v24  ;;  %v177_v49 = vld [vmem:[%s1486_s1 + $0x498] sm:$0xff] }
  0x8d   :  { %571 = vmatpush.msrb.mxu2 %v201_v25  ;;  %590 = vmatpush.msrb.mxu3 %v269_v26  ;;  %v245_v50 = vld [vmem:[%s1486_s1 + $0x6b8] sm:$0xff]  ;;  %v624_v25 = vperm.slane %v621_v13, 1 }
  0x8e   :  { %530 = vmatpush.msrb.mxu0 %v77_v27  ;;  %550 = vmatpush.msrb.mxu1 %v141_v28  ;;  %v53_v51 = vld [vmem:[%s1486_s1 + $0xb8] sm:$0xff] }
  0x8f   :  { %572 = vmatpush.msrb.mxu2 %v197_v29  ;;  %591 = vmatpush.msrb.mxu3 %v265_v30  ;;  %v117_v52 = vld [vmem:[%s1486_s1 + $0x2b8] sm:$0xff] }
  0x90   :  { %531 = vmatpush.msrb.mxu0 %v73_v31  ;;  %551 = vmatpush.msrb.mxu1 %v137_v32  ;;  %v173_v53 = vld [vmem:[%s1486_s1 + $0x478] sm:$0xff] }
  0x91   :  { %573 = vmatpush.msrb.mxu2 %v193_v33  ;;  %592 = vmatpush.msrb.mxu3 %v261_v34  ;;  %v241_v54 = vld [vmem:[%s1486_s1 + $0x698] sm:$0xff] }
  0x92   :  { %532 = vmatpush.msrb.mxu0 %v69_v35  ;;  %552 = vmatpush.msrb.mxu1 %v133_v36  ;;  %v49_v55 = vld [vmem:[%s1486_s1 + $0x98] sm:$0xff]  ;;  %v625_v35 = vperm.slane %v621_v13, 2 }
  0x93   :  { %574 = vmatpush.msrb.mxu2 %v189_v37  ;;  %593 = vmatpush.msrb.mxu3 %v257_v38  ;;  %v113_v56 = vld [vmem:[%s1486_s1 + $0x298] sm:$0xff] }
  0x94   :  { %533 = vmatpush.msrb.mxu0 %v65_v39  ;;  %553 = vmatpush.msrb.mxu1 %v129_v40  ;;  %v169_v57 = vld [vmem:[%s1486_s1 + $0x458] sm:$0xff] }
  0x95   :  { %575 = vmatpush.msrb.mxu2 %v185_v41  ;;  %594 = vmatpush.msrb.mxu3 %v253_v42  ;;  %v237_v58 = vld [vmem:[%s1486_s1 + $0x678] sm:$0xff] }
  0x96   :  { %534 = vmatpush.msrb.mxu0 %v61_v43  ;;  %554 = vmatpush.msrb.mxu1 %v125_v44  ;;  %v45_v59 = vld [vmem:[%s1486_s1 + $0x78] sm:$0xff]  ;;  %v626_v44 = vperm.slane %v621_v13, 3 }
  0x97   :  { %576 = vmatpush.msrb.mxu2 %v181_v45  ;;  %595 = vmatpush.msrb.mxu3 %v249_v46  ;;  %v109_v61 = vld [vmem:[%s1486_s1 + $0x278] sm:$0xff] }
  0x98   :  { %535 = vmatpush.msrb.mxu0 %v57_v47  ;;  %555 = vmatpush.msrb.mxu1 %v121_v48  ;;  %v165_v62 = vld [vmem:[%s1486_s1 + $0x438] sm:$0xff] }
  0x99   :  { %577 = vmatpush.msrb.mxu2 %v177_v49  ;;  %596 = vmatpush.msrb.mxu3 %v245_v50  ;;  %v233_v63 = vld [vmem:[%s1486_s1 + $0x658] sm:$0xff] }
  0x9a   :  { %502 = vmatmul.f32.vlgmr.msra.gmra.mxu2 %v1042_v60  ;;  %536 = vmatpush.msrb.mxu0 %v53_v51  ;;  %v41_v1 = vld [vmem:[%s1486_s1 + $0x58] sm:$0xff] }
  0x9b   :  { %556 = vmatpush.msrb.mxu1 %v117_v52  ;;  %578 = vmatpush.msrb.mxu2 %v173_v53  ;;  %v105_v2 = vld [vmem:[%s1486_s1 + $0x258] sm:$0xff] }
  0x9c   :  { %597 = vmatpush.msrb.mxu3 %v241_v54  ;;  %537 = vmatpush.msrb.mxu0 %v49_v55  ;;  %v161_v3 = vld [vmem:[%s1486_s1 + $0x418] sm:$0xff] }
  0x9d   :  { %522 = vmatmul.f32.vlgmr.msra.gmra.mxu3 %v1056_v0  ;;  %557 = vmatpush.msrb.mxu1 %v113_v56  ;;  %v229_v4 = vld [vmem:[%s1486_s1 + $0x638] sm:$0xff] }
  0x9e   :  { %579 = vmatpush.msrb.mxu2 %v169_v57  ;;  %598 = vmatpush.msrb.mxu3 %v237_v58  ;;  %v37_v7 = vld [vmem:[%s1486_s1 + $0x38] sm:$0xff] }
  0x9f   :  { %462 = vmatmul.f32.vlgmr.msra.gmra.mxu0 %v1074_v5  ;;  %482 = vmatmul.f32.vlgmr.msra.gmra.mxu1 %v1080_v6  ;;  %v101_v8 = vld [vmem:[%s1486_s1 + $0x238] sm:$0xff] }
  0xa0   :  { %538 = vmatpush.msrb.mxu0 %v45_v59  ;;  %558 = vmatpush.msrb.mxu1 %v109_v61  ;;  %v225_v9 = vld [vmem:[%s1486_s1 + $0x618] sm:$0xff] }
  0xa1   :  { %580 = vmatpush.msrb.mxu2 %v165_v62  ;;  %599 = vmatpush.msrb.mxu3 %v233_v63  ;;  %v33_v10 = vld [vmem:[%s1486_s1 + $0x18] sm:$0xff] }
  0xa2   :  { %539 = vmatpush.msrb.mxu0 %v41_v1  ;;  %559 = vmatpush.msrb.mxu1 %v105_v2  ;;  %v97_v11 = vld [vmem:[%s1486_s1 + $0x218] sm:$0xff] }
  0xa3   :  { %581 = vmatpush.msrb.mxu2 %v161_v3  ;;  %600 = vmatpush.msrb.mxu3 %v229_v4 }
  0xa4   :  { %582 = vmatmul.f32.vlgmr.msrb.gmra.mxu2 %v1042_v60  ;;  %540 = vmatpush.msrb.mxu0 %v37_v7 }
  0xa5   :  { %560 = vmatpush.msrb.mxu1 %v101_v8  ;;  %601 = vmatpush.msrb.mxu3 %v225_v9 }
  0xa6   :  { %602 = vmatmul.f32.vlgmr.msrb.gmra.mxu3 %v1056_v0  ;;  %541 = vmatpush.msrb.mxu0 %v33_v10 }
  0xa7   :  { %561 = vmatpush.msrb.mxu1 %v97_v11  ;;  %542 = vmatmul.f32.vlgmr.msrb.gmra.mxu0 %v1074_v5 }
  0xa8   :  { %562 = vmatmul.f32.vlgmr.msrb.gmra.mxu1 %v1080_v6 }
  0xc2   :  { %v343_v15 = vpop.f32.mrf.mxu2 }
  0xe0   :  { %v303_v60 = vpop.f32.mrf.mxu0  ;;  %v323_v12 = vpop.f32.mrf.mxu1 }
  0xe1   :  { %v324_v14 = vadd.f32 %v323_v12, %v303_v60 }
  0xe3   :  { %v344_v16 = vadd.f32 %v343_v15, %v324_v14  ;;  %v363_v17 = vpop.f32.mrf.mxu3 }
  0xe5   :  { %v364_v19 = vadd.f32 %v363_v17, %v344_v16 }
  0xe7   :  { %v631_v20 = vadd.f32 %v623_v18, %v364_v19 }
  0xe9   :  { %v635_v0 = vmax.f32 %v631_v20, 0.0 }
  0xeb   :  { %639 = vst [vmem:[%s1489_s3] sm:$0xff] %v635_v0 }
 0x102   :  { %v383_v5 = vpop.f32.mrf.mxu0  ;;  %v403_v6 = vpop.f32.mrf.mxu1 }
 0x103   :  { %v423_v21 = vpop.f32.mrf.mxu2  ;;  %v404_v22 = vadd.f32 %v403_v6, %v383_v5 }
 0x105   :  { %v424_v23 = vadd.f32 %v423_v21, %v404_v22 }
 0x106   :  { %v443_v24 = vpop.f32.mrf.mxu3 }
 0x107   :  { %v444_v26 = vadd.f32 %v443_v24, %v424_v23 }
 0x109   :  { %v632_v27 = vadd.f32 %v624_v25, %v444_v26 }
 0x10b   :  { %v636_v28 = vmax.f32 %v632_v27, 0.0 }
 0x10d   :  { %640 = vst [vmem:[%s1489_s3 + $0x8] sm:$0xff] %v636_v28 }
 0x11c   :  { %v463_v29 = vpop.f32.mrf.mxu0  ;;  %v483_v30 = vpop.f32.mrf.mxu1 }
 0x11d   :  { %v503_v31 = vpop.f32.mrf.mxu2  ;;  %v484_v32 = vadd.f32 %v483_v30, %v463_v29 }
 0x11f   :  { %v504_v33 = vadd.f32 %v503_v31, %v484_v32 }
 0x120   :  { %v523_v34 = vpop.f32.mrf.mxu3 }
 0x121   :  { %v524_v36 = vadd.f32 %v523_v34, %v504_v33 }
 0x123   :  { %v633_v37 = vadd.f32 %v625_v35, %v524_v36 }
 0x124   :  { %v543_v38 = vpop.f32.mrf.mxu0 }
 0x125   :  { %v637_v39 = vmax.f32 %v633_v37, 0.0  ;;  %v563_v40 = vpop.f32.mrf.mxu1 }
 0x126   :  { %v564_v41 = vadd.f32 %v563_v40, %v543_v38 }
 0x127   :  { %v583_v42 = vpop.f32.mrf.mxu2  ;;  %641 = vst [vmem:[%s1489_s3 + $0x10] sm:$0xff] %v637_v39 }
 0x128   :  { %v584_v43 = vadd.f32 %v583_v42, %v564_v41 }
 0x129   :  { %v603_v45 = vpop.f32.mrf.mxu3 }
 0x12a   :  { %v604_v46 = vadd.f32 %v603_v45, %v584_v43 }
 0x12c   :  { %v634_v47 = vadd.f32 %v626_v44, %v604_v46 }
 0x12e   :  { %v638_v48 = vmax.f32 %v634_v47, 0.0 }
 0x130   :  { %642 = vst [vmem:[%s1489_s3 + $0x18] sm:$0xff] %v638_v48 }

</bundles_post_ra>
